<compile_context>
chip_gen: v7x
topology: tpu7x:2x2x1
jax: 0.10.0
libtpu: 0.0.40
codegen_flags: <defaults>
</compile_context>

<pallas_src>
import functools

import numpy as np
import jax
import jax.numpy as jnp
from jax.experimental import pallas as pl
from jax.experimental.pallas import tpu as pltpu

LEAKY_SLOPE = 0.2


# ---------------------------------------------------------------------------
# Kernel 1: fused dense layer   y = act(x @ w + b)
# ---------------------------------------------------------------------------
def _linear_kernel(x_ref, w_ref, b_ref, o_ref, *, act):
    y = jnp.dot(x_ref[...], w_ref[...], preferred_element_type=jnp.float32)
    y = y + b_ref[...]
    if act == "leaky":
        y = jnp.where(y >= 0, y, LEAKY_SLOPE * y)
    elif act == "square":
        y = y * y
    elif act == "sigmoid_sq":
        y = 1.0 / (1.0 + jnp.exp(-y))
        y = y * y
    o_ref[...] = y.astype(o_ref.dtype)


def fused_linear(x, w, b, *, act="none", out_dtype=jnp.bfloat16):
    """x: (M, K) bf16, w: (K, N) bf16, b: (1, N) f32 -> (M, N) out_dtype."""
    M, K = x.shape
    K2, N = w.shape
    assert K == K2 and b.shape == (1, N)
    assert M % 8 == 0, M
    tm = next(t for t in (256, 128, 64, 32, 16, 8) if M % t == 0)
    return pl.pallas_call(
        functools.partial(_linear_kernel, act=act),
        out_shape=jax.ShapeDtypeStruct((M, N), out_dtype),
        grid_spec=pltpu.PrefetchScalarGridSpec(
            num_scalar_prefetch=0,
            grid=(M // tm,),
            in_specs=[
                pl.BlockSpec((tm, K), lambda i: (i, 0)),
                pl.BlockSpec((K, N), lambda i: (0, 0)),
                pl.BlockSpec((1, N), lambda i: (0, 0)),
            ],
            out_specs=pl.BlockSpec((tm, N), lambda i: (i, 0)),
        ),
        compiler_params=pltpu.CompilerParams(
            dimension_semantics=("parallel",)),
    )(x, w, b)


# ---------------------------------------------------------------------------
# Kernel 2: ConvTranspose1d(k=4, s=2, p=1) + folded BN + LeakyReLU(0.2)
# channels-last, even/odd output phases computed from a single VMEM tile.
#   out[2t]   = x[t] @ W1 + x[t-1] @ W3 + b
#   out[2t+1] = x[t] @ W2 + x[t+1] @ W0 + b
# ---------------------------------------------------------------------------
def _convt_k4s2_kernel(x_ref, w_ref, b_ref, o_ref):
    cout = b_ref.shape[1]
    x = x_ref[0]                                            # (L, Cin) bf16
    zero = jnp.zeros((1, x.shape[1]), x.dtype)
    x_prev = jnp.concatenate([zero, x[:-1]], axis=0)        # x[t-1]
    x_next = jnp.concatenate([x[1:], zero], axis=0)         # x[t+1]
    b = b_ref[...]                                          # (1, Cout) f32
    even = (jnp.dot(x, w_ref[1], preferred_element_type=jnp.float32)
            + jnp.dot(x_prev, w_ref[3], preferred_element_type=jnp.float32)
            + b)
    odd = (jnp.dot(x, w_ref[2], preferred_element_type=jnp.float32)
           + jnp.dot(x_next, w_ref[0], preferred_element_type=jnp.float32)
           + b)
    even = jnp.where(even >= 0, even, LEAKY_SLOPE * even)
    odd = jnp.where(odd >= 0, odd, LEAKY_SLOPE * odd)
    o_ref[0, :, :cout] = even.astype(o_ref.dtype)
    o_ref[0, :, cout:] = odd.astype(o_ref.dtype)


def conv_transpose_up(x, w_taps, b):
    """x: (BE, L, Cin) bf16, w_taps: (4, Cin, Cout) bf16 (BN folded),
    b: (1, Cout) f32 (BN folded)  ->  (BE, 2L, Cout) bf16."""
    BE, L, Cin = x.shape
    Cout = w_taps.shape[2]
    out = pl.pallas_call(
        _convt_k4s2_kernel,
        out_shape=jax.ShapeDtypeStruct((BE, L, 2 * Cout), jnp.bfloat16),
        grid_spec=pltpu.PrefetchScalarGridSpec(
            num_scalar_prefetch=0,
            grid=(BE,),
            in_specs=[
                pl.BlockSpec((1, L, Cin), lambda i: (i, 0, 0)),
                pl.BlockSpec((4, Cin, Cout), lambda i: (0, 0, 0)),
                pl.BlockSpec((1, Cout), lambda i: (0, 0)),
            ],
            out_specs=pl.BlockSpec((1, L, 2 * Cout), lambda i: (i, 0, 0)),
        ),
        compiler_params=pltpu.CompilerParams(
            dimension_semantics=("parallel",)),
    )(x, w_taps, b)
    # (BE, L, 2C) -> (BE, 2L, C): row-major reshape interleaves even/odd phases.
    return out.reshape(BE, 2 * L, Cout)


# ---------------------------------------------------------------------------
# Kernel 3: Conv1d(k=3, s=1, p=1), channels-last, taps shifted in VMEM.
# ---------------------------------------------------------------------------
def _conv_k3s1_kernel(x_ref, w_ref, b_ref, o_ref, *, act):
    x = x_ref[0]                                            # (L, Cin)
    zero = jnp.zeros((1, x.shape[1]), x.dtype)
    x_prev = jnp.concatenate([zero, x[:-1]], axis=0)
    x_next = jnp.concatenate([x[1:], zero], axis=0)
    y = (jnp.dot(x_prev, w_ref[0], preferred_element_type=jnp.float32)
         + jnp.dot(x, w_ref[1], preferred_element_type=jnp.float32)
         + jnp.dot(x_next, w_ref[2], preferred_element_type=jnp.float32)
         + b_ref[...])
    if act == "leaky":
        y = jnp.where(y >= 0, y, LEAKY_SLOPE * y)
    o_ref[0] = y.astype(o_ref.dtype)


def conv_k3(x, w_taps, b, *, act="none"):
    """x: (BE, L, Cin) bf16, w_taps: (3, Cin, Cout) bf16, b: (1, Cout) f32."""
    BE, L, Cin = x.shape
    Cout = w_taps.shape[2]
    return pl.pallas_call(
        functools.partial(_conv_k3s1_kernel, act=act),
        out_shape=jax.ShapeDtypeStruct((BE, L, Cout), jnp.bfloat16),
        grid_spec=pltpu.PrefetchScalarGridSpec(
            num_scalar_prefetch=0,
            grid=(BE,),
            in_specs=[
                pl.BlockSpec((1, L, Cin), lambda i: (i, 0, 0)),
                pl.BlockSpec((3, Cin, Cout), lambda i: (0, 0, 0)),
                pl.BlockSpec((1, Cout), lambda i: (0, 0)),
            ],
            out_specs=pl.BlockSpec((1, L, Cout), lambda i: (i, 0, 0)),
        ),
        compiler_params=pltpu.CompilerParams(
            dimension_semantics=("parallel",)),
    )(x, w_taps, b)


# ---------------------------------------------------------------------------
# Kernel 4: out = audio * (env_sq @ M)
#   M is the precomputed linear-interpolation matrix (n_frames -> n_samples),
#   so F.interpolate(mode='linear') + the final multiply are fused.
# ---------------------------------------------------------------------------
def _env_mul_kernel(e_ref, m_ref, a_ref, o_ref):
    env = jnp.dot(e_ref[...], m_ref[...], preferred_element_type=jnp.float32)
    o_ref[...] = (a_ref[...] * env).astype(o_ref.dtype)


def apply_env(audio, env_sq, interp_m):
    """audio: (BE, S) f32, env_sq: (BE, F) bf16, interp_m: (F, S) bf16."""
    BE, S = audio.shape
    F = env_sq.shape[1]
    ts = next((t for t in (2048, 1024, 512, 256, 128) if S % t == 0), S)
    return pl.pallas_call(
        _env_mul_kernel,
        out_shape=jax.ShapeDtypeStruct((BE, S), jnp.float32),
        grid_spec=pltpu.PrefetchScalarGridSpec(
            num_scalar_prefetch=0,
            grid=(S // ts,),
            in_specs=[
                pl.BlockSpec((BE, F), lambda j: (0, 0)),
                pl.BlockSpec((F, ts), lambda j: (0, j)),
                pl.BlockSpec((BE, ts), lambda j: (0, j)),
            ],
            out_specs=pl.BlockSpec((BE, ts), lambda j: (0, j)),
        ),
        compiler_params=pltpu.CompilerParams(
            dimension_semantics=("parallel",)),
    )(env_sq, interp_m, audio)


# ---------------------------------------------------------------------------
# Parameter construction (PyTorch-default-like init) + offline prep / BN fold.
# ---------------------------------------------------------------------------
def _uniform(key, shape, bound):
    return jax.random.uniform(key, shape, jnp.float32, -bound, bound)


def _linear_init(key, f_in, f_out):
    k1, k2 = jax.random.split(key)
    bound = 1.0 / np.sqrt(f_in)
    return _uniform(k1, (f_out, f_in), bound), _uniform(k2, (f_out,), bound)


def _conv_init(key, c_out, c_in, k):
    k1, k2 = jax.random.split(key)
    bound = 1.0 / np.sqrt(c_in * k)
    return _uniform(k1, (c_out, c_in, k), bound), _uniform(k2, (c_out,), bound)


def _convt_init(key, c_in, c_out, k):
    k1, k2 = jax.random.split(key)
    bound = 1.0 / np.sqrt(c_in * k)
    return _uniform(k1, (c_in, c_out, k), bound), _uniform(k2, (c_out,), bound)


def _fold_bn(gamma, beta, mean, var, eps=1e-5):
    scale = gamma / jnp.sqrt(var + eps)
    shift = beta - mean * scale
    return scale, shift


def _linear_interp_matrix(n_in, n_out):
    """F.interpolate(mode='linear', align_corners=False) as a (n_in, n_out) matrix."""
    idx = np.arange(n_out)
    src = np.clip((idx + 0.5) * (n_in / n_out) - 0.5, 0.0, n_in - 1)
    i0 = np.floor(src).astype(np.int64)
    i1 = np.minimum(i0 + 1, n_in - 1)
    frac = (src - i0).astype(np.float32)
    m = np.zeros((n_in, n_out), np.float32)
    m[i0, idx] += 1.0 - frac
    m[i1, idx] += frac
    return m


def init_params(key, *, latent_dim, channels, n_samples, start_size=4):
    n_frames = n_samples // 256
    n_noise_frames = n_frames * 4
    noise_window = 2 * (n_samples // n_noise_frames)
    noise_coeffs = noise_window // 2 + 1
    n_up_frames = int(np.log2(n_frames) - np.log2(start_size))
    n_up_noise = int(np.log2(n_noise_frames) - np.log2(n_frames))

    keys = iter(jax.random.split(key, 8 + n_up_frames + n_up_noise))
    p = {}

    # to_env = nn.Linear(latent_dim, n_frames)
    w, b = _linear_init(next(keys), latent_dim, n_frames)
    p["to_env"] = (w.T.astype(jnp.bfloat16), b.reshape(1, -1))

    # to_frames.begin = nn.Linear(latent_dim, channels*start_size); columns
    # permuted so the output reshapes directly into channels-last (BE, start, C).
    w, b = _linear_init(next(keys), latent_dim, channels * start_size)
    wt = w.T.reshape(latent_dim, channels, start_size).transpose(0, 2, 1)
    wt = wt.reshape(latent_dim, start_size * channels)
    bt = b.reshape(channels, start_size).T.reshape(1, start_size * channels)
    p["begin"] = (wt.astype(jnp.bfloat16), bt)

    def convt_bn_layer(k):
        w, b = _convt_init(k, channels, channels, 4)          # (Cin, Cout, 4)
        gamma = jnp.ones((channels,), jnp.float32)            # fresh BN, eval mode
        beta = jnp.zeros((channels,), jnp.float32)
        mean = jnp.zeros((channels,), jnp.float32)
        var = jnp.ones((channels,), jnp.float32)
        scale, shift = _fold_bn(gamma, beta, mean, var)
        wt = jnp.transpose(w, (2, 0, 1)) * scale[None, None, :]   # (4, Cin, Cout)
        bt = b * scale + shift
        return wt.astype(jnp.bfloat16), bt.reshape(1, -1)

    def conv3_layer(k, c_in, c_out):
        w, b = _conv_init(k, c_out, c_in, 3)                  # (Cout, Cin, 3)
        wt = jnp.transpose(w, (2, 1, 0))                      # (3, Cin, Cout)
        return wt.astype(jnp.bfloat16), b.reshape(1, -1)

    p["frames_up"] = [convt_bn_layer(next(keys)) for _ in range(n_up_frames)]
    p["frames_final"] = conv3_layer(next(keys), channels, channels)
    p["noise_up"] = [convt_bn_layer(next(keys)) for _ in range(n_up_noise)]
    p["noise_final"] = conv3_layer(next(keys), channels, channels)

    # to_noise_spec = nn.Conv1d(channels, noise_coeffs, 1)
    w, b = _conv_init(next(keys), noise_coeffs, channels, 1)
    p["to_spec"] = (w[:, :, 0].T.astype(jnp.bfloat16), b.reshape(1, -1))

    p["interp_m"] = jnp.asarray(_linear_interp_matrix(n_frames, n_samples),
                                jnp.bfloat16)

    cfg = dict(latent_dim=latent_dim, channels=channels, n_samples=n_samples,
               n_frames=n_frames, n_noise_frames=n_noise_frames,
               noise_window=noise_window, noise_coeffs=noise_coeffs,
               start_size=start_size, mask_after=1)
    return p, cfg


# ---------------------------------------------------------------------------
# GenerateImpulse forward pass.
# ---------------------------------------------------------------------------
def generate_impulse_forward(params, cfg, x, noise):
    B, E, D = x.shape
    BE = B * E
    C = cfg["channels"]
    NF = cfg["n_noise_frames"]
    S = cfg["n_samples"]
    W = cfg["noise_window"]
    hop = W // 2

    xb = x.reshape(BE, D).astype(jnp.bfloat16)

    # env = (to_env(x))**2 ; its linear interpolation is fused into apply_env.
    w, b = params["to_env"]
    env_sq = fused_linear(xb, w, b, act="square")             # (BE, F) bf16

    # to_frames: ConvUpsample latent -> (BE, n_frames, C) channels-last.
    w, b = params["begin"]
    h = fused_linear(xb, w, b, act="none")                    # (BE, start*C)
    h = h.reshape(BE, cfg["start_size"], C)
    for wt, bt in params["frames_up"]:
        h = conv_transpose_up(h, wt, bt)                      # length doubles
    w, b = params["frames_final"]
    h = conv_k3(h, w, b, act="none")                          # (BE, n_frames, C)

    # noise_model: upsample frames, project to per-frame noise spectra.
    for wt, bt in params["noise_up"]:
        h = conv_transpose_up(h, wt, bt)
    w, b = params["noise_final"]
    h = conv_k3(h, w, b, act="none")                          # (BE, NF, C)

    w, b = params["to_spec"]
    spec = fused_linear(h.reshape(BE * NF, C), w, b,
                        act="sigmoid_sq", out_dtype=jnp.float32)
    spec = spec.reshape(BE, NF, -1)                           # (BE, NF, coeffs)
    frame_mask = (jnp.arange(NF) < cfg["mask_after"]).astype(spec.dtype)
    spec = spec * frame_mask[None, :, None]                   # impulse: 1 frame

    # frequency-domain filtering of white noise + windowed overlap-add (jnp).
    noise_spec = jnp.fft.rfft(noise, axis=-1, norm="ortho")
    frames = jnp.fft.irfft(noise_spec * spec, n=W, axis=-1, norm="ortho")
    win = jnp.asarray(np.hanning(W), jnp.float32)
    frames = frames.astype(jnp.float32) * win[None, None, :]

    even = frames[:, 0::2, :].reshape(BE, -1)
    odd = frames[:, 1::2, :].reshape(BE, -1)
    total = (NF - 1) * hop + W
    audio = jnp.zeros((BE, total), jnp.float32)
    audio = audio.at[:, :even.shape[1]].add(even)
    audio = audio.at[:, hop:hop + odd.shape[1]].add(odd)
    audio = audio[:, :S]                                      # (BE, n_samples)

    # x.view(-1, n_events, n_samples) * interpolate(env) -- fused Pallas kernel.
    out = apply_env(audio, env_sq, params["interp_m"])        # (BE, S) f32
    return out.reshape(B, E, S)


# ---------------------------------------------------------------------------
if __name__ == "__main__":
    # Scaled-down shapes (original: n_samples=32768, n_events=16, channels~128).
    B = 2
    n_events = 4
    latent_dim = 32
    channels = 32
    n_samples = 4096          # -> n_frames=16, n_noise_frames=64, window=128

    key = jax.random.PRNGKey(0)
    k_params, k_x, k_noise = jax.random.split(key, 3)
    params, cfg = init_params(k_params, latent_dim=latent_dim,
                              channels=channels, n_samples=n_samples)

    x = jax.random.normal(k_x, (B, n_events, latent_dim), jnp.float32)
    noise = jax.random.uniform(
        k_noise, (B * n_events, cfg["n_noise_frames"], cfg["noise_window"]),
        jnp.float32, -1.0, 1.0)

    @jax.jit
    def fwd(params, x, noise):
        return generate_impulse_forward(params, cfg, x, noise)

    out = jax.block_until_ready(fwd(params, x, noise))

    assert out.shape == (B, n_events, n_samples), out.shape
    assert bool(jnp.all(jnp.isfinite(out)))
    print("KERNEL_OK")
</pallas_src>

<mosaic_0001>
module attributes {stable_mosaic.version = 11 : i64} {
  func.func @_linear_kernel(%arg0: i32, %arg1: memref<8x32xbf16, #tpu.memory_space<vmem>>, %arg2: memref<32x128xbf16, #tpu.memory_space<vmem>>, %arg3: memref<1x128xf32, #tpu.memory_space<vmem>>, %arg4: memref<8x128xbf16, #tpu.memory_space<vmem>>) attributes {dimension_semantics = [#tpu.dimension_semantics<parallel>], iteration_bounds = array<i64: 1>, scalar_prefetch = 0 : i64, scratch_operands = 0 : i64, tpu.core_type = #tpu.core_type<tc>, window_params = [{transform_indices = @transform_0, window_bounds = array<i64: 8, 32>}, {pipeline_mode = #tpu.pipeline_mode<synchronous>, transform_indices = @transform_1, window_bounds = array<i64: 32, 128>}, {pipeline_mode = #tpu.pipeline_mode<synchronous>, transform_indices = @transform_2, window_bounds = array<i64: 1, 128>}, {transform_indices = @transform_3, window_bounds = array<i64: 8, 128>}]} {
    %c0 = arith.constant 0 : index
    %c0_0 = arith.constant 0 : index
    %0 = vector.load %arg1[%c0, %c0_0] : memref<8x32xbf16, #tpu.memory_space<vmem>>, vector<8x32xbf16>
    %c0_1 = arith.constant 0 : index
    %c0_2 = arith.constant 0 : index
    %1 = vector.load %arg2[%c0_1, %c0_2] : memref<32x128xbf16, #tpu.memory_space<vmem>>, vector<32x128xbf16>
    %cst = arith.constant dense<0.000000e+00> : vector<8x128xf32>
    %2 = tpu.matmul %0, %1, %cst {dimension_numbers = #tpu.dot_dimension_numbers<[1], [0], [0], [1], [0, 0, 1, 1], [], []>} : vector<8x32xbf16>, vector<32x128xbf16>, vector<8x128xf32> -> vector<8x128xf32>
    %c0_3 = arith.constant 0 : index
    %c0_4 = arith.constant 0 : index
    %3 = vector.load %arg3[%c0_3, %c0_4] : memref<1x128xf32, #tpu.memory_space<vmem>>, vector<1x128xf32>
    %4 = vector.broadcast %3 : vector<1x128xf32> to vector<8x128xf32>
    %5 = arith.addf %2, %4 : vector<8x128xf32>
    %6 = arith.truncf %5 : vector<8x128xf32> to vector<8x128xbf16>
    %c0_5 = arith.constant 0 : index
    %c0_6 = arith.constant 0 : index
    %7 = vector.load %arg4[%c0_5, %c0_6] : memref<8x128xbf16, #tpu.memory_space<vmem>>, vector<8x128xbf16>
    tpu.vector_store %arg4[%c0_5, %c0_6], %6 {strides = array<i32>} : memref<8x128xbf16, #tpu.memory_space<vmem>>, vector<8x128xbf16>,
    return
  }
  func.func @transform_0(%arg0: i32) -> (i32, i32) {
    %c0_i32 = arith.constant 0 : i32
    %c0_i32_0 = arith.constant 0 : i32
    return %arg0, %c0_i32 : i32, i32
  }
  func.func @transform_1(%arg0: i32) -> (i32, i32) {
    %c0_i32 = arith.constant 0 : i32
    %c0_i32_0 = arith.constant 0 : i32
    %c0_i32_1 = arith.constant 0 : i32
    return %c0_i32, %c0_i32_0 : i32, i32
  }
  func.func @transform_2(%arg0: i32) -> (i32, i32) {
    %c0_i32 = arith.constant 0 : i32
    %c0_i32_0 = arith.constant 0 : i32
    %c0_i32_1 = arith.constant 0 : i32
    return %c0_i32, %c0_i32_0 : i32, i32
  }
  func.func @transform_3(%arg0: i32) -> (i32, i32) {
    %c0_i32 = arith.constant 0 : i32
    %c0_i32_0 = arith.constant 0 : i32
    return %arg0, %c0_i32 : i32, i32
  }
}

module attributes {stable_mosaic.version = 11 : i64} {
  func.func @_convt_k4s2_kernel(%arg0: i32, %arg1: memref<1x4x32xbf16, #tpu.memory_space<vmem>>, %arg2: memref<4x32x32xbf16, #tpu.memory_space<vmem>>, %arg3: memref<1x32xf32, #tpu.memory_space<vmem>>, %arg4: memref<1x4x64xbf16, #tpu.memory_space<vmem>>) attributes {dimension_semantics = [#tpu.dimension_semantics<parallel>], iteration_bounds = array<i64: 8>, scalar_prefetch = 0 : i64, scratch_operands = 0 : i64, tpu.core_type = #tpu.core_type<tc>, window_params = [{transform_indices = @transform_0, window_bounds = array<i64: 1, 4, 32>}, {pipeline_mode = #tpu.pipeline_mode<synchronous>, transform_indices = @transform_1, window_bounds = array<i64: 4, 32, 32>}, {pipeline_mode = #tpu.pipeline_mode<synchronous>, transform_indices = @transform_2, window_bounds = array<i64: 1, 32>}, {transform_indices = @transform_3, window_bounds = array<i64: 1, 4, 64>}]} {
    %c0 = arith.constant 0 : index
    %c0_0 = arith.constant 0 : index
    %c0_1 = arith.constant 0 : index
    %0 = vector.load %arg1[%c0, %c0_0, %c0_1] : memref<1x4x32xbf16, #tpu.memory_space<vmem>>, vector<1x4x32xbf16>
    %1 = vector.shape_cast %0 : vector<1x4x32xbf16> to vector<4x32xbf16>
    %cst = arith.constant 0.000000e+00 : bf16
    %2 = vector.broadcast %cst : bf16 to vector<1x32xbf16>
    %3 = vector.extract_strided_slice %1 {offsets = [0, 0], sizes = [3, 32], strides = [1, 1]} : vector<4x32xbf16> to vector<3x32xbf16>
    %4 = tpu.concatenate %2, %3 in 0 : vector<1x32xbf16>, vector<3x32xbf16> -> vector<4x32xbf16>
    %5 = vector.extract_strided_slice %1 {offsets = [1, 0], sizes = [3, 32], strides = [1, 1]} : vector<4x32xbf16> to vector<3x32xbf16>
    %6 = tpu.concatenate %5, %2 in 0 : vector<3x32xbf16>, vector<1x32xbf16> -> vector<4x32xbf16>
    %c0_2 = arith.constant 0 : index
    %c0_3 = arith.constant 0 : index
    %7 = vector.load %arg3[%c0_2, %c0_3] : memref<1x32xf32, #tpu.memory_space<vmem>>, vector<1x32xf32>
    %c1 = arith.constant 1 : index
    %c0_4 = arith.constant 0 : index
    %c0_5 = arith.constant 0 : index
    %8 = vector.load %arg2[%c1, %c0_4, %c0_5] : memref<4x32x32xbf16, #tpu.memory_space<vmem>>, vector<1x32x32xbf16>
    %9 = vector.shape_cast %8 : vector<1x32x32xbf16> to vector<32x32xbf16>
    %cst_6 = arith.constant dense<0.000000e+00> : vector<4x32xf32>
    %10 = tpu.matmul %1, %9, %cst_6 {dimension_numbers = #tpu.dot_dimension_numbers<[1], [0], [0], [1], [0, 0, 1, 1], [], []>} : vector<4x32xbf16>, vector<32x32xbf16>, vector<4x32xf32> -> vector<4x32xf32>
    %c3 = arith.constant 3 : index
    %c0_7 = arith.constant 0 : index
    %c0_8 = arith.constant 0 : index
    %11 = vector.load %arg2[%c3, %c0_7, %c0_8] : memref<4x32x32xbf16, #tpu.memory_space<vmem>>, vector<1x32x32xbf16>
    %12 = vector.shape_cast %11 : vector<1x32x32xbf16> to vector<32x32xbf16>
    %cst_9 = arith.constant dense<0.000000e+00> : vector<4x32xf32>
    %13 = tpu.matmul %4, %12, %cst_9 {dimension_numbers = #tpu.dot_dimension_numbers<[1], [0], [0], [1], [0, 0, 1, 1], [], []>} : vector<4x32xbf16>, vector<32x32xbf16>, vector<4x32xf32> -> vector<4x32xf32>
    %14 = arith.addf %10, %13 : vector<4x32xf32>
    %15 = vector.broadcast %7 : vector<1x32xf32> to vector<4x32xf32>
    %16 = arith.addf %14, %15 : vector<4x32xf32>
    %c2 = arith.constant 2 : index
    %c0_10 = arith.constant 0 : index
    %c0_11 = arith.constant 0 : index
    %17 = vector.load %arg2[%c2, %c0_10, %c0_11] : memref<4x32x32xbf16, #tpu.memory_space<vmem>>, vector<1x32x32xbf16>
    %18 = vector.shape_cast %17 : vector<1x32x32xbf16> to vector<32x32xbf16>
    %cst_12 = arith.constant dense<0.000000e+00> : vector<4x32xf32>
    %19 = tpu.matmul %1, %18, %cst_12 {dimension_numbers = #tpu.dot_dimension_numbers<[1], [0], [0], [1], [0, 0, 1, 1], [], []>} : vector<4x32xbf16>, vector<32x32xbf16>, vector<4x32xf32> -> vector<4x32xf32>
    %c0_13 = arith.constant 0 : index
    %c0_14 = arith.constant 0 : index
    %c0_15 = arith.constant 0 : index
    %20 = vector.load %arg2[%c0_13, %c0_14, %c0_15] : memref<4x32x32xbf16, #tpu.memory_space<vmem>>, vector<1x32x32xbf16>
    %21 = vector.shape_cast %20 : vector<1x32x32xbf16> to vector<32x32xbf16>
    %cst_16 = arith.constant dense<0.000000e+00> : vector<4x32xf32>
    %22 = tpu.matmul %6, %21, %cst_16 {dimension_numbers = #tpu.dot_dimension_numbers<[1], [0], [0], [1], [0, 0, 1, 1], [], []>} : vector<4x32xbf16>, vector<32x32xbf16>, vector<4x32xf32> -> vector<4x32xf32>
    %23 = arith.addf %19, %22 : vector<4x32xf32>
    %24 = vector.broadcast %7 : vector<1x32xf32> to vector<4x32xf32>
    %25 = arith.addf %23, %24 : vector<4x32xf32>
    %cst_17 = arith.constant 0.000000e+00 : f32
    %26 = vector.broadcast %cst_17 : f32 to vector<4x32xf32>
    %27 = arith.cmpf oge, %16, %26 : vector<4x32xf32>
    %cst_18 = arith.constant 2.000000e-01 : f32
    %28 = vector.broadcast %cst_18 : f32 to vector<4x32xf32>
    %29 = arith.mulf %28, %16 : vector<4x32xf32>
    %30 = arith.select %27, %16, %29 : vector<4x32xi1>, vector<4x32xf32>
    %cst_19 = arith.constant 0.000000e+00 : f32
    %31 = vector.broadcast %cst_19 : f32 to vector<4x32xf32>
    %32 = arith.cmpf oge, %25, %31 : vector<4x32xf32>
    %cst_20 = arith.constant 2.000000e-01 : f32
    %33 = vector.broadcast %cst_20 : f32 to vector<4x32xf32>
    %34 = arith.mulf %33, %25 : vector<4x32xf32>
    %35 = arith.select %32, %25, %34 : vector<4x32xi1>, vector<4x32xf32>
    %36 = arith.truncf %30 : vector<4x32xf32> to vector<4x32xbf16>
    %c0_21 = arith.constant 0 : index
    %c0_22 = arith.constant 0 : index
    %c0_23 = arith.constant 0 : index
    %37 = vector.load %arg4[%c0_21, %c0_22, %c0_23] : memref<1x4x64xbf16, #tpu.memory_space<vmem>>, vector<1x4x32xbf16>
    %38 = vector.shape_cast %37 : vector<1x4x32xbf16> to vector<4x32xbf16>
    %39 = vector.shape_cast %36 : vector<4x32xbf16> to vector<1x4x32xbf16>
    tpu.vector_store %arg4[%c0_21, %c0_22, %c0_23], %39 {strides = array<i32>} : memref<1x4x64xbf16, #tpu.memory_space<vmem>>, vector<1x4x32xbf16>,
    %40 = arith.truncf %35 : vector<4x32xf32> to vector<4x32xbf16>
    %c0_24 = arith.constant 0 : index
    %c0_25 = arith.constant 0 : index
    %c32 = arith.constant 32 : index
    %41 = vector.load %arg4[%c0_24, %c0_25, %c32] : memref<1x4x64xbf16, #tpu.memory_space<vmem>>, vector<1x4x32xbf16>
    %42 = vector.shape_cast %41 : vector<1x4x32xbf16> to vector<4x32xbf16>
    %43 = vector.shape_cast %40 : vector<4x32xbf16> to vector<1x4x32xbf16>
    tpu.vector_store %arg4[%c0_24, %c0_25, %c32], %43 {strides = array<i32>} : memref<1x4x64xbf16, #tpu.memory_space<vmem>>, vector<1x4x32xbf16>,
    return
  }
  func.func @transform_0(%arg0: i32) -> (i32, i32, i32) {
    %c0_i32 = arith.constant 0 : i32
    %c0_i32_0 = arith.constant 0 : i32
    %c0_i32_1 = arith.constant 0 : i32
    return %arg0, %c0_i32, %c0_i32_0 : i32, i32, i32
  }
  func.func @transform_1(%arg0: i32) -> (i32, i32, i32) {
    %c0_i32 = arith.constant 0 : i32
    %c0_i32_0 = arith.constant 0 : i32
    %c0_i32_1 = arith.constant 0 : i32
    %c0_i32_2 = arith.constant 0 : i32
    return %c0_i32, %c0_i32_0, %c0_i32_1 : i32, i32, i32
  }
  func.func @transform_2(%arg0: i32) -> (i32, i32) {
    %c0_i32 = arith.constant 0 : i32
    %c0_i32_0 = arith.constant 0 : i32
    %c0_i32_1 = arith.constant 0 : i32
    return %c0_i32, %c0_i32_0 : i32, i32
  }
  func.func @transform_3(%arg0: i32) -> (i32, i32, i32) {
    %c0_i32 = arith.constant 0 : i32
    %c0_i32_0 = arith.constant 0 : i32
    %c0_i32_1 = arith.constant 0 : i32
    return %arg0, %c0_i32, %c0_i32_0 : i32, i32, i32
  }
}

module attributes {stable_mosaic.version = 11 : i64} {
  func.func @_conv_k3s1_kernel(%arg0: i32, %arg1: memref<1x16x32xbf16, #tpu.memory_space<vmem>>, %arg2: memref<3x32x32xbf16, #tpu.memory_space<vmem>>, %arg3: memref<1x32xf32, #tpu.memory_space<vmem>>, %arg4: memref<1x16x32xbf16, #tpu.memory_space<vmem>>) attributes {dimension_semantics = [#tpu.dimension_semantics<parallel>], iteration_bounds = array<i64: 8>, scalar_prefetch = 0 : i64, scratch_operands = 0 : i64, tpu.core_type = #tpu.core_type<tc>, window_params = [{transform_indices = @transform_0, window_bounds = array<i64: 1, 16, 32>}, {pipeline_mode = #tpu.pipeline_mode<synchronous>, transform_indices = @transform_1, window_bounds = array<i64: 3, 32, 32>}, {pipeline_mode = #tpu.pipeline_mode<synchronous>, transform_indices = @transform_2, window_bounds = array<i64: 1, 32>}, {transform_indices = @transform_3, window_bounds = array<i64: 1, 16, 32>}]} {
    %c0 = arith.constant 0 : index
    %c0_0 = arith.constant 0 : index
    %c0_1 = arith.constant 0 : index
    %0 = vector.load %arg1[%c0, %c0_0, %c0_1] : memref<1x16x32xbf16, #tpu.memory_space<vmem>>, vector<1x16x32xbf16>
    %1 = vector.shape_cast %0 : vector<1x16x32xbf16> to vector<16x32xbf16>
    %cst = arith.constant 0.000000e+00 : bf16
    %2 = vector.broadcast %cst : bf16 to vector<1x32xbf16>
    %3 = vector.extract_strided_slice %1 {offsets = [0, 0], sizes = [15, 32], strides = [1, 1]} : vector<16x32xbf16> to vector<15x32xbf16>
    %4 = tpu.concatenate %2, %3 in 0 : vector<1x32xbf16>, vector<15x32xbf16> -> vector<16x32xbf16>
    %5 = vector.extract_strided_slice %1 {offsets = [1, 0], sizes = [15, 32], strides = [1, 1]} : vector<16x32xbf16> to vector<15x32xbf16>
    %6 = tpu.concatenate %5, %2 in 0 : vector<15x32xbf16>, vector<1x32xbf16> -> vector<16x32xbf16>
    %c0_2 = arith.constant 0 : index
    %c0_3 = arith.constant 0 : index
    %c0_4 = arith.constant 0 : index
    %7 = vector.load %arg2[%c0_2, %c0_3, %c0_4] : memref<3x32x32xbf16, #tpu.memory_space<vmem>>, vector<1x32x32xbf16>
    %8 = vector.shape_cast %7 : vector<1x32x32xbf16> to vector<32x32xbf16>
    %cst_5 = arith.constant dense<0.000000e+00> : vector<16x32xf32>
    %9 = tpu.matmul %4, %8, %cst_5 {dimension_numbers = #tpu.dot_dimension_numbers<[1], [0], [0], [1], [0, 0, 1, 1], [], []>} : vector<16x32xbf16>, vector<32x32xbf16>, vector<16x32xf32> -> vector<16x32xf32>
    %c1 = arith.constant 1 : index
    %c0_6 = arith.constant 0 : index
    %c0_7 = arith.constant 0 : index
    %10 = vector.load %arg2[%c1, %c0_6, %c0_7] : memref<3x32x32xbf16, #tpu.memory_space<vmem>>, vector<1x32x32xbf16>
    %11 = vector.shape_cast %10 : vector<1x32x32xbf16> to vector<32x32xbf16>
    %cst_8 = arith.constant dense<0.000000e+00> : vector<16x32xf32>
    %12 = tpu.matmul %1, %11, %cst_8 {dimension_numbers = #tpu.dot_dimension_numbers<[1], [0], [0], [1], [0, 0, 1, 1], [], []>} : vector<16x32xbf16>, vector<32x32xbf16>, vector<16x32xf32> -> vector<16x32xf32>
    %13 = arith.addf %9, %12 : vector<16x32xf32>
    %c2 = arith.constant 2 : index
    %c0_9 = arith.constant 0 : index
    %c0_10 = arith.constant 0 : index
    %14 = vector.load %arg2[%c2, %c0_9, %c0_10] : memref<3x32x32xbf16, #tpu.memory_space<vmem>>, vector<1x32x32xbf16>
    %15 = vector.shape_cast %14 : vector<1x32x32xbf16> to vector<32x32xbf16>
    %cst_11 = arith.constant dense<0.000000e+00> : vector<16x32xf32>
    %16 = tpu.matmul %6, %15, %cst_11 {dimension_numbers = #tpu.dot_dimension_numbers<[1], [0], [0], [1], [0, 0, 1, 1], [], []>} : vector<16x32xbf16>, vector<32x32xbf16>, vector<16x32xf32> -> vector<16x32xf32>
    %17 = arith.addf %13, %16 : vector<16x32xf32>
    %c0_12 = arith.constant 0 : index
    %c0_13 = arith.constant 0 : index
    %18 = vector.load %arg3[%c0_12, %c0_13] : memref<1x32xf32, #tpu.memory_space<vmem>>, vector<1x32xf32>
    %19 = vector.broadcast %18 : vector<1x32xf32> to vector<16x32xf32>
    %20 = arith.addf %17, %19 : vector<16x32xf32>
    %21 = arith.truncf %20 : vector<16x32xf32> to vector<16x32xbf16>
    %c0_14 = arith.constant 0 : index
    %c0_15 = arith.constant 0 : index
    %c0_16 = arith.constant 0 : index
    %22 = vector.load %arg4[%c0_14, %c0_15, %c0_16] : memref<1x16x32xbf16, #tpu.memory_space<vmem>>, vector<1x16x32xbf16>
    %23 = vector.shape_cast %22 : vector<1x16x32xbf16> to vector<16x32xbf16>
    %24 = vector.shape_cast %21 : vector<16x32xbf16> to vector<1x16x32xbf16>
    tpu.vector_store %arg4[%c0_14, %c0_15, %c0_16], %24 {strides = array<i32>} : memref<1x16x32xbf16, #tpu.memory_space<vmem>>, vector<1x16x32xbf16>,
    return
  }
  func.func @transform_0(%arg0: i32) -> (i32, i32, i32) {
    %c0_i32 = arith.constant 0 : i32
    %c0_i32_0 = arith.constant 0 : i32
    %c0_i32_1 = arith.constant 0 : i32
    return %arg0, %c0_i32, %c0_i32_0 : i32, i32, i32
  }
  func.func @transform_1(%arg0: i32) -> (i32, i32, i32) {
    %c0_i32 = arith.constant 0 : i32
    %c0_i32_0 = arith.constant 0 : i32
    %c0_i32_1 = arith.constant 0 : i32
    %c0_i32_2 = arith.constant 0 : i32
    return %c0_i32, %c0_i32_0, %c0_i32_1 : i32, i32, i32
  }
  func.func @transform_2(%arg0: i32) -> (i32, i32) {
    %c0_i32 = arith.constant 0 : i32
    %c0_i32_0 = arith.constant 0 : i32
    %c0_i32_1 = arith.constant 0 : i32
    return %c0_i32, %c0_i32_0 : i32, i32
  }
  func.func @transform_3(%arg0: i32) -> (i32, i32, i32) {
    %c0_i32 = arith.constant 0 : i32
    %c0_i32_0 = arith.constant 0 : i32
    %c0_i32_1 = arith.constant 0 : i32
    return %arg0, %c0_i32, %c0_i32_0 : i32, i32, i32
  }
}

module attributes {stable_mosaic.version = 11 : i64} {
  func.func @_convt_k4s2_kernel(%arg0: i32, %arg1: memref<1x8x32xbf16, #tpu.memory_space<vmem>>, %arg2: memref<4x32x32xbf16, #tpu.memory_space<vmem>>, %arg3: memref<1x32xf32, #tpu.memory_space<vmem>>, %arg4: memref<1x8x64xbf16, #tpu.memory_space<vmem>>) attributes {dimension_semantics = [#tpu.dimension_semantics<parallel>], iteration_bounds = array<i64: 8>, scalar_prefetch = 0 : i64, scratch_operands = 0 : i64, tpu.core_type = #tpu.core_type<tc>, window_params = [{transform_indices = @transform_0, window_bounds = array<i64: 1, 8, 32>}, {pipeline_mode = #tpu.pipeline_mode<synchronous>, transform_indices = @transform_1, window_bounds = array<i64: 4, 32, 32>}, {pipeline_mode = #tpu.pipeline_mode<synchronous>, transform_indices = @transform_2, window_bounds = array<i64: 1, 32>}, {transform_indices = @transform_3, window_bounds = array<i64: 1, 8, 64>}]} {
    %c0 = arith.constant 0 : index
    %c0_0 = arith.constant 0 : index
    %c0_1 = arith.constant 0 : index
    %0 = vector.load %arg1[%c0, %c0_0, %c0_1] : memref<1x8x32xbf16, #tpu.memory_space<vmem>>, vector<1x8x32xbf16>
    %1 = vector.shape_cast %0 : vector<1x8x32xbf16> to vector<8x32xbf16>
    %cst = arith.constant 0.000000e+00 : bf16
    %2 = vector.broadcast %cst : bf16 to vector<1x32xbf16>
    %3 = vector.extract_strided_slice %1 {offsets = [0, 0], sizes = [7, 32], strides = [1, 1]} : vector<8x32xbf16> to vector<7x32xbf16>
    %4 = tpu.concatenate %2, %3 in 0 : vector<1x32xbf16>, vector<7x32xbf16> -> vector<8x32xbf16>
    %5 = vector.extract_strided_slice %1 {offsets = [1, 0], sizes = [7, 32], strides = [1, 1]} : vector<8x32xbf16> to vector<7x32xbf16>
    %6 = tpu.concatenate %5, %2 in 0 : vector<7x32xbf16>, vector<1x32xbf16> -> vector<8x32xbf16>
    %c0_2 = arith.constant 0 : index
    %c0_3 = arith.constant 0 : index
    %7 = vector.load %arg3[%c0_2, %c0_3] : memref<1x32xf32, #tpu.memory_space<vmem>>, vector<1x32xf32>
    %c1 = arith.constant 1 : index
    %c0_4 = arith.constant 0 : index
    %c0_5 = arith.constant 0 : index
    %8 = vector.load %arg2[%c1, %c0_4, %c0_5] : memref<4x32x32xbf16, #tpu.memory_space<vmem>>, vector<1x32x32xbf16>
    %9 = vector.shape_cast %8 : vector<1x32x32xbf16> to vector<32x32xbf16>
    %cst_6 = arith.constant dense<0.000000e+00> : vector<8x32xf32>
    %10 = tpu.matmul %1, %9, %cst_6 {dimension_numbers = #tpu.dot_dimension_numbers<[1], [0], [0], [1], [0, 0, 1, 1], [], []>} : vector<8x32xbf16>, vector<32x32xbf16>, vector<8x32xf32> -> vector<8x32xf32>
    %c3 = arith.constant 3 : index
    %c0_7 = arith.constant 0 : index
    %c0_8 = arith.constant 0 : index
    %11 = vector.load %arg2[%c3, %c0_7, %c0_8] : memref<4x32x32xbf16, #tpu.memory_space<vmem>>, vector<1x32x32xbf16>
    %12 = vector.shape_cast %11 : vector<1x32x32xbf16> to vector<32x32xbf16>
    %cst_9 = arith.constant dense<0.000000e+00> : vector<8x32xf32>
    %13 = tpu.matmul %4, %12, %cst_9 {dimension_numbers = #tpu.dot_dimension_numbers<[1], [0], [0], [1], [0, 0, 1, 1], [], []>} : vector<8x32xbf16>, vector<32x32xbf16>, vector<8x32xf32> -> vector<8x32xf32>
    %14 = arith.addf %10, %13 : vector<8x32xf32>
    %15 = vector.broadcast %7 : vector<1x32xf32> to vector<8x32xf32>
    %16 = arith.addf %14, %15 : vector<8x32xf32>
    %c2 = arith.constant 2 : index
    %c0_10 = arith.constant 0 : index
    %c0_11 = arith.constant 0 : index
    %17 = vector.load %arg2[%c2, %c0_10, %c0_11] : memref<4x32x32xbf16, #tpu.memory_space<vmem>>, vector<1x32x32xbf16>
    %18 = vector.shape_cast %17 : vector<1x32x32xbf16> to vector<32x32xbf16>
    %cst_12 = arith.constant dense<0.000000e+00> : vector<8x32xf32>
    %19 = tpu.matmul %1, %18, %cst_12 {dimension_numbers = #tpu.dot_dimension_numbers<[1], [0], [0], [1], [0, 0, 1, 1], [], []>} : vector<8x32xbf16>, vector<32x32xbf16>, vector<8x32xf32> -> vector<8x32xf32>
    %c0_13 = arith.constant 0 : index
    %c0_14 = arith.constant 0 : index
    %c0_15 = arith.constant 0 : index
    %20 = vector.load %arg2[%c0_13, %c0_14, %c0_15] : memref<4x32x32xbf16, #tpu.memory_space<vmem>>, vector<1x32x32xbf16>
    %21 = vector.shape_cast %20 : vector<1x32x32xbf16> to vector<32x32xbf16>
    %cst_16 = arith.constant dense<0.000000e+00> : vector<8x32xf32>
    %22 = tpu.matmul %6, %21, %cst_16 {dimension_numbers = #tpu.dot_dimension_numbers<[1], [0], [0], [1], [0, 0, 1, 1], [], []>} : vector<8x32xbf16>, vector<32x32xbf16>, vector<8x32xf32> -> vector<8x32xf32>
    %23 = arith.addf %19, %22 : vector<8x32xf32>
    %24 = vector.broadcast %7 : vector<1x32xf32> to vector<8x32xf32>
    %25 = arith.addf %23, %24 : vector<8x32xf32>
    %cst_17 = arith.constant 0.000000e+00 : f32
    %26 = vector.broadcast %cst_17 : f32 to vector<8x32xf32>
    %27 = arith.cmpf oge, %16, %26 : vector<8x32xf32>
    %cst_18 = arith.constant 2.000000e-01 : f32
    %28 = vector.broadcast %cst_18 : f32 to vector<8x32xf32>
    %29 = arith.mulf %28, %16 : vector<8x32xf32>
    %30 = arith.select %27, %16, %29 : vector<8x32xi1>, vector<8x32xf32>
    %cst_19 = arith.constant 0.000000e+00 : f32
    %31 = vector.broadcast %cst_19 : f32 to vector<8x32xf32>
    %32 = arith.cmpf oge, %25, %31 : vector<8x32xf32>
    %cst_20 = arith.constant 2.000000e-01 : f32
    %33 = vector.broadcast %cst_20 : f32 to vector<8x32xf32>
    %34 = arith.mulf %33, %25 : vector<8x32xf32>
    %35 = arith.select %32, %25, %34 : vector<8x32xi1>, vector<8x32xf32>
    %36 = arith.truncf %30 : vector<8x32xf32> to vector<8x32xbf16>
    %c0_21 = arith.constant 0 : index
    %c0_22 = arith.constant 0 : index
    %c0_23 = arith.constant 0 : index
    %37 = vector.load %arg4[%c0_21, %c0_22, %c0_23] : memref<1x8x64xbf16, #tpu.memory_space<vmem>>, vector<1x8x32xbf16>
    %38 = vector.shape_cast %37 : vector<1x8x32xbf16> to vector<8x32xbf16>
    %39 = vector.shape_cast %36 : vector<8x32xbf16> to vector<1x8x32xbf16>
    tpu.vector_store %arg4[%c0_21, %c0_22, %c0_23], %39 {strides = array<i32>} : memref<1x8x64xbf16, #tpu.memory_space<vmem>>, vector<1x8x32xbf16>,
    %40 = arith.truncf %35 : vector<8x32xf32> to vector<8x32xbf16>
    %c0_24 = arith.constant 0 : index
    %c0_25 = arith.constant 0 : index
    %c32 = arith.constant 32 : index
    %41 = vector.load %arg4[%c0_24, %c0_25, %c32] : memref<1x8x64xbf16, #tpu.memory_space<vmem>>, vector<1x8x32xbf16>
    %42 = vector.shape_cast %41 : vector<1x8x32xbf16> to vector<8x32xbf16>
    %43 = vector.shape_cast %40 : vector<8x32xbf16> to vector<1x8x32xbf16>
    tpu.vector_store %arg4[%c0_24, %c0_25, %c32], %43 {strides = array<i32>} : memref<1x8x64xbf16, #tpu.memory_space<vmem>>, vector<1x8x32xbf16>,
    return
  }
  func.func @transform_0(%arg0: i32) -> (i32, i32, i32) {
    %c0_i32 = arith.constant 0 : i32
    %c0_i32_0 = arith.constant 0 : i32
    %c0_i32_1 = arith.constant 0 : i32
    return %arg0, %c0_i32, %c0_i32_0 : i32, i32, i32
  }
  func.func @transform_1(%arg0: i32) -> (i32, i32, i32) {
    %c0_i32 = arith.constant 0 : i32
    %c0_i32_0 = arith.constant 0 : i32
    %c0_i32_1 = arith.constant 0 : i32
    %c0_i32_2 = arith.constant 0 : i32
    return %c0_i32, %c0_i32_0, %c0_i32_1 : i32, i32, i32
  }
  func.func @transform_2(%arg0: i32) -> (i32, i32) {
    %c0_i32 = arith.constant 0 : i32
    %c0_i32_0 = arith.constant 0 : i32
    %c0_i32_1 = arith.constant 0 : i32
    return %c0_i32, %c0_i32_0 : i32, i32
  }
  func.func @transform_3(%arg0: i32) -> (i32, i32, i32) {
    %c0_i32 = arith.constant 0 : i32
    %c0_i32_0 = arith.constant 0 : i32
    %c0_i32_1 = arith.constant 0 : i32
    return %arg0, %c0_i32, %c0_i32_0 : i32, i32, i32
  }
}

module attributes {stable_mosaic.version = 11 : i64} {
  func.func @_convt_k4s2_kernel(%arg0: i32, %arg1: memref<1x16x32xbf16, #tpu.memory_space<vmem>>, %arg2: memref<4x32x32xbf16, #tpu.memory_space<vmem>>, %arg3: memref<1x32xf32, #tpu.memory_space<vmem>>, %arg4: memref<1x16x64xbf16, #tpu.memory_space<vmem>>) attributes {dimension_semantics = [#tpu.dimension_semantics<parallel>], iteration_bounds = array<i64: 8>, scalar_prefetch = 0 : i64, scratch_operands = 0 : i64, tpu.core_type = #tpu.core_type<tc>, window_params = [{transform_indices = @transform_0, window_bounds = array<i64: 1, 16, 32>}, {pipeline_mode = #tpu.pipeline_mode<synchronous>, transform_indices = @transform_1, window_bounds = array<i64: 4, 32, 32>}, {pipeline_mode = #tpu.pipeline_mode<synchronous>, transform_indices = @transform_2, window_bounds = array<i64: 1, 32>}, {transform_indices = @transform_3, window_bounds = array<i64: 1, 16, 64>}]} {
    %c0 = arith.constant 0 : index
    %c0_0 = arith.constant 0 : index
    %c0_1 = arith.constant 0 : index
    %0 = vector.load %arg1[%c0, %c0_0, %c0_1] : memref<1x16x32xbf16, #tpu.memory_space<vmem>>, vector<1x16x32xbf16>
    %1 = vector.shape_cast %0 : vector<1x16x32xbf16> to vector<16x32xbf16>
    %cst = arith.constant 0.000000e+00 : bf16
    %2 = vector.broadcast %cst : bf16 to vector<1x32xbf16>
    %3 = vector.extract_strided_slice %1 {offsets = [0, 0], sizes = [15, 32], strides = [1, 1]} : vector<16x32xbf16> to vector<15x32xbf16>
    %4 = tpu.concatenate %2, %3 in 0 : vector<1x32xbf16>, vector<15x32xbf16> -> vector<16x32xbf16>
    %5 = vector.extract_strided_slice %1 {offsets = [1, 0], sizes = [15, 32], strides = [1, 1]} : vector<16x32xbf16> to vector<15x32xbf16>
    %6 = tpu.concatenate %5, %2 in 0 : vector<15x32xbf16>, vector<1x32xbf16> -> vector<16x32xbf16>
    %c0_2 = arith.constant 0 : index
    %c0_3 = arith.constant 0 : index
    %7 = vector.load %arg3[%c0_2, %c0_3] : memref<1x32xf32, #tpu.memory_space<vmem>>, vector<1x32xf32>
    %c1 = arith.constant 1 : index
    %c0_4 = arith.constant 0 : index
    %c0_5 = arith.constant 0 : index
    %8 = vector.load %arg2[%c1, %c0_4, %c0_5] : memref<4x32x32xbf16, #tpu.memory_space<vmem>>, vector<1x32x32xbf16>
    %9 = vector.shape_cast %8 : vector<1x32x32xbf16> to vector<32x32xbf16>
    %cst_6 = arith.constant dense<0.000000e+00> : vector<16x32xf32>
    %10 = tpu.matmul %1, %9, %cst_6 {dimension_numbers = #tpu.dot_dimension_numbers<[1], [0], [0], [1], [0, 0, 1, 1], [], []>} : vector<16x32xbf16>, vector<32x32xbf16>, vector<16x32xf32> -> vector<16x32xf32>
    %c3 = arith.constant 3 : index
    %c0_7 = arith.constant 0 : index
    %c0_8 = arith.constant 0 : index
    %11 = vector.load %arg2[%c3, %c0_7, %c0_8] : memref<4x32x32xbf16, #tpu.memory_space<vmem>>, vector<1x32x32xbf16>
    %12 = vector.shape_cast %11 : vector<1x32x32xbf16> to vector<32x32xbf16>
    %cst_9 = arith.constant dense<0.000000e+00> : vector<16x32xf32>
    %13 = tpu.matmul %4, %12, %cst_9 {dimension_numbers = #tpu.dot_dimension_numbers<[1], [0], [0], [1], [0, 0, 1, 1], [], []>} : vector<16x32xbf16>, vector<32x32xbf16>, vector<16x32xf32> -> vector<16x32xf32>
    %14 = arith.addf %10, %13 : vector<16x32xf32>
    %15 = vector.broadcast %7 : vector<1x32xf32> to vector<16x32xf32>
    %16 = arith.addf %14, %15 : vector<16x32xf32>
    %c2 = arith.constant 2 : index
    %c0_10 = arith.constant 0 : index
    %c0_11 = arith.constant 0 : index
    %17 = vector.load %arg2[%c2, %c0_10, %c0_11] : memref<4x32x32xbf16, #tpu.memory_space<vmem>>, vector<1x32x32xbf16>
    %18 = vector.shape_cast %17 : vector<1x32x32xbf16> to vector<32x32xbf16>
    %cst_12 = arith.constant dense<0.000000e+00> : vector<16x32xf32>
    %19 = tpu.matmul %1, %18, %cst_12 {dimension_numbers = #tpu.dot_dimension_numbers<[1], [0], [0], [1], [0, 0, 1, 1], [], []>} : vector<16x32xbf16>, vector<32x32xbf16>, vector<16x32xf32> -> vector<16x32xf32>
    %c0_13 = arith.constant 0 : index
    %c0_14 = arith.constant 0 : index
    %c0_15 = arith.constant 0 : index
    %20 = vector.load %arg2[%c0_13, %c0_14, %c0_15] : memref<4x32x32xbf16, #tpu.memory_space<vmem>>, vector<1x32x32xbf16>
    %21 = vector.shape_cast %20 : vector<1x32x32xbf16> to vector<32x32xbf16>
    %cst_16 = arith.constant dense<0.000000e+00> : vector<16x32xf32>
    %22 = tpu.matmul %6, %21, %cst_16 {dimension_numbers = #tpu.dot_dimension_numbers<[1], [0], [0], [1], [0, 0, 1, 1], [], []>} : vector<16x32xbf16>, vector<32x32xbf16>, vector<16x32xf32> -> vector<16x32xf32>
    %23 = arith.addf %19, %22 : vector<16x32xf32>
    %24 = vector.broadcast %7 : vector<1x32xf32> to vector<16x32xf32>
    %25 = arith.addf %23, %24 : vector<16x32xf32>
    %cst_17 = arith.constant 0.000000e+00 : f32
    %26 = vector.broadcast %cst_17 : f32 to vector<16x32xf32>
    %27 = arith.cmpf oge, %16, %26 : vector<16x32xf32>
    %cst_18 = arith.constant 2.000000e-01 : f32
    %28 = vector.broadcast %cst_18 : f32 to vector<16x32xf32>
    %29 = arith.mulf %28, %16 : vector<16x32xf32>
    %30 = arith.select %27, %16, %29 : vector<16x32xi1>, vector<16x32xf32>
    %cst_19 = arith.constant 0.000000e+00 : f32
    %31 = vector.broadcast %cst_19 : f32 to vector<16x32xf32>
    %32 = arith.cmpf oge, %25, %31 : vector<16x32xf32>
    %cst_20 = arith.constant 2.000000e-01 : f32
    %33 = vector.broadcast %cst_20 : f32 to vector<16x32xf32>
    %34 = arith.mulf %33, %25 : vector<16x32xf32>
    %35 = arith.select %32, %25, %34 : vector<16x32xi1>, vector<16x32xf32>
    %36 = arith.truncf %30 : vector<16x32xf32> to vector<16x32xbf16>
    %c0_21 = arith.constant 0 : index
    %c0_22 = arith.constant 0 : index
    %c0_23 = arith.constant 0 : index
    %37 = vector.load %arg4[%c0_21, %c0_22, %c0_23] : memref<1x16x64xbf16, #tpu.memory_space<vmem>>, vector<1x16x32xbf16>
    %38 = vector.shape_cast %37 : vector<1x16x32xbf16> to vector<16x32xbf16>
    %39 = vector.shape_cast %36 : vector<16x32xbf16> to vector<1x16x32xbf16>
    tpu.vector_store %arg4[%c0_21, %c0_22, %c0_23], %39 {strides = array<i32>} : memref<1x16x64xbf16, #tpu.memory_space<vmem>>, vector<1x16x32xbf16>,
    %40 = arith.truncf %35 : vector<16x32xf32> to vector<16x32xbf16>
    %c0_24 = arith.constant 0 : index
    %c0_25 = arith.constant 0 : index
    %c32 = arith.constant 32 : index
    %41 = vector.load %arg4[%c0_24, %c0_25, %c32] : memref<1x16x64xbf16, #tpu.memory_space<vmem>>, vector<1x16x32xbf16>
    %42 = vector.shape_cast %41 : vector<1x16x32xbf16> to vector<16x32xbf16>
    %43 = vector.shape_cast %40 : vector<16x32xbf16> to vector<1x16x32xbf16>
    tpu.vector_store %arg4[%c0_24, %c0_25, %c32], %43 {strides = array<i32>} : memref<1x16x64xbf16, #tpu.memory_space<vmem>>, vector<1x16x32xbf16>,
    return
  }
  func.func @transform_0(%arg0: i32) -> (i32, i32, i32) {
    %c0_i32 = arith.constant 0 : i32
    %c0_i32_0 = arith.constant 0 : i32
    %c0_i32_1 = arith.constant 0 : i32
    return %arg0, %c0_i32, %c0_i32_0 : i32, i32, i32
  }
  func.func @transform_1(%arg0: i32) -> (i32, i32, i32) {
    %c0_i32 = arith.constant 0 : i32
    %c0_i32_0 = arith.constant 0 : i32
    %c0_i32_1 = arith.constant 0 : i32
    %c0_i32_2 = arith.constant 0 : i32
    return %c0_i32, %c0_i32_0, %c0_i32_1 : i32, i32, i32
  }
  func.func @transform_2(%arg0: i32) -> (i32, i32) {
    %c0_i32 = arith.constant 0 : i32
    %c0_i32_0 = arith.constant 0 : i32
    %c0_i32_1 = arith.constant 0 : i32
    return %c0_i32, %c0_i32_0 : i32, i32
  }
  func.func @transform_3(%arg0: i32) -> (i32, i32, i32) {
    %c0_i32 = arith.constant 0 : i32
    %c0_i32_0 = arith.constant 0 : i32
    %c0_i32_1 = arith.constant 0 : i32
    return %arg0, %c0_i32, %c0_i32_0 : i32, i32, i32
  }
}

module attributes {stable_mosaic.version = 11 : i64} {
  func.func @_convt_k4s2_kernel(%arg0: i32, %arg1: memref<1x32x32xbf16, #tpu.memory_space<vmem>>, %arg2: memref<4x32x32xbf16, #tpu.memory_space<vmem>>, %arg3: memref<1x32xf32, #tpu.memory_space<vmem>>, %arg4: memref<1x32x64xbf16, #tpu.memory_space<vmem>>) attributes {dimension_semantics = [#tpu.dimension_semantics<parallel>], iteration_bounds = array<i64: 8>, scalar_prefetch = 0 : i64, scratch_operands = 0 : i64, tpu.core_type = #tpu.core_type<tc>, window_params = [{transform_indices = @transform_0, window_bounds = array<i64: 1, 32, 32>}, {pipeline_mode = #tpu.pipeline_mode<synchronous>, transform_indices = @transform_1, window_bounds = array<i64: 4, 32, 32>}, {pipeline_mode = #tpu.pipeline_mode<synchronous>, transform_indices = @transform_2, window_bounds = array<i64: 1, 32>}, {transform_indices = @transform_3, window_bounds = array<i64: 1, 32, 64>}]} {
    %c0 = arith.constant 0 : index
    %c0_0 = arith.constant 0 : index
    %c0_1 = arith.constant 0 : index
    %0 = vector.load %arg1[%c0, %c0_0, %c0_1] : memref<1x32x32xbf16, #tpu.memory_space<vmem>>, vector<1x32x32xbf16>
    %1 = vector.shape_cast %0 : vector<1x32x32xbf16> to vector<32x32xbf16>
    %cst = arith.constant 0.000000e+00 : bf16
    %2 = vector.broadcast %cst : bf16 to vector<1x32xbf16>
    %3 = vector.extract_strided_slice %1 {offsets = [0, 0], sizes = [31, 32], strides = [1, 1]} : vector<32x32xbf16> to vector<31x32xbf16>
    %4 = tpu.concatenate %2, %3 in 0 : vector<1x32xbf16>, vector<31x32xbf16> -> vector<32x32xbf16>
    %5 = vector.extract_strided_slice %1 {offsets = [1, 0], sizes = [31, 32], strides = [1, 1]} : vector<32x32xbf16> to vector<31x32xbf16>
    %6 = tpu.concatenate %5, %2 in 0 : vector<31x32xbf16>, vector<1x32xbf16> -> vector<32x32xbf16>
    %c0_2 = arith.constant 0 : index
    %c0_3 = arith.constant 0 : index
    %7 = vector.load %arg3[%c0_2, %c0_3] : memref<1x32xf32, #tpu.memory_space<vmem>>, vector<1x32xf32>
    %c1 = arith.constant 1 : index
    %c0_4 = arith.constant 0 : index
    %c0_5 = arith.constant 0 : index
    %8 = vector.load %arg2[%c1, %c0_4, %c0_5] : memref<4x32x32xbf16, #tpu.memory_space<vmem>>, vector<1x32x32xbf16>
    %9 = vector.shape_cast %8 : vector<1x32x32xbf16> to vector<32x32xbf16>
    %cst_6 = arith.constant dense<0.000000e+00> : vector<32x32xf32>
    %10 = tpu.matmul %1, %9, %cst_6 {dimension_numbers = #tpu.dot_dimension_numbers<[1], [0], [0], [1], [0, 0, 1, 1], [], []>} : vector<32x32xbf16>, vector<32x32xbf16>, vector<32x32xf32> -> vector<32x32xf32>
    %c3 = arith.constant 3 : index
    %c0_7 = arith.constant 0 : index
    %c0_8 = arith.constant 0 : index
    %11 = vector.load %arg2[%c3, %c0_7, %c0_8] : memref<4x32x32xbf16, #tpu.memory_space<vmem>>, vector<1x32x32xbf16>
    %12 = vector.shape_cast %11 : vector<1x32x32xbf16> to vector<32x32xbf16>
    %cst_9 = arith.constant dense<0.000000e+00> : vector<32x32xf32>
    %13 = tpu.matmul %4, %12, %cst_9 {dimension_numbers = #tpu.dot_dimension_numbers<[1], [0], [0], [1], [0, 0, 1, 1], [], []>} : vector<32x32xbf16>, vector<32x32xbf16>, vector<32x32xf32> -> vector<32x32xf32>
    %14 = arith.addf %10, %13 : vector<32x32xf32>
    %15 = vector.broadcast %7 : vector<1x32xf32> to vector<32x32xf32>
    %16 = arith.addf %14, %15 : vector<32x32xf32>
    %c2 = arith.constant 2 : index
    %c0_10 = arith.constant 0 : index
    %c0_11 = arith.constant 0 : index
    %17 = vector.load %arg2[%c2, %c0_10, %c0_11] : memref<4x32x32xbf16, #tpu.memory_space<vmem>>, vector<1x32x32xbf16>
    %18 = vector.shape_cast %17 : vector<1x32x32xbf16> to vector<32x32xbf16>
    %cst_12 = arith.constant dense<0.000000e+00> : vector<32x32xf32>
    %19 = tpu.matmul %1, %18, %cst_12 {dimension_numbers = #tpu.dot_dimension_numbers<[1], [0], [0], [1], [0, 0, 1, 1], [], []>} : vector<32x32xbf16>, vector<32x32xbf16>, vector<32x32xf32> -> vector<32x32xf32>
    %c0_13 = arith.constant 0 : index
    %c0_14 = arith.constant 0 : index
    %c0_15 = arith.constant 0 : index
    %20 = vector.load %arg2[%c0_13, %c0_14, %c0_15] : memref<4x32x32xbf16, #tpu.memory_space<vmem>>, vector<1x32x32xbf16>
    %21 = vector.shape_cast %20 : vector<1x32x32xbf16> to vector<32x32xbf16>
    %cst_16 = arith.constant dense<0.000000e+00> : vector<32x32xf32>
    %22 = tpu.matmul %6, %21, %cst_16 {dimension_numbers = #tpu.dot_dimension_numbers<[1], [0], [0], [1], [0, 0, 1, 1], [], []>} : vector<32x32xbf16>, vector<32x32xbf16>, vector<32x32xf32> -> vector<32x32xf32>
    %23 = arith.addf %19, %22 : vector<32x32xf32>
    %24 = vector.broadcast %7 : vector<1x32xf32> to vector<32x32xf32>
    %25 = arith.addf %23, %24 : vector<32x32xf32>
    %cst_17 = arith.constant 0.000000e+00 : f32
    %26 = vector.broadcast %cst_17 : f32 to vector<32x32xf32>
    %27 = arith.cmpf oge, %16, %26 : vector<32x32xf32>
    %cst_18 = arith.constant 2.000000e-01 : f32
    %28 = vector.broadcast %cst_18 : f32 to vector<32x32xf32>
    %29 = arith.mulf %28, %16 : vector<32x32xf32>
    %30 = arith.select %27, %16, %29 : vector<32x32xi1>, vector<32x32xf32>
    %cst_19 = arith.constant 0.000000e+00 : f32
    %31 = vector.broadcast %cst_19 : f32 to vector<32x32xf32>
    %32 = arith.cmpf oge, %25, %31 : vector<32x32xf32>
    %cst_20 = arith.constant 2.000000e-01 : f32
    %33 = vector.broadcast %cst_20 : f32 to vector<32x32xf32>
    %34 = arith.mulf %33, %25 : vector<32x32xf32>
    %35 = arith.select %32, %25, %34 : vector<32x32xi1>, vector<32x32xf32>
    %36 = arith.truncf %30 : vector<32x32xf32> to vector<32x32xbf16>
    %c0_21 = arith.constant 0 : index
    %c0_22 = arith.constant 0 : index
    %c0_23 = arith.constant 0 : index
    %37 = vector.load %arg4[%c0_21, %c0_22, %c0_23] : memref<1x32x64xbf16, #tpu.memory_space<vmem>>, vector<1x32x32xbf16>
    %38 = vector.shape_cast %37 : vector<1x32x32xbf16> to vector<32x32xbf16>
    %39 = vector.shape_cast %36 : vector<32x32xbf16> to vector<1x32x32xbf16>
    tpu.vector_store %arg4[%c0_21, %c0_22, %c0_23], %39 {strides = array<i32>} : memref<1x32x64xbf16, #tpu.memory_space<vmem>>, vector<1x32x32xbf16>,
    %40 = arith.truncf %35 : vector<32x32xf32> to vector<32x32xbf16>
    %c0_24 = arith.constant 0 : index
    %c0_25 = arith.constant 0 : index
    %c32 = arith.constant 32 : index
    %41 = vector.load %arg4[%c0_24, %c0_25, %c32] : memref<1x32x64xbf16, #tpu.memory_space<vmem>>, vector<1x32x32xbf16>
    %42 = vector.shape_cast %41 : vector<1x32x32xbf16> to vector<32x32xbf16>
    %43 = vector.shape_cast %40 : vector<32x32xbf16> to vector<1x32x32xbf16>
    tpu.vector_store %arg4[%c0_24, %c0_25, %c32], %43 {strides = array<i32>} : memref<1x32x64xbf16, #tpu.memory_space<vmem>>, vector<1x32x32xbf16>,
    return
  }
  func.func @transform_0(%arg0: i32) -> (i32, i32, i32) {
    %c0_i32 = arith.constant 0 : i32
    %c0_i32_0 = arith.constant 0 : i32
    %c0_i32_1 = arith.constant 0 : i32
    return %arg0, %c0_i32, %c0_i32_0 : i32, i32, i32
  }
  func.func @transform_1(%arg0: i32) -> (i32, i32, i32) {
    %c0_i32 = arith.constant 0 : i32
    %c0_i32_0 = arith.constant 0 : i32
    %c0_i32_1 = arith.constant 0 : i32
    %c0_i32_2 = arith.constant 0 : i32
    return %c0_i32, %c0_i32_0, %c0_i32_1 : i32, i32, i32
  }
  func.func @transform_2(%arg0: i32) -> (i32, i32) {
    %c0_i32 = arith.constant 0 : i32
    %c0_i32_0 = arith.constant 0 : i32
    %c0_i32_1 = arith.constant 0 : i32
    return %c0_i32, %c0_i32_0 : i32, i32
  }
  func.func @transform_3(%arg0: i32) -> (i32, i32, i32) {
    %c0_i32 = arith.constant 0 : i32
    %c0_i32_0 = arith.constant 0 : i32
    %c0_i32_1 = arith.constant 0 : i32
    return %arg0, %c0_i32, %c0_i32_0 : i32, i32, i32
  }
}

module attributes {stable_mosaic.version = 11 : i64} {
  func.func @_conv_k3s1_kernel(%arg0: i32, %arg1: memref<1x64x32xbf16, #tpu.memory_space<vmem>>, %arg2: memref<3x32x32xbf16, #tpu.memory_space<vmem>>, %arg3: memref<1x32xf32, #tpu.memory_space<vmem>>, %arg4: memref<1x64x32xbf16, #tpu.memory_space<vmem>>) attributes {dimension_semantics = [#tpu.dimension_semantics<parallel>], iteration_bounds = array<i64: 8>, scalar_prefetch = 0 : i64, scratch_operands = 0 : i64, tpu.core_type = #tpu.core_type<tc>, window_params = [{transform_indices = @transform_0, window_bounds = array<i64: 1, 64, 32>}, {pipeline_mode = #tpu.pipeline_mode<synchronous>, transform_indices = @transform_1, window_bounds = array<i64: 3, 32, 32>}, {pipeline_mode = #tpu.pipeline_mode<synchronous>, transform_indices = @transform_2, window_bounds = array<i64: 1, 32>}, {transform_indices = @transform_3, window_bounds = array<i64: 1, 64, 32>}]} {
    %c0 = arith.constant 0 : index
    %c0_0 = arith.constant 0 : index
    %c0_1 = arith.constant 0 : index
    %0 = vector.load %arg1[%c0, %c0_0, %c0_1] : memref<1x64x32xbf16, #tpu.memory_space<vmem>>, vector<1x64x32xbf16>
    %1 = vector.shape_cast %0 : vector<1x64x32xbf16> to vector<64x32xbf16>
    %cst = arith.constant 0.000000e+00 : bf16
    %2 = vector.broadcast %cst : bf16 to vector<1x32xbf16>
    %3 = vector.extract_strided_slice %1 {offsets = [0, 0], sizes = [63, 32], strides = [1, 1]} : vector<64x32xbf16> to vector<63x32xbf16>
    %4 = tpu.concatenate %2, %3 in 0 : vector<1x32xbf16>, vector<63x32xbf16> -> vector<64x32xbf16>
    %5 = vector.extract_strided_slice %1 {offsets = [1, 0], sizes = [63, 32], strides = [1, 1]} : vector<64x32xbf16> to vector<63x32xbf16>
    %6 = tpu.concatenate %5, %2 in 0 : vector<63x32xbf16>, vector<1x32xbf16> -> vector<64x32xbf16>
    %c0_2 = arith.constant 0 : index
    %c0_3 = arith.constant 0 : index
    %c0_4 = arith.constant 0 : index
    %7 = vector.load %arg2[%c0_2, %c0_3, %c0_4] : memref<3x32x32xbf16, #tpu.memory_space<vmem>>, vector<1x32x32xbf16>
    %8 = vector.shape_cast %7 : vector<1x32x32xbf16> to vector<32x32xbf16>
    %cst_5 = arith.constant dense<0.000000e+00> : vector<64x32xf32>
    %9 = tpu.matmul %4, %8, %cst_5 {dimension_numbers = #tpu.dot_dimension_numbers<[1], [0], [0], [1], [0, 0, 1, 1], [], []>} : vector<64x32xbf16>, vector<32x32xbf16>, vector<64x32xf32> -> vector<64x32xf32>
    %c1 = arith.constant 1 : index
    %c0_6 = arith.constant 0 : index
    %c0_7 = arith.constant 0 : index
    %10 = vector.load %arg2[%c1, %c0_6, %c0_7] : memref<3x32x32xbf16, #tpu.memory_space<vmem>>, vector<1x32x32xbf16>
    %11 = vector.shape_cast %10 : vector<1x32x32xbf16> to vector<32x32xbf16>
    %cst_8 = arith.constant dense<0.000000e+00> : vector<64x32xf32>
    %12 = tpu.matmul %1, %11, %cst_8 {dimension_numbers = #tpu.dot_dimension_numbers<[1], [0], [0], [1], [0, 0, 1, 1], [], []>} : vector<64x32xbf16>, vector<32x32xbf16>, vector<64x32xf32> -> vector<64x32xf32>
    %13 = arith.addf %9, %12 : vector<64x32xf32>
    %c2 = arith.constant 2 : index
    %c0_9 = arith.constant 0 : index
    %c0_10 = arith.constant 0 : index
    %14 = vector.load %arg2[%c2, %c0_9, %c0_10] : memref<3x32x32xbf16, #tpu.memory_space<vmem>>, vector<1x32x32xbf16>
    %15 = vector.shape_cast %14 : vector<1x32x32xbf16> to vector<32x32xbf16>
    %cst_11 = arith.constant dense<0.000000e+00> : vector<64x32xf32>
    %16 = tpu.matmul %6, %15, %cst_11 {dimension_numbers = #tpu.dot_dimension_numbers<[1], [0], [0], [1], [0, 0, 1, 1], [], []>} : vector<64x32xbf16>, vector<32x32xbf16>, vector<64x32xf32> -> vector<64x32xf32>
    %17 = arith.addf %13, %16 : vector<64x32xf32>
    %c0_12 = arith.constant 0 : index
    %c0_13 = arith.constant 0 : index
    %18 = vector.load %arg3[%c0_12, %c0_13] : memref<1x32xf32, #tpu.memory_space<vmem>>, vector<1x32xf32>
    %19 = vector.broadcast %18 : vector<1x32xf32> to vector<64x32xf32>
    %20 = arith.addf %17, %19 : vector<64x32xf32>
    %21 = arith.truncf %20 : vector<64x32xf32> to vector<64x32xbf16>
    %c0_14 = arith.constant 0 : index
    %c0_15 = arith.constant 0 : index
    %c0_16 = arith.constant 0 : index
    %22 = vector.load %arg4[%c0_14, %c0_15, %c0_16] : memref<1x64x32xbf16, #tpu.memory_space<vmem>>, vector<1x64x32xbf16>
    %23 = vector.shape_cast %22 : vector<1x64x32xbf16> to vector<64x32xbf16>
    %24 = vector.shape_cast %21 : vector<64x32xbf16> to vector<1x64x32xbf16>
    tpu.vector_store %arg4[%c0_14, %c0_15, %c0_16], %24 {strides = array<i32>} : memref<1x64x32xbf16, #tpu.memory_space<vmem>>, vector<1x64x32xbf16>,
    return
  }
  func.func @transform_0(%arg0: i32) -> (i32, i32, i32) {
    %c0_i32 = arith.constant 0 : i32
    %c0_i32_0 = arith.constant 0 : i32
    %c0_i32_1 = arith.constant 0 : i32
    return %arg0, %c0_i32, %c0_i32_0 : i32, i32, i32
  }
  func.func @transform_1(%arg0: i32) -> (i32, i32, i32) {
    %c0_i32 = arith.constant 0 : i32
    %c0_i32_0 = arith.constant 0 : i32
    %c0_i32_1 = arith.constant 0 : i32
    %c0_i32_2 = arith.constant 0 : i32
    return %c0_i32, %c0_i32_0, %c0_i32_1 : i32, i32, i32
  }
  func.func @transform_2(%arg0: i32) -> (i32, i32) {
    %c0_i32 = arith.constant 0 : i32
    %c0_i32_0 = arith.constant 0 : i32
    %c0_i32_1 = arith.constant 0 : i32
    return %c0_i32, %c0_i32_0 : i32, i32
  }
  func.func @transform_3(%arg0: i32) -> (i32, i32, i32) {
    %c0_i32 = arith.constant 0 : i32
    %c0_i32_0 = arith.constant 0 : i32
    %c0_i32_1 = arith.constant 0 : i32
    return %arg0, %c0_i32, %c0_i32_0 : i32, i32, i32
  }
}

module attributes {stable_mosaic.version = 11 : i64} {
  func.func @_linear_kernel(%arg0: i32, %arg1: memref<256x32xbf16, #tpu.memory_space<vmem>>, %arg2: memref<32x65xbf16, #tpu.memory_space<vmem>>, %arg3: memref<1x65xf32, #tpu.memory_space<vmem>>, %arg4: memref<256x65xf32, #tpu.memory_space<vmem>>) attributes {dimension_semantics = [#tpu.dimension_semantics<parallel>], iteration_bounds = array<i64: 2>, scalar_prefetch = 0 : i64, scratch_operands = 0 : i64, tpu.core_type = #tpu.core_type<tc>, window_params = [{transform_indices = @transform_0, window_bounds = array<i64: 256, 32>}, {pipeline_mode = #tpu.pipeline_mode<synchronous>, transform_indices = @transform_1, window_bounds = array<i64: 32, 65>}, {pipeline_mode = #tpu.pipeline_mode<synchronous>, transform_indices = @transform_2, window_bounds = array<i64: 1, 65>}, {transform_indices = @transform_3, window_bounds = array<i64: 256, 65>}]} {
    %c0 = arith.constant 0 : index
    %c0_0 = arith.constant 0 : index
    %0 = vector.load %arg1[%c0, %c0_0] : memref<256x32xbf16, #tpu.memory_space<vmem>>, vector<256x32xbf16>
    %c0_1 = arith.constant 0 : index
    %c0_2 = arith.constant 0 : index
    %1 = vector.load %arg2[%c0_1, %c0_2] : memref<32x65xbf16, #tpu.memory_space<vmem>>, vector<32x65xbf16>
    %cst = arith.constant dense<0.000000e+00> : vector<256x65xf32>
    %2 = tpu.matmul %0, %1, %cst {dimension_numbers = #tpu.dot_dimension_numbers<[1], [0], [0], [1], [0, 0, 1, 1], [], []>} : vector<256x32xbf16>, vector<32x65xbf16>, vector<256x65xf32> -> vector<256x65xf32>
    %c0_3 = arith.constant 0 : index
    %c0_4 = arith.constant 0 : index
    %3 = vector.load %arg3[%c0_3, %c0_4] : memref<1x65xf32, #tpu.memory_space<vmem>>, vector<1x65xf32>
    %4 = vector.broadcast %3 : vector<1x65xf32> to vector<256x65xf32>
    %5 = arith.addf %2, %4 : vector<256x65xf32>
    %cst_5 = arith.constant 0.000000e+00 : f32
    %6 = vector.broadcast %cst_5 : f32 to vector<256x65xf32>
    %7 = arith.subf %6, %5 : vector<256x65xf32>
    %8 = math.exp %7 : vector<256x65xf32>
    %cst_6 = arith.constant 1.000000e+00 : f32
    %9 = vector.broadcast %cst_6 : f32 to vector<256x65xf32>
    %10 = arith.addf %9, %8 : vector<256x65xf32>
    %cst_7 = arith.constant 1.000000e+00 : f32
    %11 = vector.broadcast %cst_7 : f32 to vector<256x65xf32>
    %12 = arith.divf %11, %10 : vector<256x65xf32>
    %13 = arith.mulf %12, %12 : vector<256x65xf32>
    %c0_8 = arith.constant 0 : index
    %c0_9 = arith.constant 0 : index
    %14 = vector.load %arg4[%c0_8, %c0_9] : memref<256x65xf32, #tpu.memory_space<vmem>>, vector<256x65xf32>
    tpu.vector_store %arg4[%c0_8, %c0_9], %13 {strides = array<i32>} : memref<256x65xf32, #tpu.memory_space<vmem>>, vector<256x65xf32>,
    return
  }
  func.func @transform_0(%arg0: i32) -> (i32, i32) {
    %c0_i32 = arith.constant 0 : i32
    %c0_i32_0 = arith.constant 0 : i32
    return %arg0, %c0_i32 : i32, i32
  }
  func.func @transform_1(%arg0: i32) -> (i32, i32) {
    %c0_i32 = arith.constant 0 : i32
    %c0_i32_0 = arith.constant 0 : i32
    %c0_i32_1 = arith.constant 0 : i32
    return %c0_i32, %c0_i32_0 : i32, i32
  }
  func.func @transform_2(%arg0: i32) -> (i32, i32) {
    %c0_i32 = arith.constant 0 : i32
    %c0_i32_0 = arith.constant 0 : i32
    %c0_i32_1 = arith.constant 0 : i32
    return %c0_i32, %c0_i32_0 : i32, i32
  }
  func.func @transform_3(%arg0: i32) -> (i32, i32) {
    %c0_i32 = arith.constant 0 : i32
    %c0_i32_0 = arith.constant 0 : i32
    return %arg0, %c0_i32 : i32, i32
  }
}

module attributes {stable_mosaic.version = 11 : i64} {
  func.func @_linear_kernel(%arg0: i32, %arg1: memref<8x32xbf16, #tpu.memory_space<vmem>>, %arg2: memref<32x16xbf16, #tpu.memory_space<vmem>>, %arg3: memref<1x16xf32, #tpu.memory_space<vmem>>, %arg4: memref<8x16xbf16, #tpu.memory_space<vmem>>) attributes {dimension_semantics = [#tpu.dimension_semantics<parallel>], iteration_bounds = array<i64: 1>, scalar_prefetch = 0 : i64, scratch_operands = 0 : i64, tpu.core_type = #tpu.core_type<tc>, window_params = [{transform_indices = @transform_0, window_bounds = array<i64: 8, 32>}, {pipeline_mode = #tpu.pipeline_mode<synchronous>, transform_indices = @transform_1, window_bounds = array<i64: 32, 16>}, {pipeline_mode = #tpu.pipeline_mode<synchronous>, transform_indices = @transform_2, window_bounds = array<i64: 1, 16>}, {transform_indices = @transform_3, window_bounds = array<i64: 8, 16>}]} {
    %c0 = arith.constant 0 : index
    %c0_0 = arith.constant 0 : index
    %0 = vector.load %arg1[%c0, %c0_0] : memref<8x32xbf16, #tpu.memory_space<vmem>>, vector<8x32xbf16>
    %c0_1 = arith.constant 0 : index
    %c0_2 = arith.constant 0 : index
    %1 = vector.load %arg2[%c0_1, %c0_2] : memref<32x16xbf16, #tpu.memory_space<vmem>>, vector<32x16xbf16>
    %cst = arith.constant dense<0.000000e+00> : vector<8x16xf32>
    %2 = tpu.matmul %0, %1, %cst {dimension_numbers = #tpu.dot_dimension_numbers<[1], [0], [0], [1], [0, 0, 1, 1], [], []>} : vector<8x32xbf16>, vector<32x16xbf16>, vector<8x16xf32> -> vector<8x16xf32>
    %c0_3 = arith.constant 0 : index
    %c0_4 = arith.constant 0 : index
    %3 = vector.load %arg3[%c0_3, %c0_4] : memref<1x16xf32, #tpu.memory_space<vmem>>, vector<1x16xf32>
    %4 = vector.broadcast %3 : vector<1x16xf32> to vector<8x16xf32>
    %5 = arith.addf %2, %4 : vector<8x16xf32>
    %6 = arith.mulf %5, %5 : vector<8x16xf32>
    %7 = arith.truncf %6 : vector<8x16xf32> to vector<8x16xbf16>
    %c0_5 = arith.constant 0 : index
    %c0_6 = arith.constant 0 : index
    %8 = vector.load %arg4[%c0_5, %c0_6] : memref<8x16xbf16, #tpu.memory_space<vmem>>, vector<8x16xbf16>
    tpu.vector_store %arg4[%c0_5, %c0_6], %7 {strides = array<i32>} : memref<8x16xbf16, #tpu.memory_space<vmem>>, vector<8x16xbf16>,
    return
  }
  func.func @transform_0(%arg0: i32) -> (i32, i32) {
    %c0_i32 = arith.constant 0 : i32
    %c0_i32_0 = arith.constant 0 : i32
    return %arg0, %c0_i32 : i32, i32
  }
  func.func @transform_1(%arg0: i32) -> (i32, i32) {
    %c0_i32 = arith.constant 0 : i32
    %c0_i32_0 = arith.constant 0 : i32
    %c0_i32_1 = arith.constant 0 : i32
    return %c0_i32, %c0_i32_0 : i32, i32
  }
  func.func @transform_2(%arg0: i32) -> (i32, i32) {
    %c0_i32 = arith.constant 0 : i32
    %c0_i32_0 = arith.constant 0 : i32
    %c0_i32_1 = arith.constant 0 : i32
    return %c0_i32, %c0_i32_0 : i32, i32
  }
  func.func @transform_3(%arg0: i32) -> (i32, i32) {
    %c0_i32 = arith.constant 0 : i32
    %c0_i32_0 = arith.constant 0 : i32
    return %arg0, %c0_i32 : i32, i32
  }
}

module attributes {stable_mosaic.version = 11 : i64} {
  func.func @_env_mul_kernel(%arg0: i32, %arg1: memref<8x16xbf16, #tpu.memory_space<vmem>>, %arg2: memref<16x2048xbf16, #tpu.memory_space<vmem>>, %arg3: memref<8x2048xf32, #tpu.memory_space<vmem>>, %arg4: memref<8x2048xf32, #tpu.memory_space<vmem>>) attributes {dimension_semantics = [#tpu.dimension_semantics<parallel>], iteration_bounds = array<i64: 2>, scalar_prefetch = 0 : i64, scratch_operands = 0 : i64, tpu.core_type = #tpu.core_type<tc>, window_params = [{pipeline_mode = #tpu.pipeline_mode<synchronous>, transform_indices = @transform_0, window_bounds = array<i64: 8, 16>}, {transform_indices = @transform_1, window_bounds = array<i64: 16, 2048>}, {transform_indices = @transform_2, window_bounds = array<i64: 8, 2048>}, {transform_indices = @transform_3, window_bounds = array<i64: 8, 2048>}]} {
    %c0 = arith.constant 0 : index
    %c0_0 = arith.constant 0 : index
    %0 = vector.load %arg1[%c0, %c0_0] : memref<8x16xbf16, #tpu.memory_space<vmem>>, vector<8x16xbf16>
    %c0_1 = arith.constant 0 : index
    %c0_2 = arith.constant 0 : index
    %1 = vector.load %arg2[%c0_1, %c0_2] : memref<16x2048xbf16, #tpu.memory_space<vmem>>, vector<16x2048xbf16>
    %cst = arith.constant dense<0.000000e+00> : vector<8x2048xf32>
    %2 = tpu.matmul %0, %1, %cst {dimension_numbers = #tpu.dot_dimension_numbers<[1], [0], [0], [1], [0, 0, 1, 1], [], []>} : vector<8x16xbf16>, vector<16x2048xbf16>, vector<8x2048xf32> -> vector<8x2048xf32>
    %c0_3 = arith.constant 0 : index
    %c0_4 = arith.constant 0 : index
    %3 = vector.load %arg3[%c0_3, %c0_4] : memref<8x2048xf32, #tpu.memory_space<vmem>>, vector<8x2048xf32>
    %4 = arith.mulf %3, %2 : vector<8x2048xf32>
    %c0_5 = arith.constant 0 : index
    %c0_6 = arith.constant 0 : index
    %5 = vector.load %arg4[%c0_5, %c0_6] : memref<8x2048xf32, #tpu.memory_space<vmem>>, vector<8x2048xf32>
    tpu.vector_store %arg4[%c0_5, %c0_6], %4 {strides = array<i32>} : memref<8x2048xf32, #tpu.memory_space<vmem>>, vector<8x2048xf32>,
    return
  }
  func.func @transform_0(%arg0: i32) -> (i32, i32) {
    %c0_i32 = arith.constant 0 : i32
    %c0_i32_0 = arith.constant 0 : i32
    %c0_i32_1 = arith.constant 0 : i32
    return %c0_i32, %c0_i32_0 : i32, i32
  }
  func.func @transform_1(%arg0: i32) -> (i32, i32) {
    %c0_i32 = arith.constant 0 : i32
    %c0_i32_0 = arith.constant 0 : i32
    return %c0_i32, %arg0 : i32, i32
  }
  func.func @transform_2(%arg0: i32) -> (i32, i32) {
    %c0_i32 = arith.constant 0 : i32
    %c0_i32_0 = arith.constant 0 : i32
    return %c0_i32, %arg0 : i32, i32
  }
  func.func @transform_3(%arg0: i32) -> (i32, i32) {
    %c0_i32 = arith.constant 0 : i32
    %c0_i32_0 = arith.constant 0 : i32
    return %c0_i32, %arg0 : i32, i32
  }
}

</mosaic_0001>

<bundles_post_ra>
// kernel: fwd.11
= control target key start
LH: loop header
LB: loop body
LE: loop exit
PB: predicated region body
PF: predicated region fallthrough
CT: control target
= control target key end

     0   :  { %v108_v0 = vmov 0.0   ;;  %vm109_vm0 = vmmov 0   ;;  %vm39_vm1 = vcmask 261120   ;;  %s145_s1 = inlined_call_operand.vmem [shape: bf16[32,128], index: 1, kind: input, shape index: {}]   ;;  %s146_s0 = inlined_call_operand.vmem [shape: bf16[8,32], index: 0, kind: input, shape index: {}]   ;;  %s147_s2 = inlined_call_operand.vmem [shape: f32[1,128], index: 2, kind: input, shape index: {}]   ;;  %s148_s3 = inlined_call_operand.vmem [shape: bf16[8,128], index: 3, kind: output, shape index: {}]  }
   0x1   :  { %96 = vmatprep.subr.bf16.mxu0 %v108_v0  ;;  %v106_v1 = vld [vmem:[%s145_s1] sm:$0xff]   ;;  %100 = vmatprep.mubr.msk.bf16.mxu0 %vm109_vm0, %v108_v0  ;;  %v107_v2 = vld [vmem:[%s145_s1 + $0x8] sm:$0xff]  }
   0x2   :  { %97 = vmatpush3.bf16.msra.mxu0 %v106_v1  ;;  %v15_v3 = vld [vmem:[%s146_s0] sm:$0xf] }
   0x3   :  { %98 = vmatprep.subr.bf16.mxu0 %v108_v0  ;;  %v89_v4 = vld [vmem:[%s147_s2] ss:$0 sm:$0xff] }
   0x6   :  { %99 = vmatpush3.bf16.msra.mxu0 %v107_v2 }
   0x9   :  { %101 = vmatmul.mubr.msk.bf16.vlgmr.msra.gmra.mrb[0].mxu0 %vm39_vm1, %v15_v3 }
  0xdc   :  { %v77_v5 = vpop.f32.mrb[0].mxu0 }
  0xdd   :  { %v78_v6 = vadd.f32 %v89_v4, %v77_v5  ;;  %v102_v7 = vpop.f32.mrb[1].mxu0 }
  0xde   :  { %v80_v8 = vpop.f32.mrb[2].mxu0 }
  0xdf   :  { %v83_v9 = vpack.c.bf16 %v78_v6, %v78_v6  ;;  %v103_v10 = vpop.f32.mrb[3].mxu0 }
  0xe1   :  { %84 = vst [vmem:[%s148_s3] sm:$0xf] %v83_v9 }

// kernel: fwd.12
= control target key start
LH: loop header
LB: loop body
LE: loop exit
PB: predicated region body
PF: predicated region fallthrough
CT: control target
= control target key end

     0   :  { %s647_s12 = smov 0   ;;  %s710_s0 = inlined_call_operand.vmem [shape: bf16[8,4,32], index: 0, kind: input, shape index: {}]   ;;  %s711_s1 = inlined_call_operand.vmem [shape: bf16[4,32,32], index: 1, kind: input, shape index: {}]   ;;  %s712_s2 = inlined_call_operand.vmem [shape: f32[1,32], index: 2, kind: input, shape index: {}]   ;;  %s713_s3 = inlined_call_operand.vmem [shape: bf16[8,4,64], index: 3, kind: output, shape index: {}]  }
   0x1 LB: > { %s517_s13 = sadd.s32 4294967295, %s621_s12   ;;  %p521_p0 = scmp.ge.s32.totalorder %s621_s12, 1  ;;  %s621_s12 = sphi %s647_s12, %s13_s12  }
   0x2   : > { %p136_p1 = scmp.lt.s32.totalorder %s621_s12, 9 }
   0x4   : > { %p137_p2 = pnand %p521_p0, %p136_p1 }
   0x5   : > { %v607_v0 = vld [vmem:[%s711_s1 + $0x10] sm:$0xff] (!%p137_p2)   ;;  %v623_v1 = vmov (!%p137_p2), 0.0   ;;  %v172_v3 = vlaneseq (!%p137_p2)  ;;  %v609_v4 = vld [vmem:[%s711_s1 + $0x18] sm:$0xff] (!%p137_p2)   ;;  %vm624_vm0 = vmmov (!%p137_p2), 0   ;;  %p158_p3 = scmp.lt.s32.totalorder (!%p137_p2), %s517_s13, 7  ;;  %vm218_vm1 = vcmask (!%p137_p2), 261120  }
   0x6   : > { %140 = sbr.rel (%p137_p2) target bundleno = 373 (0x175), region = 32  ;;  %571 = vmatprep.subr.bf16.mxu1 (!%p137_p2), %v623_v1  ;;  %563 = vmatprep.subr.bf16.mxu0 (!%p137_p2), %v623_v1  ;;  %v608_v2 = vld [vmem:[%s711_s1 + $0x30] sm:$0xff] (!%p137_p2)   ;;  %v610_v5 = vld [vmem:[%s711_s1 + $0x38] sm:$0xff] (!%p137_p2)   ;;  %v625_v6 = vmov (!%p137_p2), 1983009808   ;;  %v611_v9 = vld [vmem:[%s711_s1 + $0x20] sm:$0xff] (!%p137_p2)  }
   0x7   : > { %572 = vmatpush3.bf16.msra.mxu1 (!%p137_p2), %v607_v0  ;;  %575 = vmatprep.mubr.msk.bf16.mxu1 (!%p137_p2), %vm624_vm0, %v623_v1  ;;  %v170_v7 = vunpack.c.l.s4 (!%p137_p2), %v625_v6  ;;  %v173_v8 = vshrl.u32 (!%p137_p2), %v172_v3, 7  ;;  %v613_v13 = vld [vmem:[%s711_s1 + $0x28] sm:$0xff] (!%p137_p2)   ;;  %vm184_vm2 = vcmask (!%p137_p2), 1040384   ;;  %vm185_vm3 = vsmask.f32 (!%p137_p2), 256  ;;  %v612_v20 = vld [vmem:[%s711_s1] sm:$0xff] (!%p137_p2)  }
   0x8   : > { %564 = vmatpush3.bf16.msra.mxu0 (!%p137_p2), %v608_v2  ;;  %573 = vmatprep.subr.bf16.mxu1 (!%p137_p2), %v623_v1  ;;  %vm186_vm4 = vmand (!%p137_p2), %vm184_vm2, %vm185_vm3  ;;  %vm191_vm5 = vcmask (!%p137_p2), 1041408   ;;  %vm192_vm6 = vsmask.f32 (!%p137_p2), 1280  ;;  %v614_v22 = vld [vmem:[%s711_s1 + $0x8] sm:$0xff] (!%p137_p2)   ;;  %v538_v32 = vld [vmem:[%s712_s2] ss:$0 sm:$0xff] (!%p137_p2) }
   0x9   : > { %565 = vmatprep.subr.bf16.mxu0 (!%p137_p2), %v623_v1  ;;  %567 = vmatprep.mubr.msk.bf16.mxu0 (!%p137_p2), %vm624_vm0, %v623_v1  ;;  %v171_v10 = vunpack.c.0.s8 (!%p137_p2), %v170_v7  ;;  %vm193_vm7 = vmand (!%p137_p2), %vm191_vm5, %vm192_vm6  ;;  %vm448_vm9 = vcmask (!%p137_p2), 254976   ;;  %vm462_vm11 = vcmask (!%p137_p2), 517376  }
   0xb   : > { %574 = vmatpush3.bf16.msra.mxu1 (!%p137_p2), %v609_v4  ;;  %v680_v12 = vsub.s32 (!%p137_p2), %v171_v10, %v173_v8 }
   0xc   : > { %566 = vmatpush3.bf16.msra.mxu0 (!%p137_p2), %v610_v5  ;;  %587 = vmatprep.subr.bf16.mxu1 (!%p137_p2), %v623_v1 }
   0xd   : > { %s715_s13 = smov (!%p158_p3, %s517_s13), 7  ;;  %579 = vmatprep.subr.bf16.mxu0 %v623_v1 }
   0xe   : > { %s522_s22 = sshll.u32 %s715_s13, 1  ;;  %s626_s13 = smov 32  }
   0xf   : > { %s161_s27 = scalar_lea.vmem %s710_s0, %s522_s22  ;;  %s165_s11 = scalar_lea.vmem %s713_s3, %s522_s22 }
  0x10   : > { %v167_v11 = vld [vmem:[%s161_s27] sm:$0x3] }
  0x11   : > { %576 = vmatmul.mubr.msk.bf16.vlgmr.msra.gmra.mrb[0].mxu1 %vm218_vm1, %v167_v11  ;;  %v175_v14 = vrot.slane %v167_v11, %v680_v12 }
  0x12   : > { %588 = vmatpush3.bf16.msra.mxu1 %v611_v9  ;;  %591 = vmatprep.mubr.msk.bf16.mxu1 %vm624_vm0, %v623_v1 }
  0x13   : > { %589 = vmatprep.subr.bf16.mxu1 %v623_v1  ;;  %v177_v15 = vshrl.u32 %v175_v14, 16  ;;  %v180_v16 = vshll.u32 %v175_v14, 16 }
  0x15   : > { %v179_v17 = vrot.slane %v177_v15, 7  ;;  %v188_v19 = vrot.slane %v180_v16, 1 }
  0x16   : > { %590 = vmatpush3.bf16.msra.mxu1 %v613_v13 }
  0x17   : > { %v182_v18 = vor.u32 %v180_v16, %v179_v17  ;;  %v189_v23 = vor.u32 %v188_v19, %v177_v15 }
  0x19   : > { %592 = vmatmul.mubr.msk.bf16.vlgmr.msra.gmra.mrb[4].mxu1 %vm218_vm1, %v167_v11  ;;  %v187_v21 = vsel %vm186_vm4, 0, %v182_v18  ;;  %v194_v24 = vsel %vm193_vm7, %v189_v23, 0 }
  0x1a   : > { %568 = vmatmul.mubr.msk.bf16.vlgmr.msra.gmra.mrb[0].mxu0 %vm218_vm1, %v187_v21 }
  0x1b   : > { %580 = vmatpush3.bf16.msra.mxu0 %v612_v20  ;;  %583 = vmatprep.mubr.msk.bf16.mxu0 %vm624_vm0, %v623_v1 }
  0x1c   : > { %581 = vmatprep.subr.bf16.mxu0 %v623_v1 }
  0x1f   : > { %582 = vmatpush3.bf16.msra.mxu0 %v614_v22 }
  0x22   : > { %584 = vmatmul.mubr.msk.bf16.vlgmr.msra.gmra.mrb[4].mxu0 %vm218_vm1, %v194_v24 }
  0xe4   : > { %v311_v25 = vpop.f32.mrb[0].mxu1 }
  0xe5   : > { %v577_v26 = vpop.f32.mrb[1].mxu1 }
  0xe6   : > { %v314_v27 = vpop.f32.mrb[2].mxu1 }
  0xe7   : > { %v578_v28 = vpop.f32.mrb[3].mxu1 }
  0xec   : > { %v434_v29 = vpop.f32.mrb[4].mxu1 }
  0xed   : > { %v593_v30 = vpop.f32.mrb[5].mxu1  ;;  %v256_v33 = vpop.f32.mrb[0].mxu0 }
  0xee   : > { %v437_v31 = vpop.f32.mrb[6].mxu1  ;;  %v312_v35 = vadd.f32 %v311_v25, %v256_v33  ;;  %v569_v36 = vpop.f32.mrb[1].mxu0 }
  0xef   : > { %v594_v34 = vpop.f32.mrb[7].mxu1  ;;  %v259_v37 = vpop.f32.mrb[2].mxu0 }
  0xf0   : > { %v323_v38 = vadd.f32 %v538_v32, %v312_v35  ;;  %v570_v39 = vpop.f32.mrb[3].mxu0 }
  0xf2   : > { %vm441_vm8 = vcmp.ge.f32.partialorder %v323_v38, 0.0  ;;  %v442_v40 = vmul.f32 0.2, %v323_v38 }
  0xf4   : > { %v443_v41 = vsel %vm441_vm8, %v323_v38, %v442_v40 }
  0xf5   : > { %v447_v42 = vpack.c.bf16 %v443_v41, %v443_v41  ;;  %v382_v43 = vpop.f32.mrb[4].mxu0 }
  0xf6   : > { %v435_v44 = vadd.f32 %v434_v29, %v382_v43  ;;  %v585_v45 = vpop.f32.mrb[5].mxu0 }
  0xf7   : > { %v385_v46 = vpop.f32.mrb[6].mxu0  ;;  %449 = vst.msk [vmem:[%s165_s11] sm:$0x3] %vm448_vm9, %v447_v42 }
  0xf8   : > { %v440_v47 = vadd.f32 %v538_v32, %v435_v44  ;;  %v586_v48 = vpop.f32.mrb[7].mxu0 }
  0xfa   : > { %v445_v49 = vmul.f32 0.2, %v440_v47  ;;  %vm444_vm10 = vcmp.ge.f32.partialorder %v440_v47, 0.0 }
  0xfc   : > { %v446_v50 = vsel %vm444_vm10, %v440_v47, %v445_v49 }
  0xfd   : > { %v450_v51 = vpack.c.bf16 %v446_v50, %v446_v50 }
  0xff   : > { %v458_v52 = vrot.slane %v450_v51, %v680_v12 }
 0x101   : > { %459 = vrot.lane.b32.xlu0 %v458_v52, %s626_s13 }
 0x173   : > { %v460_v53 = vpop.permute.xlu0 %459 }
 0x174   : > { %463 = vst.msk [vmem:[%s165_s11] sm:$0x3] %vm462_vm11, %v460_v53 }
 0x175 PF: > { %s13_s12 = sadd.s32 1, %s621_s12  }
 0x176   : > { %p10_p4 = scmp.ge.s32.totalorder %s13_s12, 10  }
 0x178   :  { %12 = sbr.rel (!%p10_p4) target bundleno = 1 (0x1), region = 65 }

// kernel: fwd.14
= control target key start
LH: loop header
LB: loop body
LE: loop exit
PB: predicated region body
PF: predicated region fallthrough
CT: control target
= control target key end

     0   :  { %s573_s12 = smov 0   ;;  %s624_s0 = inlined_call_operand.vmem [shape: bf16[8,16,32], index: 0, kind: input, shape index: {}]   ;;  %s625_s1 = inlined_call_operand.vmem [shape: bf16[3,32,32], index: 1, kind: input, shape index: {}]   ;;  %s626_s2 = inlined_call_operand.vmem [shape: f32[1,32], index: 2, kind: input, shape index: {}]   ;;  %s627_s3 = inlined_call_operand.vmem [shape: bf16[8,16,32], index: 3, kind: output, shape index: {}]  }
   0x1 LB: > { %s457_s13 = sadd.s32 4294967295, %s549_s12   ;;  %p461_p0 = scmp.ge.s32.totalorder %s549_s12, 1  ;;  %s549_s12 = sphi %s573_s12, %s13_s12  }
   0x2   : > { %p137_p1 = scmp.lt.s32.totalorder %s549_s12, 9 }
   0x4   : > { %p138_p2 = pnand %p461_p0, %p137_p1 }
   0x5   : > { %v536_v0 = vld [vmem:[%s625_s1 + $0x10] sm:$0xff] (!%p138_p2)   ;;  %v551_v1 = vmov (!%p138_p2), 0.0   ;;  %v537_v2 = vld [vmem:[%s625_s1 + $0x18] sm:$0xff] (!%p138_p2)   ;;  %vm552_vm0 = vmmov (!%p138_p2), 0   ;;  %v538_v3 = vld [vmem:[%s625_s1] sm:$0xff] (!%p138_p2)   ;;  %p161_p3 = scmp.lt.s32.totalorder (!%p138_p2), %s457_s13, 7 }
   0x6   : > { %141 = sbr.rel (%p138_p2) target bundleno = 247 (0xf7), region = 32  ;;  %502 = vmatprep.subr.bf16.mxu0 (!%p138_p2), %v551_v1  ;;  %510 = vmatprep.subr.bf16.mxu1 (!%p138_p2), %v551_v1  ;;  %v541_v4 = vld [vmem:[%s625_s1 + $0x8] sm:$0xff] (!%p138_p2)   ;;  %vm219_vm1 = vcmask (!%p138_p2), 261120   ;;  %v540_v5 = vld [vmem:[%s625_s1 + $0x20] sm:$0xff] (!%p138_p2)   ;;  %vm187_vm2 = vcmask (!%p138_p2), 1040384   ;;  %vm194_vm4 = vcmask (!%p138_p2), 1047552  }
   0x7   : > { %503 = vmatpush3.bf16.msra.mxu0 (!%p138_p2), %v536_v0  ;;  %506 = vmatprep.mubr.msk.bf16.mxu0 (!%p138_p2), %vm552_vm0, %v551_v1  ;;  %vm188_vm3 = vsmask.f32 (!%p138_p2), 256  ;;  %vm195_vm5 = vsmask.f32 (!%p138_p2), 7424  ;;  %v542_v9 = vld [vmem:[%s625_s1 + $0x28] sm:$0xff] (!%p138_p2)   ;;  %vm399_vm8 = vcmask (!%p138_p2), 257024  }
   0x8   : > { %504 = vmatprep.subr.bf16.mxu0 (!%p138_p2), %v551_v1  ;;  %514 = vmatprep.mubr.msk.bf16.mxu1 (!%p138_p2), %vm552_vm0, %v551_v1  ;;  %vm189_vm6 = vmand (!%p138_p2), %vm187_vm2, %vm188_vm3  ;;  %v484_v25 = vld [vmem:[%s626_s2] ss:$0 sm:$0xff] (!%p138_p2) }
   0x9   : > { %511 = vmatpush3.bf16.msra.mxu1 (!%p138_p2), %v538_v3  ;;  %vm196_vm7 = vmand (!%p138_p2), %vm194_vm4, %vm195_vm5 }
   0xa   : > { %512 = vmatprep.subr.bf16.mxu1 (!%p138_p2), %v551_v1 }
   0xb   : > { %505 = vmatpush3.bf16.msra.mxu0 (!%p138_p2), %v537_v2 }
   0xc   : > { %518 = vmatprep.subr.bf16.mxu0 (!%p138_p2), %v551_v1 }
   0xd   : > { %s629_s13 = smov (!%p161_p3, %s457_s13), 7  ;;  %513 = vmatpush3.bf16.msra.mxu1 %v541_v4 }
   0xe   : > { %s489_s22 = sshll.u32 %s629_s13, 3 }
   0xf   : > { %s165_s25 = scalar_lea.vmem %s624_s0, %s489_s22  ;;  %s170_s7 = scalar_lea.vmem %s627_s3, %s489_s22 }
  0x10   : > { %v539_v6 = vld [vmem:[%s165_s25] sm:$0xff]  }
  0x11   : > { %507 = vmatmul.mubr.msk.bf16.vlgmr.msra.gmra.mrb[0].mxu0 %vm219_vm1, %v539_v6  ;;  %v180_v7 = vshrl.u32 %v539_v6, 16  ;;  %v183_v8 = vshll.u32 %v539_v6, 16 }
  0x12   : > { %519 = vmatpush3.bf16.msra.mxu0 %v540_v5  ;;  %522 = vmatprep.mubr.msk.bf16.mxu0 %vm552_vm0, %v551_v1 }
  0x13   : > { %520 = vmatprep.subr.bf16.mxu0 %v551_v1  ;;  %v182_v10 = vrot.slane %v180_v7, 7  ;;  %v191_v11 = vrot.slane %v183_v8, 1 }
  0x15   : > { %v185_v12 = vor.u32 %v183_v8, %v182_v10  ;;  %v192_v13 = vor.u32 %v191_v11, %v180_v7 }
  0x16   : > { %521 = vmatpush3.bf16.msra.mxu0 %v542_v9 }
  0x17   : > { %v190_v14 = vsel %vm189_vm6, 0, %v185_v12  ;;  %v197_v15 = vsel %vm196_vm7, %v192_v13, 0 }
  0x18   : > { %515 = vmatmul.mubr.msk.bf16.vlgmr.msra.gmra.mrb[0].mxu1 %vm219_vm1, %v190_v14 }
  0x19   : > { %523 = vmatmul.mubr.msk.bf16.vlgmr.msra.gmra.mrb[4].mxu0 %vm219_vm1, %v197_v15 }
  0xe4   : > { %v256_v16 = vpop.f32.mrb[0].mxu0 }
  0xe5   : > { %v508_v17 = vpop.f32.mrb[1].mxu0 }
  0xe6   : > { %v259_v18 = vpop.f32.mrb[2].mxu0 }
  0xe7   : > { %v509_v19 = vpop.f32.mrb[3].mxu0 }
  0xeb   : > { %v312_v20 = vpop.f32.mrb[0].mxu1 }
  0xec   : > { %v313_v21 = vadd.f32 %v312_v20, %v256_v16  ;;  %v516_v22 = vpop.f32.mrb[1].mxu1  ;;  %v373_v23 = vpop.f32.mrb[4].mxu0 }
  0xed   : > { %v315_v24 = vpop.f32.mrb[2].mxu1  ;;  %v524_v26 = vpop.f32.mrb[5].mxu0 }
  0xee   : > { %v316_v27 = vadd.f32 %v315_v24, %v259_v18  ;;  %v380_v28 = vadd.f32 %v373_v23, %v313_v21  ;;  %v517_v29 = vpop.f32.mrb[3].mxu1  ;;  %v376_v30 = vpop.f32.mrb[6].mxu0 }
  0xef   : > { %v525_v31 = vpop.f32.mrb[7].mxu0 }
  0xf0   : > { %v389_v32 = vadd.f32 %v484_v25, %v380_v28  ;;  %v381_v33 = vadd.f32 %v376_v30, %v316_v27 }
  0xf2   : > { %v491_v34 = vpack.c.bf16 %v389_v32, %v389_v32  ;;  %v390_v35 = vadd.f32 %v484_v25, %v381_v33 }
  0xf4   : > { %400 = vst.msk [vmem:[%s170_s7] sm:$0xf] %vm399_vm8, %v491_v34  ;;  %v492_v36 = vpack.c.bf16 %v390_v35, %v390_v35 }
  0xf6   : > { %401 = vst.msk [vmem:[%s170_s7 + $0x4] sm:$0xf] %vm399_vm8, %v492_v36 }
  0xf7 PF: > { %s13_s12 = sadd.s32 1, %s549_s12  }
  0xf8   : > { %p10_p4 = scmp.ge.s32.totalorder %s13_s12, 10  }
  0xfa   :  { %12 = sbr.rel (!%p10_p4) target bundleno = 1 (0x1), region = 64 }

// kernel: fwd.13
= control target key start
LH: loop header
LB: loop body
LE: loop exit
PB: predicated region body
PF: predicated region fallthrough
CT: control target
= control target key end

     0   :  { %s639_s12 = smov 0   ;;  %s698_s0 = inlined_call_operand.vmem [shape: bf16[8,8,32], index: 0, kind: input, shape index: {}]   ;;  %s699_s1 = inlined_call_operand.vmem [shape: bf16[4,32,32], index: 1, kind: input, shape index: {}]   ;;  %s700_s2 = inlined_call_operand.vmem [shape: f32[1,32], index: 2, kind: input, shape index: {}]   ;;  %s701_s3 = inlined_call_operand.vmem [shape: bf16[8,8,64], index: 3, kind: output, shape index: {}]  }
   0x1 LB: > { %s507_s13 = sadd.s32 4294967295, %s614_s12   ;;  %p511_p0 = scmp.ge.s32.totalorder %s614_s12, 1  ;;  %s614_s12 = sphi %s639_s12, %s13_s12  }
   0x2   : > { %p136_p1 = scmp.lt.s32.totalorder %s614_s12, 9 }
   0x4   : > { %p137_p2 = pnand %p511_p0, %p136_p1 }
   0x5   : > { %v599_v0 = vld [vmem:[%s699_s1 + $0x10] sm:$0xff] (!%p137_p2)   ;;  %v616_v1 = vmov (!%p137_p2), 0.0   ;;  %v601_v3 = vld [vmem:[%s699_s1 + $0x18] sm:$0xff] (!%p137_p2)   ;;  %vm617_vm0 = vmmov (!%p137_p2), 0   ;;  %p158_p3 = scmp.lt.s32.totalorder (!%p137_p2), %s507_s13, 7  ;;  %vm213_vm1 = vcmask (!%p137_p2), 261120  }
   0x6   : > { %140 = sbr.rel (%p137_p2) target bundleno = 371 (0x173), region = 32  ;;  %564 = vmatprep.subr.bf16.mxu1 (!%p137_p2), %v616_v1  ;;  %556 = vmatprep.subr.bf16.mxu0 (!%p137_p2), %v616_v1  ;;  %v600_v2 = vld [vmem:[%s699_s1 + $0x30] sm:$0xff] (!%p137_p2)   ;;  %v602_v4 = vld [vmem:[%s699_s1 + $0x38] sm:$0xff] (!%p137_p2)   ;;  %v604_v5 = vld [vmem:[%s699_s1 + $0x20] sm:$0xff] (!%p137_p2)   ;;  %vm179_vm2 = vcmask (!%p137_p2), 1040384   ;;  %vm186_vm5 = vcmask (!%p137_p2), 1043456  }
   0x7   : > { %565 = vmatpush3.bf16.msra.mxu1 (!%p137_p2), %v599_v0  ;;  %568 = vmatprep.mubr.msk.bf16.mxu1 (!%p137_p2), %vm617_vm0, %v616_v1  ;;  %v606_v8 = vld [vmem:[%s699_s1 + $0x28] sm:$0xff] (!%p137_p2)   ;;  %vm180_vm3 = vsmask.f32 (!%p137_p2), 256  ;;  %v605_v14 = vld [vmem:[%s699_s1] sm:$0xff] (!%p137_p2)   ;;  %vm187_vm6 = vsmask.f32 (!%p137_p2), 3328 }
   0x8   : > { %557 = vmatpush3.bf16.msra.mxu0 (!%p137_p2), %v600_v2  ;;  %566 = vmatprep.subr.bf16.mxu1 (!%p137_p2), %v616_v1  ;;  %vm181_vm4 = vmand (!%p137_p2), %vm179_vm2, %vm180_vm3  ;;  %v607_v16 = vld [vmem:[%s699_s1 + $0x8] sm:$0xff] (!%p137_p2)   ;;  %v529_v24 = vld [vmem:[%s700_s2] ss:$0 sm:$0xff] (!%p137_p2)  ;;  %vm443_vm9 = vcmask (!%p137_p2), 257024   ;;  %s618_s14 = smov (!%p137_p2), 32   ;;  %vm452_vm11 = vcmask (!%p137_p2), 519424  }
   0x9   : > { %558 = vmatprep.subr.bf16.mxu0 (!%p137_p2), %v616_v1  ;;  %560 = vmatprep.mubr.msk.bf16.mxu0 (!%p137_p2), %vm617_vm0, %v616_v1  ;;  %vm188_vm7 = vmand (!%p137_p2), %vm186_vm5, %vm187_vm6 }
   0xb   : > { %567 = vmatpush3.bf16.msra.mxu1 (!%p137_p2), %v601_v3 }
   0xc   : > { %559 = vmatpush3.bf16.msra.mxu0 (!%p137_p2), %v602_v4  ;;  %580 = vmatprep.subr.bf16.mxu1 (!%p137_p2), %v616_v1 }
   0xd   : > { %s703_s13 = smov (!%p158_p3, %s507_s13), 7  ;;  %572 = vmatprep.subr.bf16.mxu0 %v616_v1 }
   0xe   : > { %s512_s22 = sshll.u32 %s703_s13, 2 }
   0xf   : > { %s161_s27 = scalar_lea.vmem %s698_s0, %s512_s22  ;;  %s165_s11 = scalar_lea.vmem %s701_s3, %s512_s22 }
  0x10   : > { %v167_v6 = vld [vmem:[%s161_s27] sm:$0xf] }
  0x11   : > { %v514_v7 = vcombine.low %v167_v6, %v167_v6  ;;  %569 = vmatmul.mubr.msk.bf16.vlgmr.msra.gmra.mrb[0].mxu1 %vm213_vm1, %v167_v6 }
  0x12   : > { %581 = vmatpush3.bf16.msra.mxu1 %v604_v5  ;;  %584 = vmatprep.mubr.msk.bf16.mxu1 %vm617_vm0, %v616_v1 }
  0x13   : > { %v172_v9 = vshrl.u32 %v514_v7, 16  ;;  %v175_v10 = vshll.u32 %v514_v7, 16  ;;  %582 = vmatprep.subr.bf16.mxu1 %v616_v1 }
  0x15   : > { %v174_v11 = vrot.slane %v172_v9, 7  ;;  %v183_v13 = vrot.slane %v175_v10, 1 }
  0x16   : > { %583 = vmatpush3.bf16.msra.mxu1 %v606_v8 }
  0x17   : > { %v177_v12 = vor.u32 %v175_v10, %v174_v11  ;;  %v184_v17 = vor.u32 %v183_v13, %v172_v9 }
  0x19   : > { %v182_v15 = vsel %vm181_vm4, 0, %v177_v12  ;;  %585 = vmatmul.mubr.msk.bf16.vlgmr.msra.gmra.mrb[4].mxu1 %vm213_vm1, %v167_v6  ;;  %v189_v18 = vsel %vm188_vm7, %v184_v17, 0 }
  0x1a   : > { %561 = vmatmul.mubr.msk.bf16.vlgmr.msra.gmra.mrb[0].mxu0 %vm213_vm1, %v182_v15 }
  0x1b   : > { %573 = vmatpush3.bf16.msra.mxu0 %v605_v14  ;;  %576 = vmatprep.mubr.msk.bf16.mxu0 %vm617_vm0, %v616_v1 }
  0x1c   : > { %574 = vmatprep.subr.bf16.mxu0 %v616_v1 }
  0x1f   : > { %575 = vmatpush3.bf16.msra.mxu0 %v607_v16 }
  0x22   : > { %577 = vmatmul.mubr.msk.bf16.vlgmr.msra.gmra.mrb[4].mxu0 %vm213_vm1, %v189_v18 }
  0xe4   : > { %v306_v19 = vpop.f32.mrb[0].mxu1 }
  0xe5   : > { %v570_v20 = vpop.f32.mrb[1].mxu1 }
  0xe6   : > { %v309_v21 = vpop.f32.mrb[2].mxu1 }
  0xe7   : > { %v571_v22 = vpop.f32.mrb[3].mxu1 }
  0xec   : > { %v429_v23 = vpop.f32.mrb[4].mxu1 }
  0xed   : > { %v251_v25 = vpop.f32.mrb[0].mxu0  ;;  %v586_v26 = vpop.f32.mrb[5].mxu1 }
  0xee   : > { %v307_v27 = vadd.f32 %v306_v19, %v251_v25  ;;  %v562_v28 = vpop.f32.mrb[1].mxu0  ;;  %v432_v29 = vpop.f32.mrb[6].mxu1 }
  0xef   : > { %v254_v30 = vpop.f32.mrb[2].mxu0  ;;  %v587_v31 = vpop.f32.mrb[7].mxu1 }
  0xf0   : > { %v318_v32 = vadd.f32 %v529_v24, %v307_v27  ;;  %v563_v33 = vpop.f32.mrb[3].mxu0 }
  0xf2   : > { %vm436_vm8 = vcmp.ge.f32.partialorder %v318_v32, 0.0  ;;  %v437_v34 = vmul.f32 0.2, %v318_v32 }
  0xf4   : > { %v438_v35 = vsel %vm436_vm8, %v318_v32, %v437_v34 }
  0xf5   : > { %v442_v36 = vpack.c.bf16 %v438_v35, %v438_v35  ;;  %v377_v37 = vpop.f32.mrb[4].mxu0 }
  0xf6   : > { %v430_v38 = vadd.f32 %v429_v23, %v377_v37  ;;  %v578_v39 = vpop.f32.mrb[5].mxu0 }
  0xf7   : > { %v380_v40 = vpop.f32.mrb[6].mxu0  ;;  %444 = vst.msk [vmem:[%s165_s11] sm:$0xf] %vm443_vm9, %v442_v36 }
  0xf8   : > { %v435_v41 = vadd.f32 %v529_v24, %v430_v38  ;;  %v579_v42 = vpop.f32.mrb[7].mxu0 }
  0xfa   : > { %vm439_vm10 = vcmp.ge.f32.partialorder %v435_v41, 0.0  ;;  %v440_v43 = vmul.f32 0.2, %v435_v41 }
  0xfc   : > { %v441_v44 = vsel %vm439_vm10, %v435_v41, %v440_v43 }
  0xfd   : > { %v543_v45 = vpack.c.bf16 %v441_v44, %v441_v44 }
  0xff   : > { %449 = vrot.lane.b32.xlu0 %v543_v45, %s618_s14 }
 0x171   : > { %v450_v46 = vpop.permute.xlu0 %449 }
 0x172   : > { %453 = vst.msk [vmem:[%s165_s11] sm:$0xf] %vm452_vm11, %v450_v46 }
 0x173 PF: > { %s13_s12 = sadd.s32 1, %s614_s12  }
 0x174   : > { %p10_p4 = scmp.ge.s32.totalorder %s13_s12, 10  }
 0x176   :  { %12 = sbr.rel (!%p10_p4) target bundleno = 1 (0x1), region = 65 }

// kernel: fwd.15
= control target key start
LH: loop header
LB: loop body
LE: loop exit
PB: predicated region body
PF: predicated region fallthrough
CT: control target
= control target key end

     0   :  { %s684_s12 = smov 0   ;;  %s743_s0 = inlined_call_operand.vmem [shape: bf16[8,16,32], index: 0, kind: input, shape index: {}]   ;;  %s744_s1 = inlined_call_operand.vmem [shape: bf16[4,32,32], index: 1, kind: input, shape index: {}]   ;;  %s745_s2 = inlined_call_operand.vmem [shape: f32[1,32], index: 2, kind: input, shape index: {}]   ;;  %s746_s3 = inlined_call_operand.vmem [shape: bf16[8,16,64], index: 3, kind: output, shape index: {}]  }
   0x1 LB: > { %s542_s13 = sadd.s32 4294967295, %s659_s12   ;;  %p546_p0 = scmp.ge.s32.totalorder %s659_s12, 1  ;;  %s659_s12 = sphi %s684_s12, %s13_s12  }
   0x2   : > { %p137_p1 = scmp.lt.s32.totalorder %s659_s12, 9 }
   0x4   : > { %p138_p2 = pnand %p546_p0, %p137_p1 }
   0x5   : > { %v644_v0 = vld [vmem:[%s744_s1 + $0x10] sm:$0xff] (!%p138_p2)   ;;  %v661_v1 = vmov (!%p138_p2), 0.0   ;;  %v646_v3 = vld [vmem:[%s744_s1 + $0x18] sm:$0xff] (!%p138_p2)   ;;  %vm662_vm0 = vmmov (!%p138_p2), 0   ;;  %p161_p3 = scmp.lt.s32.totalorder (!%p138_p2), %s542_s13, 7  ;;  %vm221_vm1 = vcmask (!%p138_p2), 261120  }
   0x6   : > { %141 = sbr.rel (%p138_p2) target bundleno = 373 (0x175), region = 32  ;;  %609 = vmatprep.subr.bf16.mxu1 (!%p138_p2), %v661_v1  ;;  %601 = vmatprep.subr.bf16.mxu0 (!%p138_p2), %v661_v1  ;;  %v645_v2 = vld [vmem:[%s744_s1 + $0x30] sm:$0xff] (!%p138_p2)   ;;  %v647_v4 = vld [vmem:[%s744_s1 + $0x38] sm:$0xff] (!%p138_p2)   ;;  %v649_v5 = vld [vmem:[%s744_s1 + $0x20] sm:$0xff] (!%p138_p2)   ;;  %vm187_vm2 = vcmask (!%p138_p2), 1040384   ;;  %vm194_vm5 = vcmask (!%p138_p2), 1047552  }
   0x7   : > { %610 = vmatpush3.bf16.msra.mxu1 (!%p138_p2), %v644_v0  ;;  %613 = vmatprep.mubr.msk.bf16.mxu1 (!%p138_p2), %vm662_vm0, %v661_v1  ;;  %vm188_vm3 = vsmask.f32 (!%p138_p2), 256  ;;  %v651_v9 = vld [vmem:[%s744_s1 + $0x28] sm:$0xff] (!%p138_p2)   ;;  %v650_v13 = vld [vmem:[%s744_s1] sm:$0xff] (!%p138_p2)   ;;  %vm195_vm6 = vsmask.f32 (!%p138_p2), 7424 }
   0x8   : > { %602 = vmatpush3.bf16.msra.mxu0 (!%p138_p2), %v645_v2  ;;  %611 = vmatprep.subr.bf16.mxu1 (!%p138_p2), %v661_v1  ;;  %vm189_vm4 = vmand (!%p138_p2), %vm187_vm2, %vm188_vm3  ;;  %v652_v15 = vld [vmem:[%s744_s1 + $0x8] sm:$0xff] (!%p138_p2)   ;;  %v566_v22 = vld [vmem:[%s745_s2] ss:$0 sm:$0xff] (!%p138_p2)  ;;  %vm469_vm10 = vcmask (!%p138_p2), 257024   ;;  %vm484_vm13 = vcmask (!%p138_p2), 519424  }
   0x9   : > { %603 = vmatprep.subr.bf16.mxu0 (!%p138_p2), %v661_v1  ;;  %605 = vmatprep.mubr.msk.bf16.mxu0 (!%p138_p2), %vm662_vm0, %v661_v1  ;;  %vm196_vm7 = vmand (!%p138_p2), %vm194_vm5, %vm195_vm6 }
   0xb   : > { %612 = vmatpush3.bf16.msra.mxu1 (!%p138_p2), %v646_v3 }
   0xc   : > { %604 = vmatpush3.bf16.msra.mxu0 (!%p138_p2), %v647_v4  ;;  %625 = vmatprep.subr.bf16.mxu1 (!%p138_p2), %v661_v1 }
   0xd   : > { %s748_s13 = smov (!%p161_p3, %s542_s13), 7  ;;  %617 = vmatprep.subr.bf16.mxu0 %v661_v1 }
   0xe   : > { %s583_s22 = sshll.u32 %s748_s13, 3  ;;  %s663_s13 = smov 32  }
   0xf   : > { %s165_s25 = scalar_lea.vmem %s743_s0, %s583_s22  ;;  %s170_s11 = scalar_lea.vmem %s746_s3, %s583_s22 }
  0x10   : > { %v648_v6 = vld [vmem:[%s165_s25] sm:$0xff]  }
  0x11   : > { %614 = vmatmul.mubr.msk.bf16.vlgmr.msra.gmra.mrb[0].mxu1 %vm221_vm1, %v648_v6  ;;  %v180_v7 = vshrl.u32 %v648_v6, 16  ;;  %v183_v8 = vshll.u32 %v648_v6, 16 }
  0x12   : > { %626 = vmatpush3.bf16.msra.mxu1 %v649_v5  ;;  %629 = vmatprep.mubr.msk.bf16.mxu1 %vm662_vm0, %v661_v1 }
  0x13   : > { %v182_v10 = vrot.slane %v180_v7, 7  ;;  %627 = vmatprep.subr.bf16.mxu1 %v661_v1  ;;  %v191_v12 = vrot.slane %v183_v8, 1 }
  0x15   : > { %v185_v11 = vor.u32 %v183_v8, %v182_v10  ;;  %v192_v16 = vor.u32 %v191_v12, %v180_v7 }
  0x16   : > { %628 = vmatpush3.bf16.msra.mxu1 %v651_v9 }
  0x17   : > { %v190_v14 = vsel %vm189_vm4, 0, %v185_v11  ;;  %v197_v17 = vsel %vm196_vm7, %v192_v16, 0 }
  0x18   : > { %606 = vmatmul.mubr.msk.bf16.vlgmr.msra.gmra.mrb[0].mxu0 %vm221_vm1, %v190_v14 }
  0x19   : > { %618 = vmatpush3.bf16.msra.mxu0 %v650_v13  ;;  %630 = vmatmul.mubr.msk.bf16.vlgmr.msra.gmra.mrb[4].mxu1 %vm221_vm1, %v648_v6 }
  0x1a   : > { %619 = vmatprep.subr.bf16.mxu0 %v661_v1  ;;  %621 = vmatprep.mubr.msk.bf16.mxu0 %vm662_vm0, %v661_v1 }
  0x1d   : > { %620 = vmatpush3.bf16.msra.mxu0 %v652_v15 }
  0x20   : > { %622 = vmatmul.mubr.msk.bf16.vlgmr.msra.gmra.mrb[4].mxu0 %vm221_vm1, %v197_v17 }
  0xe4   : > { %v314_v18 = vpop.f32.mrb[0].mxu1 }
  0xe5   : > { %v615_v19 = vpop.f32.mrb[1].mxu1 }
  0xe6   : > { %v317_v20 = vpop.f32.mrb[2].mxu1 }
  0xe7   : > { %v616_v21 = vpop.f32.mrb[3].mxu1 }
  0xeb   : > { %v259_v23 = vpop.f32.mrb[0].mxu0 }
  0xec   : > { %v315_v24 = vadd.f32 %v314_v18, %v259_v23  ;;  %v607_v25 = vpop.f32.mrb[1].mxu0  ;;  %v440_v26 = vpop.f32.mrb[4].mxu1 }
  0xed   : > { %v262_v27 = vpop.f32.mrb[2].mxu0  ;;  %v631_v28 = vpop.f32.mrb[5].mxu1 }
  0xee   : > { %v327_v29 = vadd.f32 %v566_v22, %v315_v24  ;;  %v318_v30 = vadd.f32 %v317_v20, %v262_v27  ;;  %v608_v31 = vpop.f32.mrb[3].mxu0  ;;  %v443_v32 = vpop.f32.mrb[6].mxu1 }
  0xef   : > { %v632_v33 = vpop.f32.mrb[7].mxu1 }
  0xf0   : > { %vm449_vm8 = vcmp.ge.f32.partialorder %v327_v29, 0.0  ;;  %v451_v34 = vmul.f32 0.2, %v327_v29  ;;  %v328_v35 = vadd.f32 %v566_v22, %v318_v30 }
  0xf2   : > { %v453_v36 = vsel %vm449_vm8, %v327_v29, %v451_v34  ;;  %vm450_vm9 = vcmp.ge.f32.partialorder %v328_v35, 0.0  ;;  %v452_v37 = vmul.f32 0.2, %v328_v35 }
  0xf3   : > { %v585_v38 = vpack.c.bf16 %v453_v36, %v453_v36  ;;  %v387_v39 = vpop.f32.mrb[4].mxu0 }
  0xf4   : > { %v454_v40 = vsel %vm450_vm9, %v328_v35, %v452_v37  ;;  %v441_v41 = vadd.f32 %v440_v26, %v387_v39  ;;  %v623_v42 = vpop.f32.mrb[5].mxu0 }
  0xf5   : > { %v586_v43 = vpack.c.bf16 %v454_v40, %v454_v40  ;;  %v390_v44 = vpop.f32.mrb[6].mxu0  ;;  %470 = vst.msk [vmem:[%s170_s11] sm:$0xf] %vm469_vm10, %v585_v38 }
  0xf6   : > { %v447_v45 = vadd.f32 %v566_v22, %v441_v41  ;;  %v444_v46 = vadd.f32 %v443_v32, %v390_v44  ;;  %v624_v47 = vpop.f32.mrb[7].mxu0 }
  0xf7   : > { %471 = vst.msk [vmem:[%s170_s11 + $0x4] sm:$0xf] %vm469_vm10, %v586_v43 }
  0xf8   : > { %v448_v48 = vadd.f32 %v566_v22, %v444_v46  ;;  %vm455_vm11 = vcmp.ge.f32.partialorder %v447_v45, 0.0  ;;  %v457_v49 = vmul.f32 0.2, %v447_v45 }
  0xfa   : > { %v458_v50 = vmul.f32 0.2, %v448_v48  ;;  %v459_v51 = vsel %vm455_vm11, %v447_v45, %v457_v49  ;;  %vm456_vm12 = vcmp.ge.f32.partialorder %v448_v48, 0.0 }
  0xfb   : > { %v587_v52 = vpack.c.bf16 %v459_v51, %v459_v51 }
  0xfc   : > { %v460_v53 = vsel %vm456_vm12, %v448_v48, %v458_v50 }
  0xfd   : > { %478 = vrot.lane.b32.xlu0 %v587_v52, %s663_s13  ;;  %v588_v54 = vpack.c.bf16 %v460_v53, %v460_v53 }
 0x101   : > { %480 = vrot.lane.b32.xlu0 %v588_v54, %s663_s13 }
 0x16f   : > { %v479_v55 = vpop.permute.xlu0 %478 }
 0x170   : > { %485 = vst.msk [vmem:[%s170_s11] sm:$0xf] %vm484_vm13, %v479_v55 }
 0x173   : > { %v481_v56 = vpop.permute.xlu0 %480 }
 0x174   : > { %486 = vst.msk [vmem:[%s170_s11 + $0x4] sm:$0xf] %vm484_vm13, %v481_v56 }
 0x175 PF: > { %s13_s12 = sadd.s32 1, %s659_s12  }
 0x176   : > { %p10_p4 = scmp.ge.s32.totalorder %s13_s12, 10  }
 0x178   :  { %12 = sbr.rel (!%p10_p4) target bundleno = 1 (0x1), region = 65 }

// kernel: fwd.16
= control target key start
LH: loop header
LB: loop body
LE: loop exit
PB: predicated region body
PF: predicated region fallthrough
CT: control target
= control target key end

     0   :  { %s804_s12 = smov 0   ;;  %s890_s0 = inlined_call_operand.vmem [shape: bf16[8,32,32], index: 0, kind: input, shape index: {}]   ;;  %s891_s1 = inlined_call_operand.vmem [shape: bf16[4,32,32], index: 1, kind: input, shape index: {}]   ;;  %s892_s2 = inlined_call_operand.vmem [shape: f32[1,32], index: 2, kind: input, shape index: {}]   ;;  %s893_s3 = inlined_call_operand.vmem [shape: bf16[8,32,64], index: 3, kind: output, shape index: {}]  }
   0x1 LB: > { %s640_s13 = sadd.s32 4294967295, %s781_s12   ;;  %p644_p0 = scmp.ge.s32.totalorder %s781_s12, 1  ;;  %s781_s12 = sphi %s804_s12, %s13_s12  }
   0x2   : > { %p137_p1 = scmp.lt.s32.totalorder %s781_s12, 9 }
   0x4   : > { %p138_p2 = pnand %p644_p0, %p137_p1 }
   0x5   : > { %v765_v0 = vld [vmem:[%s891_s1] sm:$0xff] (!%p138_p2)   ;;  %p161_p3 = scmp.lt.s32.totalorder (!%p138_p2), %s640_s13, 7  ;;  %v766_v1 = vld [vmem:[%s891_s1 + $0x8] sm:$0xff] (!%p138_p2)   ;;  %vm206_vm0 = vsmask.f32 (!%p138_p2), 7424  ;;  %vm213_vm1 = vcmask (!%p138_p2), 1047552  }
   0x6   : > { %141 = sbr.rel (%p138_p2) target bundleno = 377 (0x179), region = 32  ;;  %732 = vmatprep.subr.bf16.mxu1 (!%p138_p2), %v765_v0  ;;  %v769_v2 = vld [vmem:[%s891_s1 + $0x20] sm:$0xff] (!%p138_p2)   ;;  %v771_v3 = vld [vmem:[%s891_s1 + $0x30] sm:$0xff] (!%p138_p2)   ;;  %vm186_vm2 = vsmask.f32 (!%p138_p2), 256  ;;  %v772_v6 = vld [vmem:[%s891_s1 + $0x38] sm:$0xff] (!%p138_p2)  }
   0x7   : > { %733 = vmatpush3.bf16.msra.mxu1 (!%p138_p2), %v765_v0  ;;  %716 = vmatprep.subr.bf16.mxu0 (!%p138_p2), %v771_v3  ;;  %vm203_vm3 = vcmask (!%p138_p2), 1040384   ;;  %v773_v11 = vld [vmem:[%s891_s1 + $0x10] sm:$0xff] (!%p138_p2)   ;;  %vm840_vm4 = vmand (!%p138_p2), %vm213_vm1, %vm206_vm0  ;;  %vm239_vm5 = vcmask (!%p138_p2), 261120   ;;  %v770_v23 = vld [vmem:[%s891_s1 + $0x28] sm:$0xff] (!%p138_p2)   ;;  %vm551_vm7 = vcmask (!%p138_p2), 257024   ;;  %s783_s14 = smov (!%p138_p2), 32  }
   0x8   : > { %734 = vmatprep.subr.bf16.mxu1 (!%p138_p2), %v766_v1  ;;  %717 = vmatpush3.bf16.msra.mxu0 (!%p138_p2), %v771_v3  ;;  %vm204_vm6 = vmand (!%p138_p2), %vm203_vm3, %vm186_vm2  ;;  %v774_v26 = vld [vmem:[%s891_s1 + $0x18] sm:$0xff] (!%p138_p2)   ;;  %v667_v27 = vld [vmem:[%s892_s2] ss:$0 sm:$0xff] (!%p138_p2) }
   0x9   : > { %718 = vmatprep.subr.bf16.mxu0 (!%p138_p2), %v772_v6 }
   0xb   : > { %735 = vmatpush3.bf16.msra.mxu1 (!%p138_p2), %v766_v1 }
   0xc   : > { %740 = vmatprep.subr.bf16.mxu1 (!%p138_p2), %v769_v2  ;;  %719 = vmatpush3.bf16.msra.mxu0 (!%p138_p2), %v772_v6 }
   0xd   : > { %s897_s13 = smov (!%p161_p3, %s640_s13), 7  ;;  %724 = vmatprep.subr.bf16.mxu0 %v773_v11 }
   0xe   : > { %s690_s18 = sshll.u32 %s897_s13, 4 }
   0xf   : > { %s165_s23 = scalar_lea.vmem %s890_s0, %s690_s18  ;;  %s872_s11 = scalar_lea.vmem %s893_s3, %s690_s18 }
  0x10   : > { %v767_v4 = vld [vmem:[%s165_s23] sm:$0xff]   ;;  %v768_v5 = vld [vmem:[%s165_s23 + $0x8] sm:$0xff]  }
  0x11   : > { %v188_v7 = vshrl.u32 %v767_v4, 16  ;;  %v191_v8 = vshll.u32 %v767_v4, 16  ;;  %v198_v9 = vshll.u32 %v768_v5, 16  ;;  %v195_v10 = vshrl.u32 %v768_v5, 16 }
  0x13   : > { %v207_v12 = vrot.slane %v191_v8, 1  ;;  %v209_v13 = vrot.slane %v198_v9, 1  ;;  %v197_v15 = vrot.slane %v195_v10, 7  ;;  %v190_v16 = vrot.slane %v188_v7, 7 }
  0x15   : > { %v208_v17 = vor.u32 %v207_v12, %v188_v7  ;;  %v211_v18 = vor.u32 %v209_v13, %v195_v10  ;;  %v193_v19 = vor.u32 %v191_v8, %v190_v16  ;;  %v200_v20 = vor.u32 %v198_v9, %v197_v15 }
  0x17   : > { %v210_v21 = vsel %vm206_vm0, %v208_v17, %v209_v13  ;;  %v215_v22 = vsel %vm840_vm4, %v211_v18, 0  ;;  %v205_v24 = vsel %vm204_vm6, 0, %v193_v19  ;;  %v201_v25 = vsel %vm186_vm2, %v190_v16, %v200_v20 }
  0x18   : > { %736 = vmatprep.mubr.msk.bf16.mxu1 %vm239_vm5, %v210_v21  ;;  %720 = vmatprep.mubr.msk.bf16.mxu0 %vm239_vm5, %v205_v24  ;;  %vm580_vm0 = vcmask 519424  }
  0x19   : > { %737 = vmatmul.mubr.msk.bf16.vlgmr.msra.gmra.mrb[0].mxu1 %vm239_vm5, %v215_v22  ;;  %721 = vmatmul.mubr.msk.bf16.vlgmr.msra.gmra.mrb[0].mxu0 %vm239_vm5, %v201_v25 }
  0x1a   : > { %741 = vmatpush3.bf16.msra.mxu1 %v769_v2  ;;  %744 = vmatprep.mubr.msk.bf16.mxu1 %vm239_vm5, %v767_v4 }
  0x1b   : > { %742 = vmatprep.subr.bf16.mxu1 %v770_v23  ;;  %725 = vmatpush3.bf16.msra.mxu0 %v773_v11 }
  0x1c   : > { %726 = vmatprep.subr.bf16.mxu0 %v774_v26  ;;  %728 = vmatprep.mubr.msk.bf16.mxu0 %vm239_vm5, %v767_v4 }
  0x1e   : > { %743 = vmatpush3.bf16.msra.mxu1 %v770_v23 }
  0x1f   : > { %727 = vmatpush3.bf16.msra.mxu0 %v774_v26 }
  0x25   : > { %745 = vmatmul.mubr.msk.bf16.vlgmr.msra.gmra.mrb[0].mxu1 %vm239_vm5, %v768_v5  ;;  %729 = vmatmul.mubr.msk.bf16.vlgmr.msra.gmra.mrb[0].mxu0 %vm239_vm5, %v768_v5 }
  0xf8   : > { %v746_v28 = vpop.f32.mrb[0].mxu1  ;;  %v730_v29 = vpop.f32.mrb[0].mxu0 }
  0xf9   : > { %v509_v30 = vadd.f32 %v746_v28, %v667_v27  ;;  %v492_v31 = vpop.f32.mrb[1].mxu1  ;;  %v368_v32 = vadd.f32 %v730_v29, %v667_v27  ;;  %v345_v33 = vpop.f32.mrb[1].mxu0 }
  0xfa   : > { %v507_v34 = vadd.f32 %v667_v27, %v492_v31  ;;  %v747_v35 = vpop.f32.mrb[2].mxu1  ;;  %v366_v36 = vadd.f32 %v667_v27, %v345_v33  ;;  %v731_v37 = vpop.f32.mrb[2].mxu0 }
  0xfb   : > { %v529_v38 = vmul.f32 0.2, %v509_v30  ;;  %v510_v39 = vadd.f32 %v747_v35, %v667_v27  ;;  %v495_v40 = vpop.f32.mrb[3].mxu1  ;;  %vm525_vm8 = vcmp.ge.f32.partialorder %v509_v30, 0.0  ;;  %vm513_vm9 = vcmp.ge.f32.partialorder %v368_v32, 0.0  ;;  %v348_v41 = vpop.f32.mrb[3].mxu0 }
  0xfc   : > { %v527_v42 = vmul.f32 0.2, %v507_v34  ;;  %v508_v43 = vadd.f32 %v667_v27, %v495_v40  ;;  %vm523_vm10 = vcmp.ge.f32.partialorder %v507_v34, 0.0  ;;  %v517_v44 = vmul.f32 0.2, %v368_v32 }
  0xfd   : > { %vm526_vm11 = vcmp.ge.f32.partialorder %v510_v39, 0.0  ;;  %v530_v45 = vmul.f32 0.2, %v510_v39  ;;  %v533_v46 = vsel %vm525_vm8, %v509_v30, %v529_v38  ;;  %vm511_vm12 = vcmp.ge.f32.partialorder %v366_v36, 0.0 }
  0xfe   : > { %vm524_vm13 = vcmp.ge.f32.partialorder %v508_v43, 0.0  ;;  %v528_v47 = vmul.f32 0.2, %v508_v43  ;;  %v698_v48 = vpack.c.bf16 %v533_v46, %v533_v46  ;;  %v531_v49 = vsel %vm523_vm10, %v507_v34, %v527_v42 }
  0xff   : > { %v696_v50 = vpack.c.bf16 %v531_v49, %v531_v49  ;;  %v534_v51 = vsel %vm526_vm11, %v510_v39, %v530_v45  ;;  %v521_v52 = vsel %vm513_vm9, %v368_v32, %v517_v44  ;;  %v515_v53 = vmul.f32 0.2, %v366_v36 }
 0x100   : > { %572 = vrot.lane.b32.xlu1 %v698_v48, %s783_s14  ;;  %v532_v54 = vsel %vm524_vm13, %v508_v43, %v528_v47  ;;  %v694_v55 = vpack.c.bf16 %v521_v52, %v521_v52  ;;  %v369_v56 = vadd.f32 %v731_v37, %v667_v27  ;;  %v367_v58 = vadd.f32 %v667_v27, %v348_v41 }
 0x101   : > { %568 = vrot.lane.b32.xlu0 %v696_v50, %s783_s14  ;;  %v519_v57 = vsel %vm511_vm12, %v366_v36, %v515_v53  ;;  %v699_v59 = vpack.c.bf16 %v534_v51, %v534_v51  ;;  %v697_v62 = vpack.c.bf16 %v532_v54, %v532_v54 }
 0x102   : > { %v692_v60 = vpack.c.bf16 %v519_v57, %v519_v57  ;;  %vm514_vm14 = vcmp.ge.f32.partialorder %v369_v56, 0.0  ;;  %v518_v61 = vmul.f32 0.2, %v369_v56  ;;  %554 = vst.msk [vmem:[%s872_s11 + $0x8] sm:$0xf] %vm551_vm7, %v694_v55  ;;  %vm512_vm15 = vcmp.ge.f32.partialorder %v367_v58, 0.0 }
 0x103   : > { %v516_v63 = vmul.f32 0.2, %v367_v58 }
 0x104   : > { %574 = vrot.lane.b32.xlu1 %v699_v59, %s783_s14  ;;  %v522_v0 = vsel %vm514_vm14, %v369_v56, %v518_v61  ;;  %552 = vst.msk [vmem:[%s872_s11] sm:$0xf] %vm551_vm7, %v692_v60 }
 0x105   : > { %570 = vrot.lane.b32.xlu0 %v697_v62, %s783_s14  ;;  %v695_v1 = vpack.c.bf16 %v522_v0, %v522_v0  ;;  %v520_v2 = vsel %vm512_vm15, %v367_v58, %v516_v63 }
 0x106   : > { %v693_v3 = vpack.c.bf16 %v520_v2, %v520_v2 }
 0x107   : > { %555 = vst.msk [vmem:[%s872_s11 + $0xc] sm:$0xf] %vm551_vm7, %v695_v1 }
 0x108   : > { %553 = vst.msk [vmem:[%s872_s11 + $0x4] sm:$0xf] %vm551_vm7, %v693_v3 }
 0x172   : > { %v573_v4 = vpop.permute.xlu1 %572 }
 0x173   : > { %583 = vst.msk [vmem:[%s872_s11 + $0x8] sm:$0xf] %vm580_vm0, %v573_v4  ;;  %v569_v5 = vpop.permute.xlu0 %568 }
 0x174   : > { %581 = vst.msk [vmem:[%s872_s11] sm:$0xf] %vm580_vm0, %v569_v5 }
 0x176   : > { %v575_v6 = vpop.permute.xlu1 %574 }
 0x177   : > { %584 = vst.msk [vmem:[%s872_s11 + $0xc] sm:$0xf] %vm580_vm0, %v575_v6  ;;  %v571_v7 = vpop.permute.xlu0 %570 }
 0x178   : > { %582 = vst.msk [vmem:[%s872_s11 + $0x4] sm:$0xf] %vm580_vm0, %v571_v7 }
 0x179 PF: > { %s13_s12 = sadd.s32 1, %s781_s12  }
 0x17a   : > { %p10_p4 = scmp.ge.s32.totalorder %s13_s12, 10  }
 0x17c   :  { %12 = sbr.rel (!%p10_p4) target bundleno = 1 (0x1), region = 65 }

// kernel: fwd.17
= control target key start
LH: loop header
LB: loop body
LE: loop exit
PB: predicated region body
PF: predicated region fallthrough
CT: control target
= control target key end

     0   :  { %s829_s12 = smov 0   ;;  %s924_s0 = inlined_call_operand.vmem [shape: bf16[8,64,32], index: 0, kind: input, shape index: {}]   ;;  %s925_s1 = inlined_call_operand.vmem [shape: bf16[3,32,32], index: 1, kind: input, shape index: {}]   ;;  %s926_s2 = inlined_call_operand.vmem [shape: f32[1,32], index: 2, kind: input, shape index: {}]   ;;  %s927_s3 = inlined_call_operand.vmem [shape: bf16[8,64,32], index: 3, kind: output, shape index: {}]  }
   0x1 LB: > { %s649_s13 = sadd.s32 4294967295, %s807_s12   ;;  %p653_p0 = scmp.ge.s32.totalorder %s807_s12, 1  ;;  %s807_s12 = sphi %s829_s12, %s13_s12  }
   0x2   : > { %p137_p1 = scmp.lt.s32.totalorder %s807_s12, 9 }
   0x4   : > { %p138_p2 = pnand %p653_p0, %p137_p1 }
   0x5   : > { %v791_v0 = vld [vmem:[%s925_s1 + $0x10] sm:$0xff] (!%p138_p2)   ;;  %p161_p3 = scmp.lt.s32.totalorder (!%p138_p2), %s649_s13, 7  ;;  %v792_v1 = vld [vmem:[%s925_s1 + $0x18] sm:$0xff] (!%p138_p2)   ;;  %v793_v2 = vld [vmem:[%s925_s1] sm:$0xff] (!%p138_p2)   ;;  %vm200_vm0 = vsmask.f32 (!%p138_p2), 256 }
   0x6   : > { %141 = sbr.rel (%p138_p2) target bundleno = 267 (0x10b), region = 32  ;;  %727 = vmatprep.subr.bf16.mxu1 (!%p138_p2), %v791_v0  ;;  %v796_v3 = vld [vmem:[%s925_s1 + $0x8] sm:$0xff] (!%p138_p2)   ;;  %739 = vmatprep.subr.bf16.mxu0 (!%p138_p2), %v793_v2  ;;  %vm273_vm1 = vcmask (!%p138_p2), 261120   ;;  %v797_v4 = vld [vmem:[%s925_s1 + $0x20] sm:$0xff] (!%p138_p2)   ;;  %vm233_vm2 = vcmask (!%p138_p2), 1040384   ;;  %vm249_vm5 = vcmask (!%p138_p2), 1047552  }
   0x7   : > { %728 = vmatpush3.bf16.msra.mxu1 (!%p138_p2), %v791_v0  ;;  %740 = vmatpush3.bf16.msra.mxu0 (!%p138_p2), %v793_v2  ;;  %vm868_vm3 = vmand (!%p138_p2), %vm233_vm2, %vm200_vm0  ;;  %vm236_vm4 = vsmask.f32 (!%p138_p2), 7424  ;;  %v800_v24 = vld [vmem:[%s925_s1 + $0x28] sm:$0xff] (!%p138_p2)   ;;  %v688_v48 = vld [vmem:[%s926_s2] ss:$0 sm:$0xff] (!%p138_p2)  ;;  %vm585_vm7 = vcmask (!%p138_p2), 257024  }
   0x8   : > { %729 = vmatprep.subr.bf16.mxu1 (!%p138_p2), %v792_v1  ;;  %741 = vmatprep.subr.bf16.mxu0 (!%p138_p2), %v796_v3  ;;  %vm250_vm6 = vmand (!%p138_p2), %vm249_vm5, %vm236_vm4 }
   0xb   : > { %730 = vmatpush3.bf16.msra.mxu1 (!%p138_p2), %v792_v1  ;;  %742 = vmatpush3.bf16.msra.mxu0 (!%p138_p2), %v796_v3 }
   0xc   : > { %763 = vmatprep.subr.bf16.mxu1 (!%p138_p2), %v793_v2  ;;  %751 = vmatprep.subr.bf16.mxu0 (!%p138_p2), %v797_v4 }
   0xd   : > { %s931_s13 = smov (!%p161_p3, %s649_s13), 7 }
   0xe   : > { %s699_s22 = sshll.u32 %s931_s13, 5 }
   0xf   : > { %s857_s25 = scalar_lea.vmem %s924_s0, %s699_s22  ;;  %s903_s7 = scalar_lea.vmem %s927_s3, %s699_s22 }
  0x10   : > { %v794_v5 = vld [vmem:[%s857_s25] sm:$0xff]   ;;  %v795_v6 = vld [vmem:[%s857_s25 + $0x8] sm:$0xff]   ;;  %v798_v11 = vld [vmem:[%s857_s25 + $0x10] sm:$0xff]  }
  0x11   : > { %731 = vmatprep.mubr.msk.bf16.mxu1 %vm273_vm1, %v794_v5  ;;  %v202_v7 = vshrl.u32 %v794_v5, 16  ;;  %v205_v8 = vshll.u32 %v794_v5, 16  ;;  %v209_v9 = vshrl.u32 %v795_v6, 16  ;;  %v212_v10 = vshll.u32 %v795_v6, 16  ;;  %v799_v22 = vld [vmem:[%s857_s25 + $0x18] sm:$0xff]  }
  0x12   : > { %732 = vmatmul.mubr.msk.bf16.vlgmr.msra.gmra.mrb[0].mxu1 %vm273_vm1, %v795_v6  ;;  %v220_v16 = vshll.u32 %v798_v11, 16  ;;  %v217_v20 = vshrl.u32 %v798_v11, 16  ;;  %v225_v28 = vshrl.u32 %v799_v22, 16  ;;  %v228_v32 = vshll.u32 %v799_v22, 16 }
  0x13   : > { %v204_v12 = vrot.slane %v202_v7, 7  ;;  %v237_v13 = vrot.slane %v205_v8, 1  ;;  %765 = vmatpush3.bf16.msra.mxu1 %v793_v2  ;;  %v211_v15 = vrot.slane %v209_v9, 7  ;;  %735 = vmatprep.mubr.msk.bf16.mxu1 %vm273_vm1, %v798_v11  ;;  %v239_v19 = vrot.slane %v212_v10, 1 }
  0x14   : > { %764 = vmatprep.subr.bf16.mxu1 %v796_v3  ;;  %v219_v26 = vrot.slane %v217_v20, 7  ;;  %v227_v31 = vrot.slane %v225_v28, 7  ;;  %v242_v33 = vrot.slane %v220_v16, 1  ;;  %v245_v36 = vrot.slane %v228_v32, 1 }
  0x15   : > { %v207_v17 = vor.u32 %v205_v8, %v204_v12  ;;  %v238_v18 = vor.u32 %v237_v13, %v202_v7  ;;  %v214_v21 = vor.u32 %v212_v10, %v211_v15  ;;  %v241_v34 = vor.u32 %v239_v19, %v209_v9 }
  0x16   : > { %v222_v29 = vor.u32 %v220_v16, %v219_v26  ;;  %v244_v35 = vor.u32 %v242_v33, %v217_v20  ;;  %v230_v37 = vor.u32 %v228_v32, %v227_v31  ;;  %v247_v41 = vor.u32 %v245_v36, %v225_v28 }
  0x17   : > { %v235_v23 = vsel %vm868_vm3, 0, %v207_v17  ;;  %v240_v25 = vsel %vm236_vm4, %v238_v18, %v239_v19  ;;  %v215_v27 = vsel %vm200_vm0, %v204_v12, %v214_v21  ;;  %766 = vmatpush3.bf16.msra.mxu1 %v796_v3  ;;  %v243_v38 = vsel %vm236_vm4, %v241_v34, %v242_v33 }
  0x18   : > { %743 = vmatprep.mubr.msk.bf16.mxu0 %vm273_vm1, %v235_v23  ;;  %v223_v30 = vsel %vm200_vm0, %v211_v15, %v222_v29  ;;  %v246_v39 = vsel %vm236_vm4, %v244_v35, %v245_v36  ;;  %v231_v40 = vsel %vm200_vm0, %v219_v26, %v230_v37  ;;  %v251_v42 = vsel %vm250_vm6, %v247_v41, 0 }
  0x19   : > { %744 = vmatmul.mubr.msk.bf16.vlgmr.msra.gmra.mrb[0].mxu0 %vm273_vm1, %v215_v27 }
  0x1a   : > { %752 = vmatpush3.bf16.msra.mxu0 %v797_v4  ;;  %755 = vmatprep.mubr.msk.bf16.mxu0 %vm273_vm1, %v240_v25 }
  0x1b   : > { %736 = vmatmul.mubr.msk.bf16.gmra.mrb[4].mxu1 %vm273_vm1, %v799_v22  ;;  %753 = vmatprep.subr.bf16.mxu0 %v800_v24 }
  0x1c   : > { %747 = vmatprep.mubr.msk.bf16.mxu1 %vm273_vm1, %v223_v30 }
  0x1e   : > { %754 = vmatpush3.bf16.msra.mxu0 %v800_v24 }
  0x25   : > { %756 = vmatmul.mubr.msk.bf16.vlgmr.msra.gmra.mrb[0].mxu0 %vm273_vm1, %v243_v38 }
  0x26   : > { %759 = vmatprep.mubr.msk.bf16.mxu0 %vm273_vm1, %v246_v39 }
  0x27   : > { %748 = vmatmul.mubr.msk.bf16.vlgmr.msra.gmra.mrb[4].mxu1 %vm273_vm1, %v231_v40 }
  0x2d   : > { %760 = vmatmul.mubr.msk.bf16.gmra.mrb[4].mxu0 %vm273_vm1, %v251_v42 }
  0xe5   : > { %v733_v43 = vpop.f32.mrb[0].mxu1 }
  0xe6   : > { %v316_v44 = vpop.f32.mrb[1].mxu1 }
  0xe7   : > { %v734_v45 = vpop.f32.mrb[2].mxu1 }
  0xe8   : > { %v319_v46 = vpop.f32.mrb[3].mxu1 }
  0xf8   : > { %v757_v47 = vpop.f32.mrb[0].mxu0 }
  0xf9   : > { %v767_v49 = vadd.f32 %v757_v47, %v733_v43  ;;  %v499_v50 = vpop.f32.mrb[1].mxu0 }
  0xfa   : > { %v768_v51 = vadd.f32 %v499_v50, %v316_v44  ;;  %v749_v52 = vpop.f32.mrb[4].mxu1  ;;  %v758_v53 = vpop.f32.mrb[2].mxu0 }
  0xfb   : > { %v547_v54 = vadd.f32 %v767_v49, %v688_v48  ;;  %v769_v55 = vadd.f32 %v758_v53, %v734_v45  ;;  %v421_v56 = vpop.f32.mrb[5].mxu1  ;;  %v502_v57 = vpop.f32.mrb[3].mxu0 }
  0xfc   : > { %v545_v58 = vadd.f32 %v768_v51, %v688_v48  ;;  %v770_v59 = vadd.f32 %v502_v57, %v319_v46  ;;  %v750_v60 = vpop.f32.mrb[6].mxu1 }
  0xfd   : > { %v703_v61 = vpack.c.bf16 %v547_v54, %v547_v54  ;;  %v548_v62 = vadd.f32 %v769_v55, %v688_v48  ;;  %v424_v63 = vpop.f32.mrb[7].mxu1 }
  0xfe   : > { %v701_v0 = vpack.c.bf16 %v545_v58, %v545_v58  ;;  %v546_v1 = vadd.f32 %v770_v59, %v688_v48 }
  0xff   : > { %588 = vst.msk [vmem:[%s903_s7 + $0x8] sm:$0xf] %vm585_vm7, %v703_v61  ;;  %v704_v2 = vpack.c.bf16 %v548_v62, %v548_v62 }
 0x100   : > { %586 = vst.msk [vmem:[%s903_s7] sm:$0xf] %vm585_vm7, %v701_v0  ;;  %v702_v3 = vpack.c.bf16 %v546_v1, %v546_v1  ;;  %v761_v4 = vpop.f32.mrb[4].mxu0 }
 0x101   : > { %589 = vst.msk [vmem:[%s903_s7 + $0xc] sm:$0xf] %vm585_vm7, %v704_v2  ;;  %v771_v5 = vadd.f32 %v761_v4, %v749_v52  ;;  %v515_v6 = vpop.f32.mrb[5].mxu0 }
 0x102   : > { %587 = vst.msk [vmem:[%s903_s7 + $0x4] sm:$0xf] %vm585_vm7, %v702_v3  ;;  %v772_v7 = vadd.f32 %v515_v6, %v421_v56  ;;  %v762_v8 = vpop.f32.mrb[6].mxu0 }
 0x103   : > { %v551_v9 = vadd.f32 %v771_v5, %v688_v48  ;;  %v773_v10 = vadd.f32 %v762_v8, %v750_v60  ;;  %v518_v11 = vpop.f32.mrb[7].mxu0 }
 0x104   : > { %v549_v12 = vadd.f32 %v772_v7, %v688_v48  ;;  %v774_v13 = vadd.f32 %v518_v11, %v424_v63 }
 0x105   : > { %v707_v14 = vpack.c.bf16 %v551_v9, %v551_v9  ;;  %v552_v15 = vadd.f32 %v773_v10, %v688_v48 }
 0x106   : > { %v705_v16 = vpack.c.bf16 %v549_v12, %v549_v12  ;;  %v550_v17 = vadd.f32 %v774_v13, %v688_v48 }
 0x107   : > { %592 = vst.msk [vmem:[%s903_s7 + $0x18] sm:$0xf] %vm585_vm7, %v707_v14  ;;  %v708_v18 = vpack.c.bf16 %v552_v15, %v552_v15 }
 0x108   : > { %590 = vst.msk [vmem:[%s903_s7 + $0x10] sm:$0xf] %vm585_vm7, %v705_v16  ;;  %v706_v19 = vpack.c.bf16 %v550_v17, %v550_v17 }
 0x109   : > { %593 = vst.msk [vmem:[%s903_s7 + $0x1c] sm:$0xf] %vm585_vm7, %v708_v18 }
 0x10a   : > { %591 = vst.msk [vmem:[%s903_s7 + $0x14] sm:$0xf] %vm585_vm7, %v706_v19 }
 0x10b PF: > { %s13_s12 = sadd.s32 1, %s807_s12  }
 0x10c   : > { %p10_p4 = scmp.ge.s32.totalorder %s13_s12, 10  }
 0x10e   :  { %12 = sbr.rel (!%p10_p4) target bundleno = 1 (0x1), region = 64 }

// kernel: fwd.18
= control target key start
LH: loop header
LB: loop body
LE: loop exit
PB: predicated region body
PF: predicated region fallthrough
CT: control target
= control target key end

     0   :  { %s1119_s12 = smov 0   ;;  %s1307_s0 = inlined_call_operand.vmem [shape: bf16[512,32], index: 0, kind: input, shape index: {}]   ;;  %s1308_s1 = inlined_call_operand.vmem [shape: bf16[32,65], index: 1, kind: input, shape index: {}]   ;;  %s1309_s2 = inlined_call_operand.vmem [shape: f32[1,65], index: 2, kind: input, shape index: {}]   ;;  %s1310_s3 = inlined_call_operand.vmem [shape: f32[512,65], index: 3, kind: output, shape index: {}]  }
   0x1 LB: > { %s833_s13 = sadd.s32 4294967295, %s1097_s12   ;;  %p837_p0 = scmp.ge.s32.totalorder %s1097_s12, 1  ;;  %s1097_s12 = sphi %s1119_s12, %s13_s12  }
   0x2   : > { %p138_p1 = scmp.lt.s32.totalorder %s1097_s12, 3 }
   0x4   : > { %p139_p2 = pnand %p837_p0, %p138_p1 }
   0x5   : > { %v945_v0 = vld [vmem:[%s1308_s1] sm:$0xff] (!%p139_p2)   ;;  %s838_s16 = sshll.u32 (!%p139_p2), %s833_s13, 5  ;;  %v946_v1 = vld [vmem:[%s1308_s1 + $0x8] sm:$0xff] (!%p139_p2)   ;;  %vm310_vm0 = vcmask (!%p139_p2), 261120   ;;  %vm744_vm1 = vcmask (!%p139_p2), 531456  }
   0x6   : > { %142 = sbr.rel (%p139_p2) target bundleno = 322 (0x142), region = 32  ;;  %p163_p3 = scmp.lt.s32.totalorder (!%p139_p2), %s838_s16, 63  ;;  %897 = vmatprep.subr.bf16.mxu0 (!%p139_p2), %v945_v0  ;;  %933 = vmatprep.subr.bf16.mxu1 (!%p139_p2), %v945_v0  ;;  %v1176_v18 = vld [vmem:[%s1309_s2] ss:$0 sm:$0xff] (!%p139_p2) }
   0x7   : > { %898 = vmatpush3.bf16.msra.mxu0 (!%p139_p2), %v945_v0  ;;  %935 = vmatpush3.bf16.msra.mxu1 (!%p139_p2), %v945_v0 }
   0x8   : > { %899 = vmatprep.subr.bf16.mxu0 (!%p139_p2), %v946_v1  ;;  %934 = vmatprep.subr.bf16.mxu1 (!%p139_p2), %v946_v1 }
   0xb   : > { %900 = vmatpush3.bf16.msra.mxu0 (!%p139_p2), %v946_v1  ;;  %936 = vmatpush3.bf16.msra.mxu1 (!%p139_p2), %v946_v1 }
   0xd   : > { %s1312_s16 = smov (!%p163_p3, %s838_s16), 63 }
   0xe   : > { %s839_s19 = sshll.u32 %s1312_s16, 2  ;;  %s841_s25 = sshll.u32 %s1312_s16, 3 }
   0xf   : > { %s1139_s22 = scalar_lea.vmem %s1307_s0, %s839_s19  ;;  %s1220_s28 = scalar_lea.vmem %s1310_s3, %s841_s25 }
  0x10   : > { %v947_v2 = vld [vmem:[%s1139_s22] sm:$0xff]   ;;  %v949_v4 = vld [vmem:[%s1139_s22 + $0x8] sm:$0xff]   ;;  %v951_v6 = vld [vmem:[%s1139_s22 + $0x10] sm:$0xff]  }
  0x11   : > { %v948_v3 = vld [vmem:[%s1139_s22 + $0x40] sm:$0xff]   ;;  %901 = vmatprep.mubr.msk.bf16.mxu0 %vm310_vm0, %v947_v2  ;;  %v950_v5 = vld [vmem:[%s1139_s22 + $0x48] sm:$0xff]   ;;  %v952_v7 = vld [vmem:[%s1139_s22 + $0x50] sm:$0xff]  }
  0x12   : > { %917 = vmatprep.mubr.msk.bf16.mxu1 %vm310_vm0, %v948_v3  ;;  %902 = vmatmul.mubr.msk.bf16.vlgmr.msra.gmra.mrb[0].mxu0 %vm310_vm0, %v949_v4  ;;  %v953_v8 = vld [vmem:[%s1139_s22 + $0x18] sm:$0xff]   ;;  %v955_v10 = vld [vmem:[%s1139_s22 + $0x20] sm:$0xff]   ;;  %v957_v12 = vld [vmem:[%s1139_s22 + $0x28] sm:$0xff]  }
  0x13   : > { %918 = vmatmul.mubr.msk.bf16.vlgmr.msra.gmra.mrb[0].mxu1 %vm310_vm0, %v950_v5  ;;  %905 = vmatprep.mubr.msk.bf16.mxu0 %vm310_vm0, %v951_v6  ;;  %v954_v9 = vld [vmem:[%s1139_s22 + $0x58] sm:$0xff]   ;;  %v956_v11 = vld [vmem:[%s1139_s22 + $0x60] sm:$0xff]   ;;  %v958_v13 = vld [vmem:[%s1139_s22 + $0x68] sm:$0xff]  }
  0x14   : > { %921 = vmatprep.mubr.msk.bf16.mxu1 %vm310_vm0, %v952_v7  ;;  %v959_v14 = vld [vmem:[%s1139_s22 + $0x30] sm:$0xff]   ;;  %v961_v16 = vld [vmem:[%s1139_s22 + $0x38] sm:$0xff]  }
  0x15   : > { %v960_v15 = vld [vmem:[%s1139_s22 + $0x70] sm:$0xff]   ;;  %v962_v17 = vld [vmem:[%s1139_s22 + $0x78] sm:$0xff]  }
  0x1a   : > { %906 = vmatmul.mubr.msk.bf16.gmra.mrb[4].mxu0 %vm310_vm0, %v953_v8 }
  0x1b   : > { %922 = vmatmul.mubr.msk.bf16.gmra.mrb[4].mxu1 %vm310_vm0, %v954_v9  ;;  %909 = vmatprep.mubr.msk.bf16.mxu0 %vm310_vm0, %v955_v10 }
  0x1c   : > { %925 = vmatprep.mubr.msk.bf16.mxu1 %vm310_vm0, %v956_v11 }
  0x22   : > { %910 = vmatmul.mubr.msk.bf16.gmra.mrb[8].mxu0 %vm310_vm0, %v957_v12 }
  0x23   : > { %926 = vmatmul.mubr.msk.bf16.gmra.mrb[8].mxu1 %vm310_vm0, %v958_v13  ;;  %913 = vmatprep.mubr.msk.bf16.mxu0 %vm310_vm0, %v959_v14 }
  0x24   : > { %929 = vmatprep.mubr.msk.bf16.mxu1 %vm310_vm0, %v960_v15 }
  0x2a   : > { %914 = vmatmul.mubr.msk.bf16.gmra.mrb[12].mxu0 %vm310_vm0, %v961_v16 }
  0x2b   : > { %930 = vmatmul.mubr.msk.bf16.gmra.mrb[12].mxu1 %vm310_vm0, %v962_v17 }
  0xe5   : > { %v903_v19 = vpop.f32.mrb[0].mxu0 }
  0xe6   : > { %v402_v20 = vadd.f32 %v903_v19, %v1176_v18  ;;  %v919_v21 = vpop.f32.mrb[0].mxu1  ;;  %v393_v22 = vpop.f32.mrb[1].mxu0 }
  0xe7   : > { %v466_v23 = vadd.f32 %v919_v21, %v1176_v18  ;;  %v394_v24 = vadd.f32 %v1176_v18, %v393_v22  ;;  %v457_v25 = vpop.f32.mrb[1].mxu1  ;;  %v904_v26 = vpop.f32.mrb[2].mxu0 }
  0xe8   : > { %v522_v27 = vsub.f32 0.0, %v402_v20  ;;  %v458_v28 = vadd.f32 %v1176_v18, %v457_v25  ;;  %v405_v29 = vadd.f32 %v904_v26, %v1176_v18  ;;  %v920_v30 = vpop.f32.mrb[2].mxu1  ;;  %v396_v31 = vpop.f32.mrb[3].mxu0 }
  0xe9   : > { %v538_v32 = vsub.f32 0.0, %v466_v23  ;;  %v520_v33 = vsub.f32 0.0, %v394_v24  ;;  %v469_v34 = vadd.f32 %v920_v30, %v1176_v18  ;;  %v397_v35 = vadd.f32 %v1176_v18, %v396_v31  ;;  %v460_v36 = vpop.f32.mrb[3].mxu1 }
  0xea   : > { %v556_v37 = vmul.f32 1.442695, %v522_v27  ;;  %v536_v38 = vsub.f32 0.0, %v458_v28  ;;  %v523_v39 = vsub.f32 0.0, %v405_v29  ;;  %v461_v40 = vadd.f32 %v1176_v18, %v460_v36 }
  0xeb   : > { %v588_v41 = vmul.f32 1.442695, %v538_v32  ;;  %v552_v42 = vmul.f32 1.442695, %v520_v33  ;;  %v539_v43 = vsub.f32 0.0, %v469_v34  ;;  %v521_v44 = vsub.f32 0.0, %v397_v35 }
  0xec   : > { %963 = vpow2.f32 %v556_v37  ;;  %v584_v45 = vmul.f32 1.442695, %v536_v38  ;;  %v558_v46 = vmul.f32 1.442695, %v523_v39  ;;  %v537_v47 = vsub.f32 0.0, %v461_v40 }
  0xed   : > { %965 = vpow2.f32 %v588_v41  ;;  %v590_v48 = vmul.f32 1.442695, %v539_v43  ;;  %v907_v49 = vpop.f32.mrb[4].mxu0  ;;  %v554_v50 = vmul.f32 1.442695, %v521_v44 }
  0xee   : > { %967 = vpow2.f32 %v552_v42  ;;  %v418_v51 = vadd.f32 %v907_v49, %v1176_v18  ;;  %v923_v52 = vpop.f32.mrb[4].mxu1  ;;  %v409_v53 = vpop.f32.mrb[5].mxu0  ;;  %v586_v54 = vmul.f32 1.442695, %v537_v47 }
  0xef   : > { %969 = vpow2.f32 %v584_v45  ;;  %v482_v55 = vadd.f32 %v923_v52, %v1176_v18  ;;  %v410_v56 = vadd.f32 %v1176_v18, %v409_v53  ;;  %v473_v57 = vpop.f32.mrb[5].mxu1  ;;  %v908_v58 = vpop.f32.mrb[6].mxu0 }
  0xf0   : > { %971 = vpow2.f32 %v558_v46  ;;  %v526_v59 = vsub.f32 0.0, %v418_v51  ;;  %v474_v60 = vadd.f32 %v1176_v18, %v473_v57  ;;  %v421_v61 = vadd.f32 %v908_v58, %v1176_v18  ;;  %v924_v62 = vpop.f32.mrb[6].mxu1  ;;  %v412_v63 = vpop.f32.mrb[7].mxu0 }
  0xf1   : > { %973 = vpow2.f32 %v590_v48  ;;  %v542_v0 = vsub.f32 0.0, %v482_v55  ;;  %v524_v1 = vsub.f32 0.0, %v410_v56  ;;  %v476_v2 = vpop.f32.mrb[7].mxu1  ;;  %v485_v12 = vadd.f32 %v924_v62, %v1176_v18 }
  0xf2   : > { %975 = vpow2.f32 %v554_v50  ;;  %v564_v3 = vmul.f32 1.442695, %v526_v59  ;;  %v540_v4 = vsub.f32 0.0, %v474_v60  ;;  %v527_v5 = vsub.f32 0.0, %v421_v61 }
  0xf3   : > { %977 = vpow2.f32 %v586_v54  ;;  %v596_v6 = vmul.f32 1.442695, %v542_v0  ;;  %v560_v7 = vmul.f32 1.442695, %v524_v1  ;;  %v413_v17 = vadd.f32 %v1176_v18, %v412_v63 }
  0xf4   : > { %979 = vpow2.f32 %v564_v3  ;;  %v592_v8 = vmul.f32 1.442695, %v540_v4  ;;  %v566_v9 = vmul.f32 1.442695, %v527_v5  ;;  %v477_v23 = vadd.f32 %v1176_v18, %v476_v2 }
  0xf5   : > { %981 = vpow2.f32 %v596_v6  ;;  %v911_v10 = vpop.f32.mrb[8].mxu0  ;;  %v543_v32 = vsub.f32 0.0, %v485_v12  ;;  %v525_v36 = vsub.f32 0.0, %v413_v17 }
  0xf6   : > { %v964_v11 = vpop.eup %963  ;;  %983 = vpow2.f32 %v560_v7  ;;  %v927_v13 = vpop.f32.mrb[8].mxu1  ;;  %v434_v28 = vadd.f32 %v911_v10, %v1176_v18  ;;  %v541_v39 = vsub.f32 0.0, %v477_v23 }
  0xf7   : > { %v425_v14 = vpop.f32.mrb[9].mxu0  ;;  %v966_v15 = vpop.eup %965  ;;  %v618_v16 = vadd.f32 1.0, %v964_v11  ;;  %985 = vpow2.f32 %v592_v8  ;;  %v498_v33 = vadd.f32 %v927_v13, %v1176_v18  ;;  %v598_v46 = vmul.f32 1.442695, %v543_v32 }
  0xf8   : > { %v489_v19 = vpop.f32.mrb[9].mxu1  ;;  %v912_v20 = vpop.f32.mrb[10].mxu0  ;;  %v634_v22 = vadd.f32 1.0, %v966_v15  ;;  %987 = vpow2.f32 %v566_v9  ;;  %v530_v42 = vsub.f32 0.0, %v434_v28  ;;  %v562_v52 = vmul.f32 1.442695, %v525_v36 }
  0xf9   : > { %v968_v21 = vpop.eup %967  ;;  %v928_v24 = vpop.f32.mrb[10].mxu1  ;;  %989 = vrcp.f32 %v618_v16  ;;  %v546_v47 = vsub.f32 0.0, %v498_v33  ;;  %v426_v53 = vadd.f32 %v1176_v18, %v425_v14  ;;  %v594_v58 = vmul.f32 1.442695, %v541_v39 }
  0xfa   : > { %v1194_v25 = vpop.f32.mrb[11].mxu0  ;;  %v970_v26 = vpop.eup %969  ;;  %v616_v27 = vadd.f32 1.0, %v968_v21  ;;  %991 = vrcp.f32 %v634_v22  ;;  %v490_v59 = vadd.f32 %v1176_v18, %v489_v19  ;;  %v572_v0 = vmul.f32 1.442695, %v530_v42 }
  0xfb   : > { %v1197_v29 = vpop.f32.mrb[11].mxu1  ;;  %v972_v30 = vpop.eup %971  ;;  %v632_v31 = vadd.f32 1.0, %v970_v26  ;;  %v437_v1 = vadd.f32 %v912_v20, %v1176_v18  ;;  %v604_v5 = vmul.f32 1.442695, %v546_v47  ;;  %v501_v6 = vadd.f32 %v928_v24, %v1176_v18 }
  0xfc   : > { %v974_v34 = vpop.eup %973  ;;  %993 = vrcp.f32 %v616_v27  ;;  %v619_v35 = vadd.f32 1.0, %v972_v30  ;;  %v528_v9 = vsub.f32 0.0, %v426_v53  ;;  %v429_v10 = vadd.f32 %v1176_v18, %v1194_v25 }
  0xfd   : > { %v976_v37 = vpop.eup %975  ;;  %995 = vrcp.f32 %v632_v31  ;;  %v635_v38 = vadd.f32 1.0, %v974_v34  ;;  %v915_v43 = vpop.f32.mrb[12].mxu0  ;;  %v544_v13 = vsub.f32 0.0, %v490_v59  ;;  %v493_v14 = vadd.f32 %v1176_v18, %v1197_v29 }
  0xfe   : > { %v978_v40 = vpop.eup %977  ;;  %997 = vrcp.f32 %v619_v35  ;;  %v617_v41 = vadd.f32 1.0, %v976_v37  ;;  %v931_v48 = vpop.f32.mrb[12].mxu1  ;;  %v531_v17 = vsub.f32 0.0, %v437_v1  ;;  %v450_v19 = vadd.f32 %v915_v43, %v1176_v18 }
  0xff   : > { %v980_v44 = vpop.eup %979  ;;  %999 = vrcp.f32 %v635_v38  ;;  %v633_v45 = vadd.f32 1.0, %v978_v40  ;;  %v1200_v49 = vpop.f32.mrb[13].mxu0  ;;  %v547_v22 = vsub.f32 0.0, %v501_v6  ;;  %v514_v23 = vadd.f32 %v931_v48, %v1176_v18 }
 0x100   : > { %v982_v50 = vpop.eup %981  ;;  %1001 = vrcp.f32 %v617_v41  ;;  %v622_v51 = vadd.f32 1.0, %v980_v44  ;;  %v1203_v54 = vpop.f32.mrb[13].mxu1  ;;  %v568_v26 = vmul.f32 1.442695, %v528_v9  ;;  %v529_v27 = vsub.f32 0.0, %v429_v10 }
 0x101   : > { %v1205_v55 = vpop.f32.mrb[14].mxu0  ;;  %v984_v56 = vpop.eup %983  ;;  %1003 = vrcp.f32 %v633_v45  ;;  %v638_v57 = vadd.f32 1.0, %v982_v50  ;;  %v600_v30 = vmul.f32 1.442695, %v544_v13  ;;  %v545_v31 = vsub.f32 0.0, %v493_v14 }
 0x102   : > { %v1209_v60 = vpop.f32.mrb[14].mxu1  ;;  %v1211_v61 = vpop.f32.mrb[15].mxu0  ;;  %1005 = vrcp.f32 %v622_v51  ;;  %v620_v63 = vadd.f32 1.0, %v984_v56  ;;  %v574_v34 = vmul.f32 1.442695, %v531_v17  ;;  %v534_v35 = vsub.f32 0.0, %v450_v19 }
 0x103   : > { %v986_v62 = vpop.eup %985  ;;  %v1214_v2 = vpop.f32.mrb[15].mxu1  ;;  %1007 = vrcp.f32 %v638_v57  ;;  %v606_v38 = vmul.f32 1.442695, %v547_v22  ;;  %v550_v39 = vsub.f32 0.0, %v514_v23  ;;  %v570_v42 = vmul.f32 1.442695, %v529_v27 }
 0x104   : > { %v988_v3 = vpop.eup %987  ;;  %v636_v4 = vadd.f32 1.0, %v986_v62  ;;  %1009 = vrcp.f32 %v620_v63  ;;  %v602_v45 = vmul.f32 1.442695, %v545_v31  ;;  %v580_v48 = vmul.f32 1.442695, %v534_v35 }
 0x105   : > { %v990_v7 = vpop.eup %989  ;;  %v623_v8 = vadd.f32 1.0, %v988_v3  ;;  %v442_v6 = vadd.f32 %v1176_v18, %v1200_v49  ;;  %v506_v9 = vadd.f32 %v1176_v18, %v1203_v54  ;;  %v445_v19 = vadd.f32 %v1176_v18, %v1211_v61 }
 0x106   : > { %v992_v11 = vpop.eup %991  ;;  %v714_v12 = vmul.f32 %v990_v7, %v990_v7  ;;  %1011 = vrcp.f32 %v636_v4 }
 0x107   : > { %v994_v15 = vpop.eup %993  ;;  %v730_v16 = vmul.f32 %v992_v11, %v992_v11  ;;  %1013 = vrcp.f32 %v623_v8  ;;  %v532_v17 = vsub.f32 0.0, %v442_v6  ;;  %v533_v61 = vsub.f32 0.0, %v445_v19 }
 0x108   : > { %v996_v20 = vpop.eup %995  ;;  %747 = vst.msk [vmem:[%s1220_s28 + $0x10] sm:$0xff] %vm744_vm1, %v714_v12  ;;  %v712_v21 = vmul.f32 %v994_v15, %v994_v15  ;;  %1015 = vpow2.f32 %v598_v46  ;;  %v453_v12 = vadd.f32 %v1205_v55, %v1176_v18  ;;  %v517_v15 = vadd.f32 %v1209_v60, %v1176_v18 }
 0x109   : > { %v998_v24 = vpop.eup %997  ;;  %763 = vst.msk [vmem:[%s1220_s28 + $0x90] sm:$0xff] %vm744_vm1, %v730_v16  ;;  %v728_v25 = vmul.f32 %v996_v20, %v996_v20  ;;  %1017 = vpow2.f32 %v562_v52  ;;  %v612_v52 = vmul.f32 1.442695, %v550_v39  ;;  %v509_v55 = vadd.f32 %v1176_v18, %v1214_v2 }
 0x10a   : > { %v1000_v28 = vpop.eup %999  ;;  %745 = vst.msk [vmem:[%s1220_s28] sm:$0xff] %vm744_vm1, %v712_v21  ;;  %v715_v29 = vmul.f32 %v998_v24, %v998_v24  ;;  %1019 = vpow2.f32 %v594_v58  ;;  %v548_v21 = vsub.f32 0.0, %v506_v9  ;;  %v535_v24 = vsub.f32 0.0, %v453_v12 }
 0x10b   : > { %v1002_v32 = vpop.eup %1001  ;;  %761 = vst.msk [vmem:[%s1220_s28 + $0x80] sm:$0xff] %vm744_vm1, %v728_v25  ;;  %v731_v33 = vmul.f32 %v1000_v28, %v1000_v28  ;;  %1021 = vpow2.f32 %v572_v0  ;;  %v549_v18 = vsub.f32 0.0, %v509_v55 }
 0x10c   : > { %v1004_v36 = vpop.eup %1003  ;;  %748 = vst.msk [vmem:[%s1220_s28 + $0x18] sm:$0xff] %vm744_vm1, %v715_v29  ;;  %v713_v37 = vmul.f32 %v1002_v32, %v1002_v32  ;;  %1023 = vpow2.f32 %v604_v5  ;;  %v576_v29 = vmul.f32 1.442695, %v532_v17  ;;  %v608_v32 = vmul.f32 1.442695, %v548_v21 }
 0x10d   : > { %v1006_v40 = vpop.eup %1005  ;;  %764 = vst.msk [vmem:[%s1220_s28 + $0x98] sm:$0xff] %vm744_vm1, %v731_v33  ;;  %v729_v41 = vmul.f32 %v1004_v36, %v1004_v36  ;;  %1025 = vpow2.f32 %v568_v26  ;;  %v551_v26 = vsub.f32 0.0, %v517_v15 }
 0x10e   : > { %v1008_v43 = vpop.eup %1007  ;;  %746 = vst.msk [vmem:[%s1220_s28 + $0x8] sm:$0xff] %vm744_vm1, %v713_v37  ;;  %v718_v44 = vmul.f32 %v1006_v40, %v1006_v40  ;;  %1027 = vpow2.f32 %v600_v30  ;;  %v578_v40 = vmul.f32 1.442695, %v533_v61 }
 0x10f   : > { %v1010_v46 = vpop.eup %1009  ;;  %762 = vst.msk [vmem:[%s1220_s28 + $0x88] sm:$0xff] %vm744_vm1, %v729_v41  ;;  %v734_v47 = vmul.f32 %v1008_v43, %v1008_v43  ;;  %1029 = vpow2.f32 %v574_v34  ;;  %v582_v34 = vmul.f32 1.442695, %v535_v24  ;;  %v614_v37 = vmul.f32 1.442695, %v551_v26 }
 0x110   : > { %v1012_v50 = vpop.eup %1011  ;;  %751 = vst.msk [vmem:[%s1220_s28 + $0x30] sm:$0xff] %vm744_vm1, %v718_v44  ;;  %v716_v51 = vmul.f32 %v1010_v46, %v1010_v46  ;;  %1031 = vpow2.f32 %v606_v38  ;;  %v610_v43 = vmul.f32 1.442695, %v549_v18 }
 0x111   : > { %v1014_v53 = vpop.eup %1013  ;;  %767 = vst.msk [vmem:[%s1220_s28 + $0xb0] sm:$0xff] %vm744_vm1, %v734_v47  ;;  %v732_v56 = vmul.f32 %v1012_v50, %v1012_v50  ;;  %1033 = vpow2.f32 %v570_v42 }
 0x112   : > { %v1016_v57 = vpop.eup %1015  ;;  %749 = vst.msk [vmem:[%s1220_s28 + $0x20] sm:$0xff] %vm744_vm1, %v716_v51  ;;  %v719_v58 = vmul.f32 %v1014_v53, %v1014_v53  ;;  %1035 = vpow2.f32 %v602_v45 }
 0x113   : > { %v1018_v59 = vpop.eup %1017  ;;  %765 = vst.msk [vmem:[%s1220_s28 + $0xa0] sm:$0xff] %vm744_vm1, %v732_v56  ;;  %v639_v62 = vadd.f32 1.0, %v1016_v57  ;;  %1037 = vpow2.f32 %v580_v48 }
 0x114   : > { %v1020_v63 = vpop.eup %1019  ;;  %752 = vst.msk [vmem:[%s1220_s28 + $0x38] sm:$0xff] %vm744_vm1, %v719_v58  ;;  %v621_v0 = vadd.f32 1.0, %v1018_v59  ;;  %1039 = vpow2.f32 %v612_v52 }
 0x115   : > { %v1022_v1 = vpop.eup %1021  ;;  %1041 = vrcp.f32 %v639_v62  ;;  %v637_v3 = vadd.f32 1.0, %v1020_v63 }
 0x116   : > { %v1024_v4 = vpop.eup %1023  ;;  %1043 = vrcp.f32 %v621_v0  ;;  %v626_v5 = vadd.f32 1.0, %v1022_v1 }
 0x117   : > { %v1026_v7 = vpop.eup %1025  ;;  %1045 = vrcp.f32 %v637_v3  ;;  %v642_v8 = vadd.f32 1.0, %v1024_v4 }
 0x118   : > { %v1028_v10 = vpop.eup %1027  ;;  %1047 = vrcp.f32 %v626_v5  ;;  %v624_v11 = vadd.f32 1.0, %v1026_v7 }
 0x119   : > { %v1030_v13 = vpop.eup %1029  ;;  %1049 = vrcp.f32 %v642_v8  ;;  %v640_v14 = vadd.f32 1.0, %v1028_v10 }
 0x11a   : > { %v1032_v16 = vpop.eup %1031  ;;  %1051 = vrcp.f32 %v624_v11  ;;  %v627_v49 = vadd.f32 1.0, %v1030_v13 }
 0x11b   : > { %v1034_v54 = vpop.eup %1033  ;;  %1053 = vrcp.f32 %v640_v14  ;;  %v643_v20 = vadd.f32 1.0, %v1032_v16 }
 0x11c   : > { %v1036_v22 = vpop.eup %1035  ;;  %1055 = vrcp.f32 %v627_v49  ;;  %v625_v23 = vadd.f32 1.0, %v1034_v54 }
 0x11d   : > { %v1038_v25 = vpop.eup %1037  ;;  %1057 = vrcp.f32 %v643_v20  ;;  %v641_v60 = vadd.f32 1.0, %v1036_v22 }
 0x11e   : > { %v1040_v27 = vpop.eup %1039  ;;  %1059 = vrcp.f32 %v625_v23  ;;  %v630_v28 = vadd.f32 1.0, %v1038_v25 }
 0x11f   : > { %v1042_v30 = vpop.eup %1041  ;;  %1061 = vrcp.f32 %v641_v60  ;;  %v646_v31 = vadd.f32 1.0, %v1040_v27 }
 0x120   : > { %v1044_v2 = vpop.eup %1043  ;;  %v735_v33 = vmul.f32 %v1042_v30, %v1042_v30  ;;  %1063 = vrcp.f32 %v630_v28 }
 0x121   : > { %v1046_v35 = vpop.eup %1045  ;;  %v717_v36 = vmul.f32 %v1044_v2, %v1044_v2  ;;  %1065 = vrcp.f32 %v646_v31 }
 0x122   : > { %v1048_v38 = vpop.eup %1047  ;;  %768 = vst.msk [vmem:[%s1220_s28 + $0xb8] sm:$0xff] %vm744_vm1, %v735_v33  ;;  %v733_v39 = vmul.f32 %v1046_v35, %v1046_v35  ;;  %1067 = vpow2.f32 %v576_v29 }
 0x123   : > { %v1050_v41 = vpop.eup %1049  ;;  %750 = vst.msk [vmem:[%s1220_s28 + $0x28] sm:$0xff] %vm744_vm1, %v717_v36  ;;  %v722_v42 = vmul.f32 %v1048_v38, %v1048_v38  ;;  %1069 = vpow2.f32 %v608_v32 }
 0x124   : > { %v1052_v44 = vpop.eup %1051  ;;  %766 = vst.msk [vmem:[%s1220_s28 + $0xa8] sm:$0xff] %vm744_vm1, %v733_v39  ;;  %v738_v45 = vmul.f32 %v1050_v41, %v1050_v41  ;;  %1071 = vpow2.f32 %v582_v34 }
 0x125   : > { %v1054_v46 = vpop.eup %1053  ;;  %755 = vst.msk [vmem:[%s1220_s28 + $0x50] sm:$0xff] %vm744_vm1, %v722_v42  ;;  %v720_v47 = vmul.f32 %v1052_v44, %v1052_v44  ;;  %1073 = vpow2.f32 %v614_v37 }
 0x126   : > { %v1056_v48 = vpop.eup %1055  ;;  %771 = vst.msk [vmem:[%s1220_s28 + $0xd0] sm:$0xff] %vm744_vm1, %v738_v45  ;;  %v736_v50 = vmul.f32 %v1054_v46, %v1054_v46  ;;  %1075 = vpow2.f32 %v578_v40 }
 0x127   : > { %v1058_v51 = vpop.eup %1057  ;;  %753 = vst.msk [vmem:[%s1220_s28 + $0x40] sm:$0xff] %vm744_vm1, %v720_v47  ;;  %v723_v52 = vmul.f32 %v1056_v48, %v1056_v48  ;;  %1077 = vpow2.f32 %v610_v43 }
 0x128   : > { %v1060_v53 = vpop.eup %1059  ;;  %769 = vst.msk [vmem:[%s1220_s28 + $0xc0] sm:$0xff] %vm744_vm1, %v736_v50  ;;  %v739_v56 = vmul.f32 %v1058_v51, %v1058_v51 }
 0x129   : > { %v1062_v57 = vpop.eup %1061  ;;  %756 = vst.msk [vmem:[%s1220_s28 + $0x58] sm:$0xff] %vm744_vm1, %v723_v52  ;;  %v721_v58 = vmul.f32 %v1060_v53, %v1060_v53 }
 0x12a   : > { %v1064_v59 = vpop.eup %1063  ;;  %772 = vst.msk [vmem:[%s1220_s28 + $0xd8] sm:$0xff] %vm744_vm1, %v739_v56  ;;  %v737_v62 = vmul.f32 %v1062_v57, %v1062_v57 }
 0x12b   : > { %v1066_v63 = vpop.eup %1065  ;;  %754 = vst.msk [vmem:[%s1220_s28 + $0x48] sm:$0xff] %vm744_vm1, %v721_v58  ;;  %v726_v0 = vmul.f32 %v1064_v59, %v1064_v59 }
 0x12c   : > { %v1068_v1 = vpop.eup %1067  ;;  %770 = vst.msk [vmem:[%s1220_s28 + $0xc8] sm:$0xff] %vm744_vm1, %v737_v62  ;;  %v742_v3 = vmul.f32 %v1066_v63, %v1066_v63 }
 0x12d   : > { %v1070_v4 = vpop.eup %1069  ;;  %759 = vst.msk [vmem:[%s1220_s28 + $0x70] sm:$0xff] %vm744_vm1, %v726_v0  ;;  %v628_v5 = vadd.f32 1.0, %v1068_v1 }
 0x12e   : > { %v1072_v6 = vpop.eup %1071  ;;  %775 = vst.msk [vmem:[%s1220_s28 + $0xf0] sm:$0xff] %vm744_vm1, %v742_v3  ;;  %v644_v7 = vadd.f32 1.0, %v1070_v4 }
 0x12f   : > { %v1074_v8 = vpop.eup %1073  ;;  %1079 = vrcp.f32 %v628_v5  ;;  %v631_v9 = vadd.f32 1.0, %v1072_v6 }
 0x130   : > { %v1076_v10 = vpop.eup %1075  ;;  %1081 = vrcp.f32 %v644_v7  ;;  %v647_v11 = vadd.f32 1.0, %v1074_v8 }
 0x131   : > { %v1078_v12 = vpop.eup %1077  ;;  %1083 = vrcp.f32 %v631_v9  ;;  %v629_v13 = vadd.f32 1.0, %v1076_v10 }
 0x132   : > { %1085 = vrcp.f32 %v647_v11  ;;  %v645_v14 = vadd.f32 1.0, %v1078_v12 }
 0x133   : > { %1087 = vrcp.f32 %v629_v13 }
 0x134   : > { %1089 = vrcp.f32 %v645_v14 }
 0x139   : > { %v1080_v15 = vpop.eup %1079 }
 0x13a   : > { %v1082_v16 = vpop.eup %1081  ;;  %v724_v49 = vmul.f32 %v1080_v15, %v1080_v15 }
 0x13b   : > { %v1084_v17 = vpop.eup %1083  ;;  %v740_v19 = vmul.f32 %v1082_v16, %v1082_v16 }
 0x13c   : > { %v1086_v54 = vpop.eup %1085  ;;  %757 = vst.msk [vmem:[%s1220_s28 + $0x60] sm:$0xff] %vm744_vm1, %v724_v49  ;;  %v727_v20 = vmul.f32 %v1084_v17, %v1084_v17 }
 0x13d   : > { %v1088_v21 = vpop.eup %1087  ;;  %773 = vst.msk [vmem:[%s1220_s28 + $0xe0] sm:$0xff] %vm744_vm1, %v740_v19  ;;  %v743_v55 = vmul.f32 %v1086_v54, %v1086_v54 }
 0x13e   : > { %v1090_v22 = vpop.eup %1089  ;;  %760 = vst.msk [vmem:[%s1220_s28 + $0x78] sm:$0xff] %vm744_vm1, %v727_v20  ;;  %v725_v23 = vmul.f32 %v1088_v21, %v1088_v21 }
 0x13f   : > { %776 = vst.msk [vmem:[%s1220_s28 + $0xf8] sm:$0xff] %vm744_vm1, %v743_v55  ;;  %v741_v24 = vmul.f32 %v1090_v22, %v1090_v22 }
 0x140   : > { %758 = vst.msk [vmem:[%s1220_s28 + $0x68] sm:$0xff] %vm744_vm1, %v725_v23 }
 0x141   : > { %774 = vst.msk [vmem:[%s1220_s28 + $0xe8] sm:$0xff] %vm744_vm1, %v741_v24 }
 0x142 PF: > { %s13_s12 = sadd.s32 1, %s1097_s12  }
 0x143   : > { %p10_p4 = scmp.ge.s32.totalorder %s13_s12, 4  }
 0x145   :  { %12 = sbr.rel (!%p10_p4) target bundleno = 1 (0x1), region = 62 }

// kernel: reverse.0
= control target key start
LH: loop header
LB: loop body
LE: loop exit
PB: predicated region body
PF: predicated region fallthrough
CT: control target
= control target key end

     0   :  { %v2_v0 = vlaneseq  ;;  %s1456_s0 = inlined_call_operand.vmem [shape: f32[8,64,63], index: 0, kind: input, shape index: {}]   ;;  %s1457_s1 = inlined_call_operand.vmem [shape: f32[8,64,63], index: 1, kind: output, shape index: {}]  }
   0x1   :  { %v162_v2 = vld [vmem:[%s1456_s0 + $0x10] sm:$0xff]  ;;  %v158_v3 = vld [vmem:[%s1456_s0] sm:$0xff]  ;;  %v164_v4 = vld [vmem:[%s1456_s0 + $0x18] sm:$0xff] }
   0x2   :  { %v3_v1 = vsub.s32 62, %v2_v0  ;;  %v160_v5 = vld [vmem:[%s1456_s0 + $0x8] sm:$0xff]  ;;  %v166_v7 = vld [vmem:[%s1456_s0 + $0x20] sm:$0xff]  ;;  %v172_v8 = vld [vmem:[%s1456_s0 + $0x38] sm:$0xff] }
   0x3   :  { %v168_v6 = vld [vmem:[%s1456_s0 + $0x28] sm:$0xff]  ;;  %v170_v9 = vld [vmem:[%s1456_s0 + $0x30] sm:$0xff]  ;;  %v174_v11 = vld [vmem:[%s1456_s0 + $0x40] sm:$0xff] }
   0x4   :  { %4 = vset.pattern.permute.xlu0 %v3_v1  ;;  %1061 = vset.pattern.permute.xlu1 %v3_v1  ;;  %v176_v10 = vld [vmem:[%s1456_s0 + $0x48] sm:$0xff]  ;;  %v180_v12 = vld [vmem:[%s1456_s0 + $0x58] sm:$0xff]  ;;  %v178_v13 = vld [vmem:[%s1456_s0 + $0x50] sm:$0xff] }
   0x5   :  { %302 = vperm.xlu1 %1061, %v162_v2   ;;  %290 = vperm.xlu0 %4, %v158_v3   ;;  %v184_v14 = vld [vmem:[%s1456_s0 + $0x68] sm:$0xff]  ;;  %v182_v15 = vld [vmem:[%s1456_s0 + $0x60] sm:$0xff]  ;;  %v188_v16 = vld [vmem:[%s1456_s0 + $0x78] sm:$0xff] }
   0x6   :  { %v186_v17 = vld [vmem:[%s1456_s0 + $0x70] sm:$0xff]  ;;  %v192_v18 = vld [vmem:[%s1456_s0 + $0x88] sm:$0xff]  ;;  %v190_v19 = vld [vmem:[%s1456_s0 + $0x80] sm:$0xff] }
   0x7   :  { %v196_v20 = vld [vmem:[%s1456_s0 + $0x98] sm:$0xff]  ;;  %v194_v21 = vld [vmem:[%s1456_s0 + $0x90] sm:$0xff]  ;;  %v200_v22 = vld [vmem:[%s1456_s0 + $0xa8] sm:$0xff] }
   0x8   :  { %v198_v23 = vld [vmem:[%s1456_s0 + $0xa0] sm:$0xff]  ;;  %v204_v24 = vld [vmem:[%s1456_s0 + $0xb8] sm:$0xff]  ;;  %v202_v25 = vld [vmem:[%s1456_s0 + $0xb0] sm:$0xff] }
   0x9   :  { %308 = vperm.xlu1 %1061, %v164_v4   ;;  %296 = vperm.xlu0 %4, %v160_v5   ;;  %v208_v26 = vld [vmem:[%s1456_s0 + $0xc8] sm:$0xff]  ;;  %v206_v27 = vld [vmem:[%s1456_s0 + $0xc0] sm:$0xff]  ;;  %v212_v28 = vld [vmem:[%s1456_s0 + $0xd8] sm:$0xff] }
   0xa   :  { %v210_v29 = vld [vmem:[%s1456_s0 + $0xd0] sm:$0xff]  ;;  %v216_v30 = vld [vmem:[%s1456_s0 + $0xe8] sm:$0xff]  ;;  %v214_v31 = vld [vmem:[%s1456_s0 + $0xe0] sm:$0xff] }
   0xb   :  { %v220_v32 = vld [vmem:[%s1456_s0 + $0xf8] sm:$0xff]  ;;  %v218_v33 = vld [vmem:[%s1456_s0 + $0xf0] sm:$0xff]  ;;  %v224_v34 = vld [vmem:[%s1456_s0 + $0x108] sm:$0xff] }
   0xc   :  { %v222_v35 = vld [vmem:[%s1456_s0 + $0x100] sm:$0xff]  ;;  %v228_v36 = vld [vmem:[%s1456_s0 + $0x118] sm:$0xff]  ;;  %v226_v37 = vld [vmem:[%s1456_s0 + $0x110] sm:$0xff] }
   0xd   :  { %320 = vperm.xlu1 %1061, %v168_v6   ;;  %314 = vperm.xlu0 %4, %v166_v7   ;;  %v232_v38 = vld [vmem:[%s1456_s0 + $0x128] sm:$0xff]  ;;  %v230_v39 = vld [vmem:[%s1456_s0 + $0x120] sm:$0xff]  ;;  %v236_v40 = vld [vmem:[%s1456_s0 + $0x138] sm:$0xff] }
   0xe   :  { %v234_v41 = vld [vmem:[%s1456_s0 + $0x130] sm:$0xff]  ;;  %v240_v42 = vld [vmem:[%s1456_s0 + $0x148] sm:$0xff]  ;;  %v238_v43 = vld [vmem:[%s1456_s0 + $0x140] sm:$0xff] }
   0xf   :  { %v244_v44 = vld [vmem:[%s1456_s0 + $0x158] sm:$0xff]  ;;  %v242_v45 = vld [vmem:[%s1456_s0 + $0x150] sm:$0xff]  ;;  %v248_v46 = vld [vmem:[%s1456_s0 + $0x168] sm:$0xff] }
  0x10   :  { %v246_v47 = vld [vmem:[%s1456_s0 + $0x160] sm:$0xff]  ;;  %v252_v48 = vld [vmem:[%s1456_s0 + $0x178] sm:$0xff]  ;;  %v250_v49 = vld [vmem:[%s1456_s0 + $0x170] sm:$0xff] }
  0x11   :  { %332 = vperm.xlu1 %1061, %v172_v8   ;;  %326 = vperm.xlu0 %4, %v170_v9   ;;  %v256_v50 = vld [vmem:[%s1456_s0 + $0x188] sm:$0xff]  ;;  %v254_v51 = vld [vmem:[%s1456_s0 + $0x180] sm:$0xff]  ;;  %v260_v52 = vld [vmem:[%s1456_s0 + $0x198] sm:$0xff] }
  0x12   :  { %v258_v53 = vld [vmem:[%s1456_s0 + $0x190] sm:$0xff]  ;;  %v264_v54 = vld [vmem:[%s1456_s0 + $0x1a8] sm:$0xff]  ;;  %v262_v55 = vld [vmem:[%s1456_s0 + $0x1a0] sm:$0xff] }
  0x13   :  { %v268_v56 = vld [vmem:[%s1456_s0 + $0x1b8] sm:$0xff]  ;;  %v266_v57 = vld [vmem:[%s1456_s0 + $0x1b0] sm:$0xff]  ;;  %v272_v58 = vld [vmem:[%s1456_s0 + $0x1c8] sm:$0xff] }
  0x14   :  { %v270_v59 = vld [vmem:[%s1456_s0 + $0x1c0] sm:$0xff]  ;;  %v276_v60 = vld [vmem:[%s1456_s0 + $0x1d8] sm:$0xff]  ;;  %v274_v61 = vld [vmem:[%s1456_s0 + $0x1d0] sm:$0xff] }
  0x15   :  { %344 = vperm.xlu1 %1061, %v176_v10   ;;  %338 = vperm.xlu0 %4, %v174_v11   ;;  %v280_v62 = vld [vmem:[%s1456_s0 + $0x1e8] sm:$0xff]  ;;  %v278_v63 = vld [vmem:[%s1456_s0 + $0x1e0] sm:$0xff]  ;;  %v284_v0 = vld [vmem:[%s1456_s0 + $0x1f8] sm:$0xff] }
  0x16   :  { %v282_v1 = vld [vmem:[%s1456_s0 + $0x1f0] sm:$0xff] }
  0x19   :  { %356 = vperm.xlu1 %1061, %v180_v12   ;;  %350 = vperm.xlu0 %4, %v178_v13  }
  0x1d   :  { %368 = vperm.xlu1 %1061, %v184_v14   ;;  %362 = vperm.xlu0 %4, %v182_v15  }
  0x21   :  { %380 = vperm.xlu1 %1061, %v188_v16   ;;  %374 = vperm.xlu0 %4, %v186_v17  }
  0x25   :  { %392 = vperm.xlu1 %1061, %v192_v18   ;;  %386 = vperm.xlu0 %4, %v190_v19  }
  0x29   :  { %404 = vperm.xlu1 %1061, %v196_v20   ;;  %398 = vperm.xlu0 %4, %v194_v21  }
  0x2d   :  { %416 = vperm.xlu1 %1061, %v200_v22   ;;  %410 = vperm.xlu0 %4, %v198_v23  }
  0x31   :  { %428 = vperm.xlu1 %1061, %v204_v24   ;;  %422 = vperm.xlu0 %4, %v202_v25  }
  0x35   :  { %440 = vperm.xlu1 %1061, %v208_v26   ;;  %434 = vperm.xlu0 %4, %v206_v27  }
  0x39   :  { %452 = vperm.xlu1 %1061, %v212_v28   ;;  %446 = vperm.xlu0 %4, %v210_v29  }
  0x3d   :  { %464 = vperm.xlu1 %1061, %v216_v30   ;;  %458 = vperm.xlu0 %4, %v214_v31  }
  0x41   :  { %476 = vperm.xlu1 %1061, %v220_v32   ;;  %470 = vperm.xlu0 %4, %v218_v33  }
  0x45   :  { %488 = vperm.xlu1 %1061, %v224_v34   ;;  %482 = vperm.xlu0 %4, %v222_v35  }
  0x49   :  { %500 = vperm.xlu1 %1061, %v228_v36   ;;  %494 = vperm.xlu0 %4, %v226_v37  }
  0x4d   :  { %512 = vperm.xlu1 %1061, %v232_v38   ;;  %506 = vperm.xlu0 %4, %v230_v39  }
  0x51   :  { %524 = vperm.xlu1 %1061, %v236_v40   ;;  %518 = vperm.xlu0 %4, %v234_v41  }
  0x55   :  { %536 = vperm.xlu1 %1061, %v240_v42   ;;  %530 = vperm.xlu0 %4, %v238_v43  }
  0x59   :  { %548 = vperm.xlu1 %1061, %v244_v44   ;;  %542 = vperm.xlu0 %4, %v242_v45  }
  0x5d   :  { %560 = vperm.xlu1 %1061, %v248_v46   ;;  %554 = vperm.xlu0 %4, %v246_v47  }
  0x61   :  { %572 = vperm.xlu1 %1061, %v252_v48   ;;  %566 = vperm.xlu0 %4, %v250_v49  }
  0x65   :  { %584 = vperm.xlu1 %1061, %v256_v50   ;;  %578 = vperm.xlu0 %4, %v254_v51  }
  0x69   :  { %596 = vperm.xlu1 %1061, %v260_v52   ;;  %590 = vperm.xlu0 %4, %v258_v53  }
  0x6d   :  { %608 = vperm.xlu1 %1061, %v264_v54   ;;  %602 = vperm.xlu0 %4, %v262_v55  }
  0x71   :  { %620 = vperm.xlu1 %1061, %v268_v56   ;;  %614 = vperm.xlu0 %4, %v266_v57  }
  0x75   :  { %632 = vperm.xlu1 %1061, %v272_v58   ;;  %626 = vperm.xlu0 %4, %v270_v59  }
  0x79   :  { %644 = vperm.xlu1 %1061, %v276_v60   ;;  %638 = vperm.xlu0 %4, %v274_v61  }
  0x7d   :  { %656 = vperm.xlu1 %1061, %v280_v62   ;;  %650 = vperm.xlu0 %4, %v278_v63  }
  0x81   :  { %668 = vperm.xlu1 %1061, %v284_v0   ;;  %662 = vperm.xlu0 %4, %v282_v1  }
  0x84   :  { %v303_v2 = vpop.permute.xlu1 %302  ;;  %v291_v3 = vpop.permute.xlu0 %290 }
  0x85   :  { %829 = vst [vmem:[%s1457_s1 + $0x10] sm:$0xff] %v303_v2  ;;  %825 = vst [vmem:[%s1457_s1] sm:$0xff] %v291_v3 }
  0x88   :  { %v309_v4 = vpop.permute.xlu1 %308  ;;  %v297_v5 = vpop.permute.xlu0 %296 }
  0x89   :  { %831 = vst [vmem:[%s1457_s1 + $0x18] sm:$0xff] %v309_v4  ;;  %827 = vst [vmem:[%s1457_s1 + $0x8] sm:$0xff] %v297_v5 }
  0x8c   :  { %v321_v6 = vpop.permute.xlu1 %320  ;;  %v315_v7 = vpop.permute.xlu0 %314 }
  0x8d   :  { %835 = vst [vmem:[%s1457_s1 + $0x28] sm:$0xff] %v321_v6  ;;  %833 = vst [vmem:[%s1457_s1 + $0x20] sm:$0xff] %v315_v7 }
  0x90   :  { %v333_v8 = vpop.permute.xlu1 %332  ;;  %v327_v9 = vpop.permute.xlu0 %326 }
  0x91   :  { %839 = vst [vmem:[%s1457_s1 + $0x38] sm:$0xff] %v333_v8  ;;  %837 = vst [vmem:[%s1457_s1 + $0x30] sm:$0xff] %v327_v9 }
  0x94   :  { %v345_v10 = vpop.permute.xlu1 %344  ;;  %v339_v11 = vpop.permute.xlu0 %338 }
  0x95   :  { %843 = vst [vmem:[%s1457_s1 + $0x48] sm:$0xff] %v345_v10  ;;  %841 = vst [vmem:[%s1457_s1 + $0x40] sm:$0xff] %v339_v11 }
  0x98   :  { %v357_v12 = vpop.permute.xlu1 %356  ;;  %v351_v13 = vpop.permute.xlu0 %350 }
  0x99   :  { %847 = vst [vmem:[%s1457_s1 + $0x58] sm:$0xff] %v357_v12  ;;  %845 = vst [vmem:[%s1457_s1 + $0x50] sm:$0xff] %v351_v13 }
  0x9c   :  { %v369_v14 = vpop.permute.xlu1 %368  ;;  %v363_v15 = vpop.permute.xlu0 %362 }
  0x9d   :  { %851 = vst [vmem:[%s1457_s1 + $0x68] sm:$0xff] %v369_v14  ;;  %849 = vst [vmem:[%s1457_s1 + $0x60] sm:$0xff] %v363_v15 }
  0xa0   :  { %v381_v16 = vpop.permute.xlu1 %380  ;;  %v375_v17 = vpop.permute.xlu0 %374 }
  0xa1   :  { %855 = vst [vmem:[%s1457_s1 + $0x78] sm:$0xff] %v381_v16  ;;  %853 = vst [vmem:[%s1457_s1 + $0x70] sm:$0xff] %v375_v17 }
  0xa4   :  { %v393_v18 = vpop.permute.xlu1 %392  ;;  %v387_v19 = vpop.permute.xlu0 %386 }
  0xa5   :  { %859 = vst [vmem:[%s1457_s1 + $0x88] sm:$0xff] %v393_v18  ;;  %857 = vst [vmem:[%s1457_s1 + $0x80] sm:$0xff] %v387_v19 }
  0xa8   :  { %v405_v20 = vpop.permute.xlu1 %404  ;;  %v399_v21 = vpop.permute.xlu0 %398 }
  0xa9   :  { %863 = vst [vmem:[%s1457_s1 + $0x98] sm:$0xff] %v405_v20  ;;  %861 = vst [vmem:[%s1457_s1 + $0x90] sm:$0xff] %v399_v21 }
  0xac   :  { %v417_v22 = vpop.permute.xlu1 %416  ;;  %v411_v23 = vpop.permute.xlu0 %410 }
  0xad   :  { %867 = vst [vmem:[%s1457_s1 + $0xa8] sm:$0xff] %v417_v22  ;;  %865 = vst [vmem:[%s1457_s1 + $0xa0] sm:$0xff] %v411_v23 }
  0xb0   :  { %v429_v24 = vpop.permute.xlu1 %428  ;;  %v423_v25 = vpop.permute.xlu0 %422 }
  0xb1   :  { %871 = vst [vmem:[%s1457_s1 + $0xb8] sm:$0xff] %v429_v24  ;;  %869 = vst [vmem:[%s1457_s1 + $0xb0] sm:$0xff] %v423_v25 }
  0xb4   :  { %v441_v26 = vpop.permute.xlu1 %440  ;;  %v435_v27 = vpop.permute.xlu0 %434 }
  0xb5   :  { %875 = vst [vmem:[%s1457_s1 + $0xc8] sm:$0xff] %v441_v26  ;;  %873 = vst [vmem:[%s1457_s1 + $0xc0] sm:$0xff] %v435_v27 }
  0xb8   :  { %v453_v28 = vpop.permute.xlu1 %452  ;;  %v447_v29 = vpop.permute.xlu0 %446 }
  0xb9   :  { %879 = vst [vmem:[%s1457_s1 + $0xd8] sm:$0xff] %v453_v28  ;;  %877 = vst [vmem:[%s1457_s1 + $0xd0] sm:$0xff] %v447_v29 }
  0xbc   :  { %v465_v30 = vpop.permute.xlu1 %464  ;;  %v459_v31 = vpop.permute.xlu0 %458 }
  0xbd   :  { %883 = vst [vmem:[%s1457_s1 + $0xe8] sm:$0xff] %v465_v30  ;;  %881 = vst [vmem:[%s1457_s1 + $0xe0] sm:$0xff] %v459_v31 }
  0xc0   :  { %v477_v32 = vpop.permute.xlu1 %476  ;;  %v471_v33 = vpop.permute.xlu0 %470 }
  0xc1   :  { %887 = vst [vmem:[%s1457_s1 + $0xf8] sm:$0xff] %v477_v32  ;;  %885 = vst [vmem:[%s1457_s1 + $0xf0] sm:$0xff] %v471_v33 }
  0xc4   :  { %v489_v34 = vpop.permute.xlu1 %488  ;;  %v483_v35 = vpop.permute.xlu0 %482 }
  0xc5   :  { %891 = vst [vmem:[%s1457_s1 + $0x108] sm:$0xff] %v489_v34  ;;  %889 = vst [vmem:[%s1457_s1 + $0x100] sm:$0xff] %v483_v35 }
  0xc8   :  { %v501_v36 = vpop.permute.xlu1 %500  ;;  %v495_v37 = vpop.permute.xlu0 %494 }
  0xc9   :  { %895 = vst [vmem:[%s1457_s1 + $0x118] sm:$0xff] %v501_v36  ;;  %893 = vst [vmem:[%s1457_s1 + $0x110] sm:$0xff] %v495_v37 }
  0xcc   :  { %v513_v38 = vpop.permute.xlu1 %512  ;;  %v507_v39 = vpop.permute.xlu0 %506 }
  0xcd   :  { %899 = vst [vmem:[%s1457_s1 + $0x128] sm:$0xff] %v513_v38  ;;  %897 = vst [vmem:[%s1457_s1 + $0x120] sm:$0xff] %v507_v39 }
  0xd0   :  { %v525_v40 = vpop.permute.xlu1 %524  ;;  %v519_v41 = vpop.permute.xlu0 %518 }
  0xd1   :  { %903 = vst [vmem:[%s1457_s1 + $0x138] sm:$0xff] %v525_v40  ;;  %901 = vst [vmem:[%s1457_s1 + $0x130] sm:$0xff] %v519_v41 }
  0xd4   :  { %v537_v42 = vpop.permute.xlu1 %536  ;;  %v531_v43 = vpop.permute.xlu0 %530 }
  0xd5   :  { %907 = vst [vmem:[%s1457_s1 + $0x148] sm:$0xff] %v537_v42  ;;  %905 = vst [vmem:[%s1457_s1 + $0x140] sm:$0xff] %v531_v43 }
  0xd8   :  { %v549_v44 = vpop.permute.xlu1 %548  ;;  %v543_v45 = vpop.permute.xlu0 %542 }
  0xd9   :  { %911 = vst [vmem:[%s1457_s1 + $0x158] sm:$0xff] %v549_v44  ;;  %909 = vst [vmem:[%s1457_s1 + $0x150] sm:$0xff] %v543_v45 }
  0xdc   :  { %v561_v46 = vpop.permute.xlu1 %560  ;;  %v555_v47 = vpop.permute.xlu0 %554 }
  0xdd   :  { %915 = vst [vmem:[%s1457_s1 + $0x168] sm:$0xff] %v561_v46  ;;  %913 = vst [vmem:[%s1457_s1 + $0x160] sm:$0xff] %v555_v47 }
  0xe0   :  { %v573_v48 = vpop.permute.xlu1 %572  ;;  %v567_v49 = vpop.permute.xlu0 %566 }
  0xe1   :  { %919 = vst [vmem:[%s1457_s1 + $0x178] sm:$0xff] %v573_v48  ;;  %917 = vst [vmem:[%s1457_s1 + $0x170] sm:$0xff] %v567_v49 }
  0xe4   :  { %v585_v50 = vpop.permute.xlu1 %584  ;;  %v579_v51 = vpop.permute.xlu0 %578 }
  0xe5   :  { %923 = vst [vmem:[%s1457_s1 + $0x188] sm:$0xff] %v585_v50  ;;  %921 = vst [vmem:[%s1457_s1 + $0x180] sm:$0xff] %v579_v51 }
  0xe8   :  { %v597_v52 = vpop.permute.xlu1 %596  ;;  %v591_v53 = vpop.permute.xlu0 %590 }
  0xe9   :  { %927 = vst [vmem:[%s1457_s1 + $0x198] sm:$0xff] %v597_v52  ;;  %925 = vst [vmem:[%s1457_s1 + $0x190] sm:$0xff] %v591_v53 }
  0xec   :  { %v609_v54 = vpop.permute.xlu1 %608  ;;  %v603_v55 = vpop.permute.xlu0 %602 }
  0xed   :  { %931 = vst [vmem:[%s1457_s1 + $0x1a8] sm:$0xff] %v609_v54  ;;  %929 = vst [vmem:[%s1457_s1 + $0x1a0] sm:$0xff] %v603_v55 }
  0xf0   :  { %v621_v56 = vpop.permute.xlu1 %620  ;;  %v615_v57 = vpop.permute.xlu0 %614 }
  0xf1   :  { %935 = vst [vmem:[%s1457_s1 + $0x1b8] sm:$0xff] %v621_v56  ;;  %933 = vst [vmem:[%s1457_s1 + $0x1b0] sm:$0xff] %v615_v57 }
  0xf4   :  { %v633_v58 = vpop.permute.xlu1 %632  ;;  %v627_v59 = vpop.permute.xlu0 %626 }
  0xf5   :  { %939 = vst [vmem:[%s1457_s1 + $0x1c8] sm:$0xff] %v633_v58  ;;  %937 = vst [vmem:[%s1457_s1 + $0x1c0] sm:$0xff] %v627_v59 }
  0xf8   :  { %v645_v60 = vpop.permute.xlu1 %644  ;;  %v639_v61 = vpop.permute.xlu0 %638 }
  0xf9   :  { %943 = vst [vmem:[%s1457_s1 + $0x1d8] sm:$0xff] %v645_v60  ;;  %941 = vst [vmem:[%s1457_s1 + $0x1d0] sm:$0xff] %v639_v61 }
  0xfc   :  { %v657_v62 = vpop.permute.xlu1 %656  ;;  %v651_v63 = vpop.permute.xlu0 %650 }
  0xfd   :  { %947 = vst [vmem:[%s1457_s1 + $0x1e8] sm:$0xff] %v657_v62  ;;  %945 = vst [vmem:[%s1457_s1 + $0x1e0] sm:$0xff] %v651_v63 }
 0x100   :  { %v669_v0 = vpop.permute.xlu1 %668  ;;  %v663_v1 = vpop.permute.xlu0 %662 }
 0x101   :  { %951 = vst [vmem:[%s1457_s1 + $0x1f8] sm:$0xff] %v669_v0  ;;  %949 = vst [vmem:[%s1457_s1 + $0x1f0] sm:$0xff] %v663_v1 }

// kernel: fwd.10
= control target key start
LH: loop header
LB: loop body
LE: loop exit
PB: predicated region body
PF: predicated region fallthrough
CT: control target
= control target key end

     0   :  { %v110_v0 = vmov 0.0   ;;  %vm111_vm0 = vmmov 0   ;;  %vm39_vm1 = vcmask 261120   ;;  %vm85_vm2 = vcmask 125952   ;;  %s147_s1 = inlined_call_operand.vmem [shape: bf16[32,16], index: 1, kind: input, shape index: {}]   ;;  %s148_s0 = inlined_call_operand.vmem [shape: bf16[8,32], index: 0, kind: input, shape index: {}]   ;;  %s149_s2 = inlined_call_operand.vmem [shape: f32[1,16], index: 2, kind: input, shape index: {}]   ;;  %s150_s3 = inlined_call_operand.vmem [shape: bf16[8,16], index: 3, kind: output, shape index: {}]  }
   0x1   :  { %98 = vmatprep.subr.bf16.mxu0 %v110_v0  ;;  %v108_v1 = vld [vmem:[%s147_s1] sm:$0xff]   ;;  %102 = vmatprep.mubr.msk.bf16.mxu0 %vm111_vm0, %v110_v0  ;;  %v109_v2 = vld [vmem:[%s147_s1 + $0x8] sm:$0xff]  }
   0x2   :  { %99 = vmatpush3.bf16.msra.mxu0 %v108_v1  ;;  %v15_v3 = vld [vmem:[%s148_s0] sm:$0xf] }
   0x3   :  { %100 = vmatprep.subr.bf16.mxu0 %v110_v0  ;;  %v91_v4 = vld [vmem:[%s149_s2] ss:$0 sm:$0xff] }
   0x6   :  { %101 = vmatpush3.bf16.msra.mxu0 %v109_v2 }
   0x9   :  { %103 = vmatmul.mubr.msk.bf16.vlgmr.msra.gmra.mrb[0].mxu0 %vm39_vm1, %v15_v3 }
  0xdc   :  { %v77_v5 = vpop.f32.mrb[0].mxu0 }
  0xdd   :  { %v78_v6 = vadd.f32 %v91_v4, %v77_v5  ;;  %v104_v7 = vpop.f32.mrb[1].mxu0 }
  0xde   :  { %v80_v8 = vpop.f32.mrb[2].mxu0 }
  0xdf   :  { %v83_v9 = vmul.f32 %v78_v6, %v78_v6  ;;  %v105_v10 = vpop.f32.mrb[3].mxu0 }
  0xe1   :  { %v84_v11 = vpack.c.bf16 %v83_v9, %v83_v9 }
  0xe3   :  { %86 = vst.msk [vmem:[%s150_s3] sm:$0xf] %vm85_vm2, %v84_v11 }

// kernel: fwd.19
= control target key start
LH: loop header
LB: loop body
LE: loop exit
PB: predicated region body
PF: predicated region fallthrough
CT: control target
= control target key end

     0   :  { %s907_s12 = smov 0   ;;  %s909_s13 = smov 0   ;;  %s1053_s0 = inlined_call_operand.vmem [shape: bf16[8,16], index: 0, kind: input, shape index: {}]   ;;  %s1054_s1 = inlined_call_operand.vmem [shape: bf16[16,4096], index: 1, kind: input, shape index: {}]   ;;  %s1055_s2 = inlined_call_operand.vmem [shape: f32[8,4096], index: 2, kind: input, shape index: {}]   ;;  %s1056_s3 = inlined_call_operand.vmem [shape: f32[8,4096], index: 3, kind: output, shape index: {}]  }
   0x1   :  { %s911_s14 = smov 0  }
   0x2 LB: > { %s797_s15 = sadd.s32 4294967295, %s884_s14   ;;  %s924_s16 = sadd.s32 1, %s884_s14   ;;  %s884_s14 = sphi %s911_s14, %s1059_s14   ;;  %s880_s13 = sphi %s909_s13, %s1058_s13   ;;  %s876_s12 = sphi %s907_s12, %s1057_s12  }
   0x3   : > { %s38_s17 = ssub.s32 %s884_s14, %s924_s16  ;;  %s41_s18 = sadd.s32 1, %s880_s13 }
   0x4   : > { %p39_p0 = scmp.eq.s32.totalorder %s38_s17, 0  ;;  %p48_p1 = scmp.ne.s32.totalorder %s880_s13, %s876_s12 }
   0x5   : > { %p49_p2 = scmp.eq.s32.totalorder %s884_s14, 0  ;;  %p800_p4 = scmp.ge.s32.totalorder %s884_s14, 2 }
   0x6   : > { %s933_s19 = scalar_select %p39_p0, %s880_s13, %s41_s18  }
   0x7   : > { %p50_p3 = por %p49_p2, %p48_p1  ;;  %129 = sbr.rel (%p800_p4) target bundleno = 26 (0x1a), region = 20 }
   0xe   : > { %132 = sbr.rel (!%p50_p3) target bundleno = 26 (0x1a), region = 24  ;;  %s134_s20 = sand.u32 (%p50_p3), 1, %s880_s13  }
   0xf   : > { %s836_s21 = sshll.u32 (%p50_p3), %s884_s14, 6  ;;  %s801_s22 = sshll.u32 (%p50_p3), %s134_s20, 7 }
  0x10   : > { %s941_s25 = scalar_lea.vmem (%p50_p3), %s1054_s1, %s836_s21  ;;  %s136_s26 = scalar_lea.vmem (%p50_p3), [#allocation2], %s801_s22 }
  0x11   : > { %v152_v0 = vld [vmem:[%s941_s25] sm:$0xff] (%p50_p3)  ;;  %v154_v1 = vld [vmem:[%s941_s25 + $0x8] sm:$0xff] (%p50_p3)  ;;  %v156_v2 = vld [vmem:[%s941_s25 + $0x10] sm:$0xff] (%p50_p3) }
  0x12   : > { %153 = vst [vmem:[%s136_s26] sm:$0xff] (%p50_p3), %v152_v0  ;;  %155 = vst [vmem:[%s136_s26 + $0x8] sm:$0xff] (%p50_p3), %v154_v1  ;;  %v158_v3 = vld [vmem:[%s941_s25 + $0x18] sm:$0xff] (%p50_p3)  ;;  %v160_v4 = vld [vmem:[%s941_s25 + $0x20] sm:$0xff] (%p50_p3) }
  0x13   : > { %157 = vst [vmem:[%s136_s26 + $0x10] sm:$0xff] (%p50_p3), %v156_v2  ;;  %v162_v5 = vld [vmem:[%s941_s25 + $0x28] sm:$0xff] (%p50_p3)  ;;  %159 = vst [vmem:[%s136_s26 + $0x18] sm:$0xff] (%p50_p3), %v158_v3  ;;  %v164_v6 = vld [vmem:[%s941_s25 + $0x30] sm:$0xff] (%p50_p3) }
  0x14   : > { %161 = vst [vmem:[%s136_s26 + $0x20] sm:$0xff] (%p50_p3), %v160_v4  ;;  %163 = vst [vmem:[%s136_s26 + $0x28] sm:$0xff] (%p50_p3), %v162_v5  ;;  %v166_v7 = vld [vmem:[%s941_s25 + $0x38] sm:$0xff] (%p50_p3)  ;;  %v168_v8 = vld [vmem:[%s941_s25 + $0x80] sm:$0xff] (%p50_p3) }
  0x15   : > { %165 = vst [vmem:[%s136_s26 + $0x30] sm:$0xff] %v164_v6  ;;  %167 = vst [vmem:[%s136_s26 + $0x38] sm:$0xff] %v166_v7  ;;  %v170_v9 = vld [vmem:[%s941_s25 + $0x88] sm:$0xff]  ;;  %v172_v10 = vld [vmem:[%s941_s25 + $0x90] sm:$0xff] }
  0x16   : > { %169 = vst [vmem:[%s136_s26 + $0x40] sm:$0xff] %v168_v8  ;;  %v174_v11 = vld [vmem:[%s941_s25 + $0x98] sm:$0xff]  ;;  %171 = vst [vmem:[%s136_s26 + $0x48] sm:$0xff] %v170_v9  ;;  %v176_v12 = vld [vmem:[%s941_s25 + $0xa0] sm:$0xff] }
  0x17   : > { %173 = vst [vmem:[%s136_s26 + $0x50] sm:$0xff] %v172_v10  ;;  %175 = vst [vmem:[%s136_s26 + $0x58] sm:$0xff] %v174_v11  ;;  %v178_v13 = vld [vmem:[%s941_s25 + $0xa8] sm:$0xff]  ;;  %v180_v14 = vld [vmem:[%s941_s25 + $0xb0] sm:$0xff] }
  0x18   : > { %177 = vst [vmem:[%s136_s26 + $0x60] sm:$0xff] %v176_v12  ;;  %179 = vst [vmem:[%s136_s26 + $0x68] sm:$0xff] %v178_v13  ;;  %v182_v15 = vld [vmem:[%s941_s25 + $0xb8] sm:$0xff] }
  0x19   : > { %181 = vst [vmem:[%s136_s26 + $0x70] sm:$0xff] %v180_v14  ;;  %183 = vst [vmem:[%s136_s26 + $0x78] sm:$0xff] %v182_v15 }
  0x1a PF: > { %p804_p5 = scmp.ge.s32.totalorder %s884_s14, 1  ;;  %p197_p6 = scmp.lt.s32.totalorder %s884_s14, 3 }
  0x1c   : > { %p198_p7 = pnand %p804_p5, %p197_p6 }
  0x1d   : > { %s204_s27 = sand.u32 (!%p198_p7), 1, %s876_s12   ;;  %v886_v16 = vmov (!%p198_p7), 0   ;;  %v246_v33 = vld [vmem:[%s1053_s0] sm:$0xf] (!%p198_p7)  ;;  %vm343_vm0 = vcmask (!%p198_p7), 130048   ;;  %s806_s5 = sshll.u32 (!%p198_p7), %s797_s15, 4 }
  0x1e   : > { %201 = sbr.rel (%p198_p7) target bundleno = 280 (0x118), region = 51  ;;  %s805_s28 = sshll.u32 (!%p198_p7), %s204_s27, 7  ;;  %379 = vmatprep.mubr.bf16.mxu0 (!%p198_p7), %v886_v16  ;;  %420 = vmatprep.mubr.bf16.mxu1 (!%p198_p7), %v886_v16 }
  0x1f   : > { %s964_s29 = scalar_lea.vmem (!%p198_p7), [#allocation2], %s805_s28  ;;  %p234_p8 = scmp.lt.s32.totalorder (!%p198_p7), %s806_s5, 31 }
  0x20   : > { %v247_v17 = vld [vmem:[%s964_s29] sm:$0xff] (!%p198_p7)  ;;  %v248_v19 = vld [vmem:[%s964_s29 + $0x8] sm:$0xff] (!%p198_p7)  ;;  %v249_v23 = vld [vmem:[%s964_s29 + $0x10] sm:$0xff] (!%p198_p7) }
  0x21   : > { %v255_v18 = vld [vmem:[%s964_s29 + $0x40] sm:$0xff] (!%p198_p7)  ;;  %v256_v21 = vld [vmem:[%s964_s29 + $0x48] sm:$0xff] (!%p198_p7)  ;;  %v257_v24 = vld [vmem:[%s964_s29 + $0x50] sm:$0xff] (!%p198_p7) }
  0x22   : > { %v811_v20 = vcombine.high (!%p198_p7), %v247_v17, %v255_v18  ;;  %v810_v22 = vcombine.low (!%p198_p7), %v247_v17, %v255_v18  ;;  %v813_v25 = vcombine.high (!%p198_p7), %v248_v19, %v256_v21  ;;  %v812_v26 = vcombine.low (!%p198_p7), %v248_v19, %v256_v21  ;;  %v250_v28 = vld [vmem:[%s964_s29 + $0x18] sm:$0xff] (!%p198_p7)  ;;  %v251_v31 = vld [vmem:[%s964_s29 + $0x20] sm:$0xff] (!%p198_p7)  ;;  %v252_v35 = vld [vmem:[%s964_s29 + $0x28] sm:$0xff] (!%p198_p7) }
  0x23   : > { %v815_v27 = vcombine.high (!%p198_p7), %v249_v23, %v257_v24  ;;  %v258_v29 = vld [vmem:[%s964_s29 + $0x58] sm:$0xff] (!%p198_p7)  ;;  %v259_v32 = vld [vmem:[%s964_s29 + $0x60] sm:$0xff] (!%p198_p7)  ;;  %v814_v34 = vcombine.low (!%p198_p7), %v249_v23, %v257_v24  ;;  %v260_v36 = vld [vmem:[%s964_s29 + $0x68] sm:$0xff] (!%p198_p7) }
  0x24   : > { %347 = vmatprep.subr.bf16.mxu0 (!%p198_p7), %v811_v20  ;;  %v817_v30 = vcombine.high (!%p198_p7), %v250_v28, %v258_v29  ;;  %388 = vmatprep.subr.bf16.mxu1 (!%p198_p7), %v813_v25  ;;  %v816_v37 = vcombine.low (!%p198_p7), %v250_v28, %v258_v29  ;;  %v819_v38 = vcombine.high (!%p198_p7), %v251_v31, %v259_v32  ;;  %v253_v40 = vld [vmem:[%s964_s29 + $0x30] sm:$0xff] (!%p198_p7)  ;;  %v254_v43 = vld [vmem:[%s964_s29 + $0x38] sm:$0xff] (!%p198_p7) }
  0x25   : > { %348 = vmatpush1.bf16.msra.mxu0 %v810_v22  ;;  %389 = vmatpush1.bf16.msra.mxu1 %v812_v26  ;;  %v821_v39 = vcombine.high %v252_v35, %v260_v36  ;;  %v261_v41 = vld [vmem:[%s964_s29 + $0x70] sm:$0xff]  ;;  %v818_v42 = vcombine.low %v251_v31, %v259_v32  ;;  %v262_v44 = vld [vmem:[%s964_s29 + $0x78] sm:$0xff]  ;;  %v820_v45 = vcombine.low %v252_v35, %v260_v36  ;;  %s1061_s5 = smov (!%p234_p8, %s806_s5), 31 }
  0x26   : > { %429 = vmatprep.subr.bf16.mxu0 %v815_v27  ;;  %470 = vmatprep.subr.bf16.mxu1 %v817_v30  ;;  %v823_v46 = vcombine.high %v253_v40, %v261_v41  ;;  %v825_v47 = vcombine.high %v254_v43, %v262_v44  ;;  %v822_v48 = vcombine.low %v253_v40, %v261_v41  ;;  %s807_s6 = sshll.u32 %s1061_s5, 3 }
  0x27   : > { %v824_v49 = vcombine.low %v254_v43, %v262_v44  ;;  %s1004_s9 = scalar_lea.vmem %s1055_s2, %s807_s6  ;;  %s1012_s12 = scalar_lea.vmem %s1056_s3, %s807_s6 }
  0x28   : > { %826 = vmatmul.mubr.msk.bf16.vlgmr.msra.gmra.mrb[0].mxu0 %vm343_vm0, %v246_v33  ;;  %827 = vmatmul.mubr.msk.bf16.vlgmr.msra.gmra.mrb[0].mxu1 %vm343_vm0, %v246_v33  ;;  %v675_v50 = vld [vmem:[%s1004_s9] sm:$0xff]  ;;  %v677_v51 = vld [vmem:[%s1004_s9 + $0x10] sm:$0xff]  ;;  %v676_v52 = vld [vmem:[%s1004_s9 + $0x8] sm:$0xff] }
  0x29   : > { %430 = vmatpush1.bf16.msra.mxu0 %v814_v34  ;;  %471 = vmatpush1.bf16.msra.mxu1 %v816_v37  ;;  %v678_v54 = vld [vmem:[%s1004_s9 + $0x18] sm:$0xff]  ;;  %v679_v2 = vld [vmem:[%s1004_s9 + $0x20] sm:$0xff]  ;;  %v681_v3 = vld [vmem:[%s1004_s9 + $0x30] sm:$0xff] }
  0x2a   : > { %461 = vmatprep.mubr.bf16.mxu0 %v886_v16  ;;  %502 = vmatprep.mubr.bf16.mxu1 %v886_v16  ;;  %v680_v4 = vld [vmem:[%s1004_s9 + $0x28] sm:$0xff]  ;;  %v682_v6 = vld [vmem:[%s1004_s9 + $0x38] sm:$0xff]  ;;  %v683_v18 = vld [vmem:[%s1004_s9 + $0x40] sm:$0xff] }
  0x2b   : > { %511 = vmatprep.subr.bf16.mxu0 %v819_v38  ;;  %552 = vmatprep.subr.bf16.mxu1 %v821_v39  ;;  %v685_v19 = vld [vmem:[%s1004_s9 + $0x50] sm:$0xff]  ;;  %v684_v20 = vld [vmem:[%s1004_s9 + $0x48] sm:$0xff]  ;;  %v686_v22 = vld [vmem:[%s1004_s9 + $0x58] sm:$0xff] }
  0x2c   : > { %v687_v34 = vld [vmem:[%s1004_s9 + $0x60] sm:$0xff]  ;;  %v689_v35 = vld [vmem:[%s1004_s9 + $0x70] sm:$0xff]  ;;  %v688_v36 = vld [vmem:[%s1004_s9 + $0x68] sm:$0xff] }
  0x2d   : > { %v690_v38 = vld [vmem:[%s1004_s9 + $0x78] sm:$0xff] }
  0x30   : > { %828 = vmatmul.mubr.msk.bf16.vlgmr.msra.gmra.mrb[4].mxu0 %vm343_vm0, %v246_v33  ;;  %829 = vmatmul.mubr.msk.bf16.vlgmr.msra.gmra.mrb[4].mxu1 %vm343_vm0, %v246_v33 }
  0x31   : > { %512 = vmatpush1.bf16.msra.mxu0 %v818_v42  ;;  %553 = vmatpush1.bf16.msra.mxu1 %v820_v45 }
  0x32   : > { %543 = vmatprep.mubr.bf16.mxu0 %v886_v16  ;;  %584 = vmatprep.mubr.bf16.mxu1 %v886_v16 }
  0x33   : > { %593 = vmatprep.subr.bf16.mxu0 %v823_v46  ;;  %634 = vmatprep.subr.bf16.mxu1 %v825_v47 }
  0x38   : > { %830 = vmatmul.mubr.msk.bf16.vlgmr.msra.gmra.mrb[8].mxu0 %vm343_vm0, %v246_v33  ;;  %831 = vmatmul.mubr.msk.bf16.vlgmr.msra.gmra.mrb[8].mxu1 %vm343_vm0, %v246_v33 }
  0x39   : > { %594 = vmatpush1.bf16.msra.mxu0 %v822_v48  ;;  %635 = vmatpush1.bf16.msra.mxu1 %v824_v49 }
  0x3a   : > { %625 = vmatprep.mubr.bf16.mxu0 %v886_v16  ;;  %666 = vmatprep.mubr.bf16.mxu1 %v886_v16 }
  0x40   : > { %832 = vmatmul.mubr.msk.bf16.vlgmr.msra.gmra.mrb[12].mxu0 %vm343_vm0, %v246_v33  ;;  %833 = vmatmul.mubr.msk.bf16.vlgmr.msra.gmra.mrb[12].mxu1 %vm343_vm0, %v246_v33 }
  0xfb   : > { %v381_v53 = vpop.f32.mrb[0].mxu0  ;;  %v422_v56 = vpop.f32.mrb[0].mxu1 }
  0xfc   : > { %v691_v55 = vmul.f32 %v675_v50, %v381_v53  ;;  %v383_v57 = vpop.f32.mrb[1].mxu0  ;;  %v693_v58 = vmul.f32 %v677_v51, %v422_v56  ;;  %v424_v60 = vpop.f32.mrb[1].mxu1 }
  0xfd   : > { %v692_v59 = vmul.f32 %v676_v52, %v383_v57  ;;  %v385_v61 = vpop.f32.mrb[2].mxu0  ;;  %v694_v62 = vmul.f32 %v678_v54, %v424_v60  ;;  %v426_v63 = vpop.f32.mrb[2].mxu1 }
  0xfe   : > { %707 = vst [vmem:[%s1012_s12] sm:$0xff] %v691_v55  ;;  %v386_v0 = vpop.f32.mrb[3].mxu0  ;;  %709 = vst [vmem:[%s1012_s12 + $0x10] sm:$0xff] %v693_v58  ;;  %v427_v1 = vpop.f32.mrb[3].mxu1 }
  0xff   : > { %708 = vst [vmem:[%s1012_s12 + $0x8] sm:$0xff] %v692_v59  ;;  %710 = vst [vmem:[%s1012_s12 + $0x18] sm:$0xff] %v694_v62 }
 0x103   : > { %v463_v5 = vpop.f32.mrb[4].mxu0  ;;  %v504_v8 = vpop.f32.mrb[4].mxu1 }
 0x104   : > { %v695_v7 = vmul.f32 %v679_v2, %v463_v5  ;;  %v465_v9 = vpop.f32.mrb[5].mxu0  ;;  %v697_v10 = vmul.f32 %v681_v3, %v504_v8  ;;  %v506_v12 = vpop.f32.mrb[5].mxu1 }
 0x105   : > { %v696_v11 = vmul.f32 %v680_v4, %v465_v9  ;;  %v467_v13 = vpop.f32.mrb[6].mxu0  ;;  %v698_v14 = vmul.f32 %v682_v6, %v506_v12  ;;  %v508_v15 = vpop.f32.mrb[6].mxu1 }
 0x106   : > { %711 = vst [vmem:[%s1012_s12 + $0x20] sm:$0xff] %v695_v7  ;;  %v468_v16 = vpop.f32.mrb[7].mxu0  ;;  %713 = vst [vmem:[%s1012_s12 + $0x30] sm:$0xff] %v697_v10  ;;  %v509_v17 = vpop.f32.mrb[7].mxu1 }
 0x107   : > { %712 = vst [vmem:[%s1012_s12 + $0x28] sm:$0xff] %v696_v11  ;;  %714 = vst [vmem:[%s1012_s12 + $0x38] sm:$0xff] %v698_v14 }
 0x10b   : > { %v545_v21 = vpop.f32.mrb[8].mxu0  ;;  %v586_v24 = vpop.f32.mrb[8].mxu1 }
 0x10c   : > { %v699_v23 = vmul.f32 %v683_v18, %v545_v21  ;;  %v547_v25 = vpop.f32.mrb[9].mxu0  ;;  %v701_v26 = vmul.f32 %v685_v19, %v586_v24  ;;  %v588_v28 = vpop.f32.mrb[9].mxu1 }
 0x10d   : > { %v700_v27 = vmul.f32 %v684_v20, %v547_v25  ;;  %v549_v29 = vpop.f32.mrb[10].mxu0  ;;  %v702_v30 = vmul.f32 %v686_v22, %v588_v28  ;;  %v590_v31 = vpop.f32.mrb[10].mxu1 }
 0x10e   : > { %715 = vst [vmem:[%s1012_s12 + $0x40] sm:$0xff] %v699_v23  ;;  %v550_v32 = vpop.f32.mrb[11].mxu0  ;;  %717 = vst [vmem:[%s1012_s12 + $0x50] sm:$0xff] %v701_v26  ;;  %v591_v33 = vpop.f32.mrb[11].mxu1 }
 0x10f   : > { %716 = vst [vmem:[%s1012_s12 + $0x48] sm:$0xff] %v700_v27  ;;  %718 = vst [vmem:[%s1012_s12 + $0x58] sm:$0xff] %v702_v30 }
 0x113   : > { %v627_v37 = vpop.f32.mrb[12].mxu0  ;;  %v668_v40 = vpop.f32.mrb[12].mxu1 }
 0x114   : > { %v703_v39 = vmul.f32 %v687_v34, %v627_v37  ;;  %v629_v41 = vpop.f32.mrb[13].mxu0  ;;  %v705_v42 = vmul.f32 %v689_v35, %v668_v40  ;;  %v670_v44 = vpop.f32.mrb[13].mxu1 }
 0x115   : > { %v704_v43 = vmul.f32 %v688_v36, %v629_v41  ;;  %v631_v45 = vpop.f32.mrb[14].mxu0  ;;  %v706_v46 = vmul.f32 %v690_v38, %v670_v44  ;;  %v672_v47 = vpop.f32.mrb[14].mxu1 }
 0x116   : > { %719 = vst [vmem:[%s1012_s12 + $0x60] sm:$0xff] %v703_v39  ;;  %v632_v48 = vpop.f32.mrb[15].mxu0  ;;  %721 = vst [vmem:[%s1012_s12 + $0x70] sm:$0xff] %v705_v42  ;;  %v673_v49 = vpop.f32.mrb[15].mxu1 }
 0x117   : > { %720 = vst [vmem:[%s1012_s12 + $0x68] sm:$0xff] %v704_v43  ;;  %722 = vst [vmem:[%s1012_s12 + $0x78] sm:$0xff] %v706_v46 }
 0x118 PF: > { %p10_p9 = scmp.ge.s32.totalorder %s924_s16, 4   ;;  %s1057_s12 = smov %s880_s13 }
 0x119   : > { %s1058_s13 = smov %s933_s19  ;;  %s1059_s14 = smov %s924_s16 }
 0x11a   :  { %12 = sbr.rel (!%p10_p9) target bundleno = 2 (0x2), region = 93 }

</bundles_post_ra>
